<compile_context>
chip_gen: v6e
topology: v6e:2x2x1
jax: 0.10.0
libtpu: 0.0.40
codegen_flags: <defaults>
</compile_context>

<pallas_src>
import jax
import jax.numpy as jnp
from jax import lax
from jax.experimental import pallas as pl
from jax.experimental.pallas import tpu as pltpu


def _round_up(x, m):
    return (x + m - 1) // m * m


def _vmem_limit_bytes():
    """Per-generation scoped-VMEM budget with headroom; safe fallback."""
    try:
        info = pltpu.get_tpu_info()
        phys = int(getattr(info, "vmem_capacity_bytes", 0) or 0)
        if phys > 0:
            return int(min(phys * 3 // 4, 100 * 1024 * 1024))
    except Exception:
        pass
    return 64 * 1024 * 1024


# ---------------------------------------------------------------------------
# Tiled matmul (optional bias):  (M, K) @ (K, N) [+ b(1, N)]  ->  (M, N)
# ---------------------------------------------------------------------------
def _matmul_kernel(x_ref, w_ref, o_ref):
    o_ref[...] = jnp.dot(x_ref[...], w_ref[...],
                         preferred_element_type=jnp.float32).astype(o_ref.dtype)


def _matmul_bias_kernel(x_ref, w_ref, b_ref, o_ref):
    o_ref[...] = (jnp.dot(x_ref[...], w_ref[...],
                          preferred_element_type=jnp.float32)
                  + b_ref[...]).astype(o_ref.dtype)


def _pallas_matmul(x, w, *, bias=None, out_dtype=jnp.float32, tm=256, tn=512):
    """x:(M,K) bf16, w:(K,N) bf16 [, bias:(1,N) f32] -> (M,N) out_dtype.
    f32 MXU accumulation.  Grid order is chosen so the LARGER of {x, w} is
    DMA'd from HBM exactly once (its block index follows the outer grid axis).
    """
    M, K = x.shape
    Kw, N = w.shape
    assert K == Kw
    tm = min(tm, _round_up(M, 16))          # bf16 sublane packing
    tn = min(tn, _round_up(N, 128))
    Mp, Kp, Np = _round_up(M, tm), _round_up(K, 128), _round_up(N, tn)
    x = jnp.pad(x, ((0, Mp - M), (0, Kp - K)))
    w = jnp.pad(w, ((0, Kp - K), (0, Np - N)))
    # TODO(synk): K kept whole per tile (fine for embed/hidden <= ~2k); add a K
    # grid axis + accumulator scratch for very large K.
    n_major = w.size > x.size               # vocab projection: W_out read once
    if n_major:
        grid = (Np // tn, Mp // tm)         # M innermost -> re-stream small x
        x_map = lambda j, i: (i, 0)
        w_map = lambda j, i: (0, j)
        o_map = lambda j, i: (i, j)
    else:
        grid = (Mp // tm, Np // tn)         # N innermost -> re-stream small w
        x_map = lambda i, j: (i, 0)
        w_map = lambda i, j: (0, j)
        o_map = lambda i, j: (i, j)

    in_specs = [pl.BlockSpec((tm, Kp), x_map),
                pl.BlockSpec((Kp, tn), w_map)]
    args = [x, w]
    kernel = _matmul_kernel
    if bias is not None:
        b = jnp.pad(bias, ((0, 0), (0, Np - N)))
        in_specs.append(pl.BlockSpec((1, tn), w_map))   # (0, j) block index
        args.append(b)
        kernel = _matmul_bias_kernel

    out = pl.pallas_call(
        kernel,
        out_shape=jax.ShapeDtypeStruct((Mp, Np), out_dtype),
        grid_spec=pltpu.PrefetchScalarGridSpec(
            num_scalar_prefetch=0, grid=grid,
            in_specs=in_specs,
            out_specs=pl.BlockSpec((tm, tn), o_map)),
        compiler_params=pltpu.CompilerParams(
            dimension_semantics=("parallel", "parallel"),
            vmem_limit_bytes=_vmem_limit_bytes()),
    )(*args)
    return out[:M, :N]


# ---------------------------------------------------------------------------
# LSTM recurrence: time-chunked grid, h/c in VMEM scratch, W_hh single-buffered.
# ---------------------------------------------------------------------------
def _lstm_recurrence_kernel(gx_ref, b_ref, whh_hbm, hs_ref,
                            whh_vmem, h_sc, c_sc, dma_sem):
    """gx_ref  : (tt, tb, 4Hp) bf16   precomputed x @ W_ih^T (no bias)
       b_ref   : (1, 4Hp)      f32    b_ih + b_hh
       whh_hbm : (Hp, 4Hp)     bf16   hidden->gate weights (HBM)
       hs_ref  : (tt, tb, Hp)  bf16   hidden states out
       whh_vmem/h_sc/c_sc VMEM scratch; dma_sem DMA semaphore
    """
    tt = gx_ref.shape[0]
    Hp = whh_vmem.shape[0]

    @pl.when(pl.program_id(1) == 0)          # first time chunk of this batch tile
    def _init():
        cp = pltpu.make_async_copy(whh_hbm, whh_vmem, dma_sem)
        cp.start()
        cp.wait()                             # W_hh resident, single-buffered
        h_sc[...] = jnp.zeros_like(h_sc)
        c_sc[...] = jnp.zeros_like(c_sc)

    bias = b_ref[...]                         # (1, 4Hp) f32

    def step(t, carry):
        h = h_sc[...]                         # (tb, Hp) f32
        c = c_sc[...]
        gates = (gx_ref[t].astype(jnp.float32) + bias
                 + jnp.dot(h.astype(whh_vmem.dtype), whh_vmem[...],
                           preferred_element_type=jnp.float32))   # (tb, 4Hp)
        # PyTorch gate order: input, forget, cell(g), output — Hp lane-aligned.
        i_g = jax.nn.sigmoid(gates[:, 0 * Hp:1 * Hp])
        f_g = jax.nn.sigmoid(gates[:, 1 * Hp:2 * Hp])
        g_g = jnp.tanh(gates[:, 2 * Hp:3 * Hp])
        o_g = jax.nn.sigmoid(gates[:, 3 * Hp:4 * Hp])
        c_new = f_g * c + i_g * g_g
        h_new = o_g * jnp.tanh(c_new)
        hs_ref[t] = h_new.astype(hs_ref.dtype)    # bf16 write-back
        h_sc[...] = h_new
        c_sc[...] = c_new
        return carry

    lax.fori_loop(0, tt, step, 0, unroll=(tt <= 8))


def _lstm_recurrence(gx_tm, b_gates, w_hh_bf16, *, tb, tt):
    T_pad, Bp, G = gx_tm.shape
    Hp = w_hh_bf16.shape[0]
    assert G == 4 * Hp and Bp % tb == 0 and T_pad % tt == 0
    return pl.pallas_call(
        _lstm_recurrence_kernel,
        out_shape=jax.ShapeDtypeStruct((T_pad, Bp, Hp), jnp.bfloat16),
        grid_spec=pltpu.PrefetchScalarGridSpec(
            num_scalar_prefetch=0,
            grid=(Bp // tb, T_pad // tt),          # sequential time axis last
            in_specs=[
                pl.BlockSpec((tt, tb, G), lambda bt, tc: (tc, bt, 0)),
                pl.BlockSpec((1, G), lambda bt, tc: (0, 0)),
                pl.BlockSpec(memory_space=pl.ANY),     # W_hh stays in HBM
            ],
            out_specs=pl.BlockSpec((tt, tb, Hp), lambda bt, tc: (tc, bt, 0)),
            scratch_shapes=[
                pltpu.VMEM((Hp, G), w_hh_bf16.dtype),  # single-buffered W_hh
                pltpu.VMEM((tb, Hp), jnp.float32),     # h carry
                pltpu.VMEM((tb, Hp), jnp.float32),     # c carry
                pltpu.SemaphoreType.DMA(()),
            ]),
        compiler_params=pltpu.CompilerParams(
            dimension_semantics=("parallel", "arbitrary"),
            vmem_limit_bytes=_vmem_limit_bytes()),
    )(gx_tm, b_gates, w_hh_bf16)


# ---------------------------------------------------------------------------
# Wrapper
# ---------------------------------------------------------------------------
def _pad_gate_cols(a, H, Hp):
    """Pad trailing 4*H gate axis to 4*Hp, zero-padding each gate block."""
    lead = a.shape[:-1]
    a4 = a.reshape(lead + (4, H))
    pad = [(0, 0)] * (a4.ndim - 1) + [(0, Hp - H)]
    return jnp.pad(a4, pad).reshape(lead + (4 * Hp,))


def _pick_batch_tile(B):
    """Batch tile (multiple of 16): <=256 rows (v6e/v7x MXU fill), prefer >=2
    tiles so both v7x TensorCores get recurrence work."""
    Bp = _round_up(B, 16)
    if Bp <= 16:
        return 16, Bp
    tb = min(256, _round_up((Bp + 1) // 2, 16))
    return tb, _round_up(Bp, tb)


def decoder_rnn_forward(params, features, captions):
    """features: (B, E) f32, captions: (B, Tcap) int32 -> logits (B, Tcap, V)."""
    embed_w = params["embed"]          # (V, E)
    w_ih_t = params["w_ih_t"]          # (E, 4H)   (PyTorch W_ih transposed)
    w_hh_t = params["w_hh_t"]          # (H, 4H)   (PyTorch W_hh transposed)
    b_gates = params["b_gates"]        # (1, 4H)   = b_ih + b_hh
    w_out_t = params["w_out_t"]        # (H, V)    (PyTorch W_out transposed)
    b_out = params["b_out"]            # (1, V)

    B, E = features.shape
    H = w_hh_t.shape[0]
    V = w_out_t.shape[1]

    # glue (XLA): embedding gather + concat image features as the t=0 input.
    # TODO(synk): could be fused into the gates matmul via scalar-prefetched ids
    # + pl.Element row gather on embed_w; left to XLA here.
    cap = captions[:, :-1]
    embedded = jnp.take(embed_w, cap, axis=0)                     # (B, T-1, E)
    inputs = jnp.concatenate([features[:, None, :], embedded], axis=1)
    T = inputs.shape[1]

    # TPU-friendly padding / tiling.
    Hp = _round_up(H, 128)
    tb, Bp = _pick_batch_tile(B)
    # Time chunk: cap the bf16 gx chunk near ~6 MiB so the recurrence's
    # double-buffered working set stays well under v7x's 64 MiB VMEM.
    bytes_per_step = tb * 4 * Hp * 2
    tt = max(1, min(T, (6 << 20) // bytes_per_step))
    T_pad = _round_up(T, tt)

    inputs_p = jnp.pad(inputs, ((0, Bp - B), (0, 0), (0, 0)))     # (Bp, T, E)
    inputs_tm = jnp.transpose(inputs_p, (1, 0, 2))                # (T, Bp, E)
    inputs_tm = jnp.pad(inputs_tm, ((0, T_pad - T), (0, 0), (0, 0)))

    w_ih_p = _pad_gate_cols(w_ih_t, H, Hp)                        # (E, 4Hp)
    w_hh_p = jnp.pad(_pad_gate_cols(w_hh_t, H, Hp), ((0, Hp - H), (0, 0)))
    b_gates_p = _pad_gate_cols(b_gates, H, Hp).astype(jnp.float32)
    w_out_p = jnp.pad(w_out_t, ((0, Hp - H), (0, 0)))             # (Hp, V)

    bf16 = jnp.bfloat16

    # 1) input-side gates for ALL timesteps in one MXU matmul; bf16 storage,
    #    bias is added in f32 inside the recurrence.
    x2d = inputs_tm.reshape(T_pad * Bp, E).astype(bf16)
    gx = _pallas_matmul(x2d, w_ih_p.astype(bf16), out_dtype=bf16)
    gx_tm = gx.reshape(T_pad, Bp, 4 * Hp)

    # 2) sequential LSTM recurrence (time-chunked grid, h/c in VMEM scratch).
    hs_tm = _lstm_recurrence(gx_tm, b_gates_p, w_hh_p.astype(bf16), tb=tb, tt=tt)

    # 3) vocab projection.  Transpose the SMALL bf16 hs tensor to batch-major
    #    (instead of the huge f32 logits) so the projection writes (B,T,V)
    #    directly; W_out is streamed from HBM exactly once (n-major grid).
    hs_bt = jnp.transpose(hs_tm[:T], (1, 0, 2)).reshape(Bp * T, Hp)   # bf16
    logits2d = _pallas_matmul(hs_bt, w_out_p.astype(bf16),
                              bias=b_out.astype(jnp.float32),
                              out_dtype=jnp.float32)
    return logits2d.reshape(Bp, T, V)[:B]                         # (B, T, V)


# ---------------------------------------------------------------------------
# Pure-JAX reference mirroring the declared precision choices
# (bf16 matmul operands, f32 accumulation, bf16-stored gx / hs).
# ---------------------------------------------------------------------------
def _reference_forward(params, features, captions):
    bf16 = jnp.bfloat16
    embed_w = params["embed"]
    w_ih = params["w_ih_t"].astype(bf16)
    w_hh = params["w_hh_t"].astype(bf16)
    b_gates = params["b_gates"][0]
    w_out = params["w_out_t"].astype(bf16)
    b_out = params["b_out"][0]
    H = params["w_hh_t"].shape[0]

    cap = captions[:, :-1]
    embedded = jnp.take(embed_w, cap, axis=0)
    inputs = jnp.concatenate([features[:, None, :], embedded], axis=1)
    B = inputs.shape[0]

    def step(carry, x_t):
        h, c = carry
        gx = jnp.dot(x_t.astype(bf16), w_ih, preferred_element_type=jnp.float32)
        gx = gx.astype(bf16).astype(jnp.float32)        # kernel stores gx in bf16
        gates = (gx + b_gates
                 + jnp.dot(h.astype(bf16), w_hh, preferred_element_type=jnp.float32))
        i = jax.nn.sigmoid(gates[:, 0 * H:1 * H])
        f = jax.nn.sigmoid(gates[:, 1 * H:2 * H])
        g = jnp.tanh(gates[:, 2 * H:3 * H])
        o = jax.nn.sigmoid(gates[:, 3 * H:4 * H])
        c = f * c + i * g
        h = o * jnp.tanh(c)
        return (h, c), h

    init = (jnp.zeros((B, H), jnp.float32), jnp.zeros((B, H), jnp.float32))
    _, hs = lax.scan(step, init, jnp.transpose(inputs, (1, 0, 2)))
    hs = jnp.transpose(hs, (1, 0, 2))                              # (B, T, H)
    return jnp.dot(hs.astype(bf16), w_out,
                   preferred_element_type=jnp.float32) + b_out


def init_params(key, embed_size, hidden_size, vocab_size):
    ks = jax.random.split(key, 7)
    s = 0.1
    return {
        "embed":   s * jax.random.normal(ks[0], (vocab_size, embed_size), jnp.float32),
        # stored pre-transposed relative to PyTorch's (4H, E)/(4H, H)
        "w_ih_t":  s * jax.random.normal(ks[1], (embed_size, 4 * hidden_size), jnp.float32),
        "w_hh_t":  s * jax.random.normal(ks[2], (hidden_size, 4 * hidden_size), jnp.float32),
        "b_gates": s * jax.random.normal(ks[3], (1, 4 * hidden_size), jnp.float32),
        "w_out_t": s * jax.random.normal(ks[4], (hidden_size, vocab_size), jnp.float32),
        "b_out":   s * jax.random.normal(ks[5], (1, vocab_size), jnp.float32),
    }


if __name__ == "__main__":
    # small shapes: batch=2, embed=32, hidden=32, vocab=128, caption length=8
    B, E, H, V, T_CAP = 2, 32, 32, 128, 8
    key = jax.random.PRNGKey(0)
    k_feat, k_cap, k_param = jax.random.split(key, 3)

    params = init_params(k_param, E, H, V)
    features = jax.random.normal(k_feat, (B, E), jnp.float32)
    captions = jax.random.randint(k_cap, (B, T_CAP), 0, V, dtype=jnp.int32)

    fwd = jax.jit(decoder_rnn_forward)
    out = jax.block_until_ready(fwd(params, features, captions))

    ref = jax.block_until_ready(_reference_forward(params, features, captions))
    assert out.shape == (B, T_CAP, V)
    max_err = float(jnp.max(jnp.abs(out - ref)))
    assert jnp.allclose(out, ref, atol=2e-3, rtol=2e-3), \
        f"mismatch vs reference (max abs err {max_err})"

    # NOTE: nn.LSTM dropout=0.2 is a no-op with num_layers=1 (inter-layer only).
    # TODO(synk): sample() (greedy autoregressive decode with data-dependent
    # early stop) is not part of forward() and is left unimplemented.
    print("KERNEL_OK")
</pallas_src>

<mosaic_0001>
module attributes {stable_mosaic.version = 11 : i64} {
  func.func @_matmul_kernel(%arg0: i32, %arg1: i32, %arg2: memref<128x128xbf16, #tpu.memory_space<vmem>>, %arg3: memref<128x512xbf16, #tpu.memory_space<vmem>>, %arg4: memref<128x512xbf16, #tpu.memory_space<vmem>>) attributes {dimension_semantics = [#tpu.dimension_semantics<parallel>, #tpu.dimension_semantics<parallel>], iteration_bounds = array<i64: 1, 1>, scalar_prefetch = 0 : i64, scratch_operands = 0 : i64, tpu.core_type = #tpu.core_type<tc>, window_params = [{transform_indices = @transform_0, window_bounds = array<i64: 128, 128>}, {transform_indices = @transform_1, window_bounds = array<i64: 128, 512>}, {transform_indices = @transform_2, window_bounds = array<i64: 128, 512>}]} {
    %c0 = arith.constant 0 : index
    %c0_0 = arith.constant 0 : index
    %0 = vector.load %arg2[%c0, %c0_0] : memref<128x128xbf16, #tpu.memory_space<vmem>>, vector<128x128xbf16>
    %c0_1 = arith.constant 0 : index
    %c0_2 = arith.constant 0 : index
    %1 = vector.load %arg3[%c0_1, %c0_2] : memref<128x512xbf16, #tpu.memory_space<vmem>>, vector<128x512xbf16>
    %cst = arith.constant dense<0.000000e+00> : vector<128x512xf32>
    %2 = tpu.matmul %0, %1, %cst {dimension_numbers = #tpu.dot_dimension_numbers<[1], [0], [0], [1], [0, 0, 1, 1], [], []>} : vector<128x128xbf16>, vector<128x512xbf16>, vector<128x512xf32> -> vector<128x512xf32>
    %3 = arith.truncf %2 : vector<128x512xf32> to vector<128x512xbf16>
    %c0_3 = arith.constant 0 : index
    %c0_4 = arith.constant 0 : index
    %4 = vector.load %arg4[%c0_3, %c0_4] : memref<128x512xbf16, #tpu.memory_space<vmem>>, vector<128x512xbf16>
    tpu.vector_store %arg4[%c0_3, %c0_4], %3 {strides = array<i32>} : memref<128x512xbf16, #tpu.memory_space<vmem>>, vector<128x512xbf16>,
    return
  }
  func.func @transform_0(%arg0: i32, %arg1: i32) -> (i32, i32) {
    %c0_i32 = arith.constant 0 : i32
    %c0_i32_0 = arith.constant 0 : i32
    return %arg1, %c0_i32 : i32, i32
  }
  func.func @transform_1(%arg0: i32, %arg1: i32) -> (i32, i32) {
    %c0_i32 = arith.constant 0 : i32
    %c0_i32_0 = arith.constant 0 : i32
    return %c0_i32, %arg0 : i32, i32
  }
  func.func @transform_2(%arg0: i32, %arg1: i32) -> (i32, i32) {
    %c0_i32 = arith.constant 0 : i32
    return %arg1, %arg0 : i32, i32
  }
}

module attributes {stable_mosaic.version = 11 : i64} {
  func.func @_matmul_bias_kernel(%arg0: i32, %arg1: i32, %arg2: memref<128x128xbf16, #tpu.memory_space<vmem>>, %arg3: memref<128x128xbf16, #tpu.memory_space<vmem>>, %arg4: memref<1x128xf32, #tpu.memory_space<vmem>>, %arg5: memref<128x128xf32, #tpu.memory_space<vmem>>) attributes {dimension_semantics = [#tpu.dimension_semantics<parallel>, #tpu.dimension_semantics<parallel>], iteration_bounds = array<i64: 1, 1>, scalar_prefetch = 0 : i64, scratch_operands = 0 : i64, tpu.core_type = #tpu.core_type<tc>, window_params = [{transform_indices = @transform_0, window_bounds = array<i64: 128, 128>}, {transform_indices = @transform_1, window_bounds = array<i64: 128, 128>}, {transform_indices = @transform_2, window_bounds = array<i64: 1, 128>}, {transform_indices = @transform_3, window_bounds = array<i64: 128, 128>}]} {
    %c0 = arith.constant 0 : index
    %c0_0 = arith.constant 0 : index
    %0 = vector.load %arg2[%c0, %c0_0] : memref<128x128xbf16, #tpu.memory_space<vmem>>, vector<128x128xbf16>
    %c0_1 = arith.constant 0 : index
    %c0_2 = arith.constant 0 : index
    %1 = vector.load %arg3[%c0_1, %c0_2] : memref<128x128xbf16, #tpu.memory_space<vmem>>, vector<128x128xbf16>
    %cst = arith.constant dense<0.000000e+00> : vector<128x128xf32>
    %2 = tpu.matmul %0, %1, %cst {dimension_numbers = #tpu.dot_dimension_numbers<[1], [0], [0], [1], [0, 0, 1, 1], [], []>} : vector<128x128xbf16>, vector<128x128xbf16>, vector<128x128xf32> -> vector<128x128xf32>
    %c0_3 = arith.constant 0 : index
    %c0_4 = arith.constant 0 : index
    %3 = vector.load %arg4[%c0_3, %c0_4] : memref<1x128xf32, #tpu.memory_space<vmem>>, vector<1x128xf32>
    %4 = vector.broadcast %3 : vector<1x128xf32> to vector<128x128xf32>
    %5 = arith.addf %2, %4 : vector<128x128xf32>
    %c0_5 = arith.constant 0 : index
    %c0_6 = arith.constant 0 : index
    %6 = vector.load %arg5[%c0_5, %c0_6] : memref<128x128xf32, #tpu.memory_space<vmem>>, vector<128x128xf32>
    tpu.vector_store %arg5[%c0_5, %c0_6], %5 {strides = array<i32>} : memref<128x128xf32, #tpu.memory_space<vmem>>, vector<128x128xf32>,
    return
  }
  func.func @transform_0(%arg0: i32, %arg1: i32) -> (i32, i32) {
    %c0_i32 = arith.constant 0 : i32
    %c0_i32_0 = arith.constant 0 : i32
    return %arg0, %c0_i32 : i32, i32
  }
  func.func @transform_1(%arg0: i32, %arg1: i32) -> (i32, i32) {
    %c0_i32 = arith.constant 0 : i32
    %c0_i32_0 = arith.constant 0 : i32
    return %c0_i32, %arg1 : i32, i32
  }
  func.func @transform_2(%arg0: i32, %arg1: i32) -> (i32, i32) {
    %c0_i32 = arith.constant 0 : i32
    %c0_i32_0 = arith.constant 0 : i32
    return %c0_i32, %arg1 : i32, i32
  }
  func.func @transform_3(%arg0: i32, %arg1: i32) -> (i32, i32) {
    %c0_i32 = arith.constant 0 : i32
    return %arg0, %arg1 : i32, i32
  }
}

module attributes {stable_mosaic.version = 11 : i64} {
  func.func @_lstm_recurrence_kernel(%arg0: i32, %arg1: i32, %arg2: memref<8x16x512xbf16, #tpu.memory_space<vmem>>, %arg3: memref<1x512xf32, #tpu.memory_space<vmem>>, %arg4: memref<128x512xbf16, #tpu.memory_space<any>>, %arg5: memref<8x16x128xbf16, #tpu.memory_space<vmem>>, %arg6: memref<128x512xbf16, #tpu.memory_space<vmem>>, %arg7: memref<16x128xf32, #tpu.memory_space<vmem>>, %arg8: memref<16x128xf32, #tpu.memory_space<vmem>>, %arg9: memref<!tpu.dma_semaphore, #tpu.memory_space<semaphore_mem>>) attributes {dimension_semantics = [#tpu.dimension_semantics<parallel>, #tpu.dimension_semantics<arbitrary>], iteration_bounds = array<i64: 1, 1>, scalar_prefetch = 0 : i64, scratch_operands = 4 : i64, tpu.core_type = #tpu.core_type<tc>, window_params = [{transform_indices = @transform_0, window_bounds = array<i64: 8, 16, 512>}, {pipeline_mode = #tpu.pipeline_mode<synchronous>, transform_indices = @transform_1, window_bounds = array<i64: 1, 512>}, {}, {transform_indices = @transform_3, window_bounds = array<i64: 8, 16, 128>}]} {
    %c0_i32 = arith.constant 0 : i32
    %0 = arith.cmpi eq, %arg1, %c0_i32 : i32
    %1 = arith.extui %0 : i1 to i32
    %c0_i32_0 = arith.constant 0 : i32
    %2 = arith.cmpi ne, %1, %c0_i32_0 : i32
    scf.if %2 {
      tpu.enqueue_dma source(%arg4 : memref<128x512xbf16, #tpu.memory_space<any>>) target(%arg6 : memref<128x512xbf16, #tpu.memory_space<vmem>>) target_semaphore(%arg9 : memref<!tpu.dma_semaphore, #tpu.memory_space<semaphore_mem>>)
      tpu.wait_dma2 semaphore(%arg9 : memref<!tpu.dma_semaphore, #tpu.memory_space<semaphore_mem>>) src(%arg4 : memref<128x512xbf16, #tpu.memory_space<any>>) dst(%arg6 : memref<128x512xbf16, #tpu.memory_space<vmem>>)
      %cst_146 = arith.constant 0.000000e+00 : f32
      %356 = vector.broadcast %cst_146 : f32 to vector<16x128xf32>
      %c0_147 = arith.constant 0 : index
      %c0_148 = arith.constant 0 : index
      %357 = vector.load %arg7[%c0_147, %c0_148] : memref<16x128xf32, #tpu.memory_space<vmem>>, vector<16x128xf32>
      tpu.vector_store %arg7[%c0_147, %c0_148], %356 {strides = array<i32>} : memref<16x128xf32, #tpu.memory_space<vmem>>, vector<16x128xf32>,
      %cst_149 = arith.constant 0.000000e+00 : f32
      %358 = vector.broadcast %cst_149 : f32 to vector<16x128xf32>
      %c0_150 = arith.constant 0 : index
      %c0_151 = arith.constant 0 : index
      %359 = vector.load %arg8[%c0_150, %c0_151] : memref<16x128xf32, #tpu.memory_space<vmem>>, vector<16x128xf32>
      tpu.vector_store %arg8[%c0_150, %c0_151], %358 {strides = array<i32>} : memref<16x128xf32, #tpu.memory_space<vmem>>, vector<16x128xf32>,
    } else {
    }
    %c0 = arith.constant 0 : index
    %c0_1 = arith.constant 0 : index
    %3 = vector.load %arg3[%c0, %c0_1] : memref<1x512xf32, #tpu.memory_space<vmem>>, vector<1x512xf32>
    %c0_i32_2 = arith.constant 0 : i32
    %c0_3 = arith.constant 0 : index
    %c0_4 = arith.constant 0 : index
    %4 = vector.load %arg7[%c0_3, %c0_4] : memref<16x128xf32, #tpu.memory_space<vmem>>, vector<16x128xf32>
    %c0_5 = arith.constant 0 : index
    %c0_6 = arith.constant 0 : index
    %5 = vector.load %arg8[%c0_5, %c0_6] : memref<16x128xf32, #tpu.memory_space<vmem>>, vector<16x128xf32>
    %6 = arith.index_cast %c0_i32_2 : i32 to index
    %c0_7 = arith.constant 0 : index
    %c0_8 = arith.constant 0 : index
    %7 = vector.load %arg2[%6, %c0_7, %c0_8] : memref<8x16x512xbf16, #tpu.memory_space<vmem>>, vector<1x16x512xbf16>
    %8 = vector.shape_cast %7 : vector<1x16x512xbf16> to vector<16x512xbf16>
    %9 = arith.extf %8 : vector<16x512xbf16> to vector<16x512xf32>
    %10 = vector.broadcast %3 : vector<1x512xf32> to vector<16x512xf32>
    %11 = arith.addf %9, %10 : vector<16x512xf32>
    %12 = arith.truncf %4 : vector<16x128xf32> to vector<16x128xbf16>
    %c0_9 = arith.constant 0 : index
    %c0_10 = arith.constant 0 : index
    %13 = vector.load %arg6[%c0_9, %c0_10] : memref<128x512xbf16, #tpu.memory_space<vmem>>, vector<128x512xbf16>
    %cst = arith.constant dense<0.000000e+00> : vector<16x512xf32>
    %14 = tpu.matmul %12, %13, %cst {dimension_numbers = #tpu.dot_dimension_numbers<[1], [0], [0], [1], [0, 0, 1, 1], [], []>} : vector<16x128xbf16>, vector<128x512xbf16>, vector<16x512xf32> -> vector<16x512xf32>
    %15 = arith.addf %11, %14 : vector<16x512xf32>
    %16 = vector.extract_strided_slice %15 {offsets = [0, 0], sizes = [16, 128], strides = [1, 1]} : vector<16x512xf32> to vector<16x128xf32>
    %17 = arith.negf %16 : vector<16x128xf32>
    %18 = math.exp %17 : vector<16x128xf32>
    %cst_11 = arith.constant 1.000000e+00 : f32
    %19 = vector.broadcast %cst_11 : f32 to vector<16x128xf32>
    %20 = arith.addf %19, %18 : vector<16x128xf32>
    %21 = arith.divf %19, %20 : vector<16x128xf32>
    %22 = vector.extract_strided_slice %15 {offsets = [0, 128], sizes = [16, 128], strides = [1, 1]} : vector<16x512xf32> to vector<16x128xf32>
    %23 = arith.negf %22 : vector<16x128xf32>
    %24 = math.exp %23 : vector<16x128xf32>
    %cst_12 = arith.constant 1.000000e+00 : f32
    %25 = vector.broadcast %cst_12 : f32 to vector<16x128xf32>
    %26 = arith.addf %25, %24 : vector<16x128xf32>
    %27 = arith.divf %25, %26 : vector<16x128xf32>
    %28 = vector.extract_strided_slice %15 {offsets = [0, 256], sizes = [16, 128], strides = [1, 1]} : vector<16x512xf32> to vector<16x128xf32>
    %29 = math.tanh %28 : vector<16x128xf32>
    %30 = vector.extract_strided_slice %15 {offsets = [0, 384], sizes = [16, 128], strides = [1, 1]} : vector<16x512xf32> to vector<16x128xf32>
    %31 = arith.negf %30 : vector<16x128xf32>
    %32 = math.exp %31 : vector<16x128xf32>
    %cst_13 = arith.constant 1.000000e+00 : f32
    %33 = vector.broadcast %cst_13 : f32 to vector<16x128xf32>
    %34 = arith.addf %33, %32 : vector<16x128xf32>
    %35 = arith.divf %33, %34 : vector<16x128xf32>
    %36 = arith.mulf %27, %5 : vector<16x128xf32>
    %37 = arith.mulf %21, %29 : vector<16x128xf32>
    %38 = arith.addf %36, %37 : vector<16x128xf32>
    %39 = math.tanh %38 : vector<16x128xf32>
    %40 = arith.mulf %35, %39 : vector<16x128xf32>
    %41 = arith.truncf %40 : vector<16x128xf32> to vector<16x128xbf16>
    %42 = arith.index_cast %c0_i32_2 : i32 to index
    %c0_14 = arith.constant 0 : index
    %c0_15 = arith.constant 0 : index
    %43 = vector.load %arg5[%42, %c0_14, %c0_15] : memref<8x16x128xbf16, #tpu.memory_space<vmem>>, vector<1x16x128xbf16>
    %44 = vector.shape_cast %43 : vector<1x16x128xbf16> to vector<16x128xbf16>
    %45 = vector.shape_cast %41 : vector<16x128xbf16> to vector<1x16x128xbf16>
    tpu.vector_store %arg5[%42, %c0_14, %c0_15], %45 {strides = array<i32>} : memref<8x16x128xbf16, #tpu.memory_space<vmem>>, vector<1x16x128xbf16>,
    %c0_16 = arith.constant 0 : index
    %c0_17 = arith.constant 0 : index
    %46 = vector.load %arg7[%c0_16, %c0_17] : memref<16x128xf32, #tpu.memory_space<vmem>>, vector<16x128xf32>
    tpu.vector_store %arg7[%c0_16, %c0_17], %40 {strides = array<i32>} : memref<16x128xf32, #tpu.memory_space<vmem>>, vector<16x128xf32>,
    %c0_18 = arith.constant 0 : index
    %c0_19 = arith.constant 0 : index
    %47 = vector.load %arg8[%c0_18, %c0_19] : memref<16x128xf32, #tpu.memory_space<vmem>>, vector<16x128xf32>
    tpu.vector_store %arg8[%c0_18, %c0_19], %38 {strides = array<i32>} : memref<16x128xf32, #tpu.memory_space<vmem>>, vector<16x128xf32>,
    %c1_i32 = arith.constant 1 : i32
    %c0_20 = arith.constant 0 : index
    %c0_21 = arith.constant 0 : index
    %48 = vector.load %arg7[%c0_20, %c0_21] : memref<16x128xf32, #tpu.memory_space<vmem>>, vector<16x128xf32>
    %c0_22 = arith.constant 0 : index
    %c0_23 = arith.constant 0 : index
    %49 = vector.load %arg8[%c0_22, %c0_23] : memref<16x128xf32, #tpu.memory_space<vmem>>, vector<16x128xf32>
    %50 = arith.index_cast %c1_i32 : i32 to index
    %c0_24 = arith.constant 0 : index
    %c0_25 = arith.constant 0 : index
    %51 = vector.load %arg2[%50, %c0_24, %c0_25] : memref<8x16x512xbf16, #tpu.memory_space<vmem>>, vector<1x16x512xbf16>
    %52 = vector.shape_cast %51 : vector<1x16x512xbf16> to vector<16x512xbf16>
    %53 = arith.extf %52 : vector<16x512xbf16> to vector<16x512xf32>
    %54 = vector.broadcast %3 : vector<1x512xf32> to vector<16x512xf32>
    %55 = arith.addf %53, %54 : vector<16x512xf32>
    %56 = arith.truncf %48 : vector<16x128xf32> to vector<16x128xbf16>
    %c0_26 = arith.constant 0 : index
    %c0_27 = arith.constant 0 : index
    %57 = vector.load %arg6[%c0_26, %c0_27] : memref<128x512xbf16, #tpu.memory_space<vmem>>, vector<128x512xbf16>
    %cst_28 = arith.constant dense<0.000000e+00> : vector<16x512xf32>
    %58 = tpu.matmul %56, %57, %cst_28 {dimension_numbers = #tpu.dot_dimension_numbers<[1], [0], [0], [1], [0, 0, 1, 1], [], []>} : vector<16x128xbf16>, vector<128x512xbf16>, vector<16x512xf32> -> vector<16x512xf32>
    %59 = arith.addf %55, %58 : vector<16x512xf32>
    %60 = vector.extract_strided_slice %59 {offsets = [0, 0], sizes = [16, 128], strides = [1, 1]} : vector<16x512xf32> to vector<16x128xf32>
    %61 = arith.negf %60 : vector<16x128xf32>
    %62 = math.exp %61 : vector<16x128xf32>
    %cst_29 = arith.constant 1.000000e+00 : f32
    %63 = vector.broadcast %cst_29 : f32 to vector<16x128xf32>
    %64 = arith.addf %63, %62 : vector<16x128xf32>
    %65 = arith.divf %63, %64 : vector<16x128xf32>
    %66 = vector.extract_strided_slice %59 {offsets = [0, 128], sizes = [16, 128], strides = [1, 1]} : vector<16x512xf32> to vector<16x128xf32>
    %67 = arith.negf %66 : vector<16x128xf32>
    %68 = math.exp %67 : vector<16x128xf32>
    %cst_30 = arith.constant 1.000000e+00 : f32
    %69 = vector.broadcast %cst_30 : f32 to vector<16x128xf32>
    %70 = arith.addf %69, %68 : vector<16x128xf32>
    %71 = arith.divf %69, %70 : vector<16x128xf32>
    %72 = vector.extract_strided_slice %59 {offsets = [0, 256], sizes = [16, 128], strides = [1, 1]} : vector<16x512xf32> to vector<16x128xf32>
    %73 = math.tanh %72 : vector<16x128xf32>
    %74 = vector.extract_strided_slice %59 {offsets = [0, 384], sizes = [16, 128], strides = [1, 1]} : vector<16x512xf32> to vector<16x128xf32>
    %75 = arith.negf %74 : vector<16x128xf32>
    %76 = math.exp %75 : vector<16x128xf32>
    %cst_31 = arith.constant 1.000000e+00 : f32
    %77 = vector.broadcast %cst_31 : f32 to vector<16x128xf32>
    %78 = arith.addf %77, %76 : vector<16x128xf32>
    %79 = arith.divf %77, %78 : vector<16x128xf32>
    %80 = arith.mulf %71, %49 : vector<16x128xf32>
    %81 = arith.mulf %65, %73 : vector<16x128xf32>
    %82 = arith.addf %80, %81 : vector<16x128xf32>
    %83 = math.tanh %82 : vector<16x128xf32>
    %84 = arith.mulf %79, %83 : vector<16x128xf32>
    %85 = arith.truncf %84 : vector<16x128xf32> to vector<16x128xbf16>
    %86 = arith.index_cast %c1_i32 : i32 to index
    %c0_32 = arith.constant 0 : index
    %c0_33 = arith.constant 0 : index
    %87 = vector.load %arg5[%86, %c0_32, %c0_33] : memref<8x16x128xbf16, #tpu.memory_space<vmem>>, vector<1x16x128xbf16>
    %88 = vector.shape_cast %87 : vector<1x16x128xbf16> to vector<16x128xbf16>
    %89 = vector.shape_cast %85 : vector<16x128xbf16> to vector<1x16x128xbf16>
    tpu.vector_store %arg5[%86, %c0_32, %c0_33], %89 {strides = array<i32>} : memref<8x16x128xbf16, #tpu.memory_space<vmem>>, vector<1x16x128xbf16>,
    %c0_34 = arith.constant 0 : index
    %c0_35 = arith.constant 0 : index
    %90 = vector.load %arg7[%c0_34, %c0_35] : memref<16x128xf32, #tpu.memory_space<vmem>>, vector<16x128xf32>
    tpu.vector_store %arg7[%c0_34, %c0_35], %84 {strides = array<i32>} : memref<16x128xf32, #tpu.memory_space<vmem>>, vector<16x128xf32>,
    %c0_36 = arith.constant 0 : index
    %c0_37 = arith.constant 0 : index
    %91 = vector.load %arg8[%c0_36, %c0_37] : memref<16x128xf32, #tpu.memory_space<vmem>>, vector<16x128xf32>
    tpu.vector_store %arg8[%c0_36, %c0_37], %82 {strides = array<i32>} : memref<16x128xf32, #tpu.memory_space<vmem>>, vector<16x128xf32>,
    %c2_i32 = arith.constant 2 : i32
    %c0_38 = arith.constant 0 : index
    %c0_39 = arith.constant 0 : index
    %92 = vector.load %arg7[%c0_38, %c0_39] : memref<16x128xf32, #tpu.memory_space<vmem>>, vector<16x128xf32>
    %c0_40 = arith.constant 0 : index
    %c0_41 = arith.constant 0 : index
    %93 = vector.load %arg8[%c0_40, %c0_41] : memref<16x128xf32, #tpu.memory_space<vmem>>, vector<16x128xf32>
    %94 = arith.index_cast %c2_i32 : i32 to index
    %c0_42 = arith.constant 0 : index
    %c0_43 = arith.constant 0 : index
    %95 = vector.load %arg2[%94, %c0_42, %c0_43] : memref<8x16x512xbf16, #tpu.memory_space<vmem>>, vector<1x16x512xbf16>
    %96 = vector.shape_cast %95 : vector<1x16x512xbf16> to vector<16x512xbf16>
    %97 = arith.extf %96 : vector<16x512xbf16> to vector<16x512xf32>
    %98 = vector.broadcast %3 : vector<1x512xf32> to vector<16x512xf32>
    %99 = arith.addf %97, %98 : vector<16x512xf32>
    %100 = arith.truncf %92 : vector<16x128xf32> to vector<16x128xbf16>
    %c0_44 = arith.constant 0 : index
    %c0_45 = arith.constant 0 : index
    %101 = vector.load %arg6[%c0_44, %c0_45] : memref<128x512xbf16, #tpu.memory_space<vmem>>, vector<128x512xbf16>
    %cst_46 = arith.constant dense<0.000000e+00> : vector<16x512xf32>
    %102 = tpu.matmul %100, %101, %cst_46 {dimension_numbers = #tpu.dot_dimension_numbers<[1], [0], [0], [1], [0, 0, 1, 1], [], []>} : vector<16x128xbf16>, vector<128x512xbf16>, vector<16x512xf32> -> vector<16x512xf32>
    %103 = arith.addf %99, %102 : vector<16x512xf32>
    %104 = vector.extract_strided_slice %103 {offsets = [0, 0], sizes = [16, 128], strides = [1, 1]} : vector<16x512xf32> to vector<16x128xf32>
    %105 = arith.negf %104 : vector<16x128xf32>
    %106 = math.exp %105 : vector<16x128xf32>
    %cst_47 = arith.constant 1.000000e+00 : f32
    %107 = vector.broadcast %cst_47 : f32 to vector<16x128xf32>
    %108 = arith.addf %107, %106 : vector<16x128xf32>
    %109 = arith.divf %107, %108 : vector<16x128xf32>
    %110 = vector.extract_strided_slice %103 {offsets = [0, 128], sizes = [16, 128], strides = [1, 1]} : vector<16x512xf32> to vector<16x128xf32>
    %111 = arith.negf %110 : vector<16x128xf32>
    %112 = math.exp %111 : vector<16x128xf32>
    %cst_48 = arith.constant 1.000000e+00 : f32
    %113 = vector.broadcast %cst_48 : f32 to vector<16x128xf32>
    %114 = arith.addf %113, %112 : vector<16x128xf32>
    %115 = arith.divf %113, %114 : vector<16x128xf32>
    %116 = vector.extract_strided_slice %103 {offsets = [0, 256], sizes = [16, 128], strides = [1, 1]} : vector<16x512xf32> to vector<16x128xf32>
    %117 = math.tanh %116 : vector<16x128xf32>
    %118 = vector.extract_strided_slice %103 {offsets = [0, 384], sizes = [16, 128], strides = [1, 1]} : vector<16x512xf32> to vector<16x128xf32>
    %119 = arith.negf %118 : vector<16x128xf32>
    %120 = math.exp %119 : vector<16x128xf32>
    %cst_49 = arith.constant 1.000000e+00 : f32
    %121 = vector.broadcast %cst_49 : f32 to vector<16x128xf32>
    %122 = arith.addf %121, %120 : vector<16x128xf32>
    %123 = arith.divf %121, %122 : vector<16x128xf32>
    %124 = arith.mulf %115, %93 : vector<16x128xf32>
    %125 = arith.mulf %109, %117 : vector<16x128xf32>
    %126 = arith.addf %124, %125 : vector<16x128xf32>
    %127 = math.tanh %126 : vector<16x128xf32>
    %128 = arith.mulf %123, %127 : vector<16x128xf32>
    %129 = arith.truncf %128 : vector<16x128xf32> to vector<16x128xbf16>
    %130 = arith.index_cast %c2_i32 : i32 to index
    %c0_50 = arith.constant 0 : index
    %c0_51 = arith.constant 0 : index
    %131 = vector.load %arg5[%130, %c0_50, %c0_51] : memref<8x16x128xbf16, #tpu.memory_space<vmem>>, vector<1x16x128xbf16>
    %132 = vector.shape_cast %131 : vector<1x16x128xbf16> to vector<16x128xbf16>
    %133 = vector.shape_cast %129 : vector<16x128xbf16> to vector<1x16x128xbf16>
    tpu.vector_store %arg5[%130, %c0_50, %c0_51], %133 {strides = array<i32>} : memref<8x16x128xbf16, #tpu.memory_space<vmem>>, vector<1x16x128xbf16>,
    %c0_52 = arith.constant 0 : index
    %c0_53 = arith.constant 0 : index
    %134 = vector.load %arg7[%c0_52, %c0_53] : memref<16x128xf32, #tpu.memory_space<vmem>>, vector<16x128xf32>
    tpu.vector_store %arg7[%c0_52, %c0_53], %128 {strides = array<i32>} : memref<16x128xf32, #tpu.memory_space<vmem>>, vector<16x128xf32>,
    %c0_54 = arith.constant 0 : index
    %c0_55 = arith.constant 0 : index
    %135 = vector.load %arg8[%c0_54, %c0_55] : memref<16x128xf32, #tpu.memory_space<vmem>>, vector<16x128xf32>
    tpu.vector_store %arg8[%c0_54, %c0_55], %126 {strides = array<i32>} : memref<16x128xf32, #tpu.memory_space<vmem>>, vector<16x128xf32>,
    %c3_i32 = arith.constant 3 : i32
    %c0_56 = arith.constant 0 : index
    %c0_57 = arith.constant 0 : index
    %136 = vector.load %arg7[%c0_56, %c0_57] : memref<16x128xf32, #tpu.memory_space<vmem>>, vector<16x128xf32>
    %c0_58 = arith.constant 0 : index
    %c0_59 = arith.constant 0 : index
    %137 = vector.load %arg8[%c0_58, %c0_59] : memref<16x128xf32, #tpu.memory_space<vmem>>, vector<16x128xf32>
    %138 = arith.index_cast %c3_i32 : i32 to index
    %c0_60 = arith.constant 0 : index
    %c0_61 = arith.constant 0 : index
    %139 = vector.load %arg2[%138, %c0_60, %c0_61] : memref<8x16x512xbf16, #tpu.memory_space<vmem>>, vector<1x16x512xbf16>
    %140 = vector.shape_cast %139 : vector<1x16x512xbf16> to vector<16x512xbf16>
    %141 = arith.extf %140 : vector<16x512xbf16> to vector<16x512xf32>
    %142 = vector.broadcast %3 : vector<1x512xf32> to vector<16x512xf32>
    %143 = arith.addf %141, %142 : vector<16x512xf32>
    %144 = arith.truncf %136 : vector<16x128xf32> to vector<16x128xbf16>
    %c0_62 = arith.constant 0 : index
    %c0_63 = arith.constant 0 : index
    %145 = vector.load %arg6[%c0_62, %c0_63] : memref<128x512xbf16, #tpu.memory_space<vmem>>, vector<128x512xbf16>
    %cst_64 = arith.constant dense<0.000000e+00> : vector<16x512xf32>
    %146 = tpu.matmul %144, %145, %cst_64 {dimension_numbers = #tpu.dot_dimension_numbers<[1], [0], [0], [1], [0, 0, 1, 1], [], []>} : vector<16x128xbf16>, vector<128x512xbf16>, vector<16x512xf32> -> vector<16x512xf32>
    %147 = arith.addf %143, %146 : vector<16x512xf32>
    %148 = vector.extract_strided_slice %147 {offsets = [0, 0], sizes = [16, 128], strides = [1, 1]} : vector<16x512xf32> to vector<16x128xf32>
    %149 = arith.negf %148 : vector<16x128xf32>
    %150 = math.exp %149 : vector<16x128xf32>
    %cst_65 = arith.constant 1.000000e+00 : f32
    %151 = vector.broadcast %cst_65 : f32 to vector<16x128xf32>
    %152 = arith.addf %151, %150 : vector<16x128xf32>
    %153 = arith.divf %151, %152 : vector<16x128xf32>
    %154 = vector.extract_strided_slice %147 {offsets = [0, 128], sizes = [16, 128], strides = [1, 1]} : vector<16x512xf32> to vector<16x128xf32>
    %155 = arith.negf %154 : vector<16x128xf32>
    %156 = math.exp %155 : vector<16x128xf32>
    %cst_66 = arith.constant 1.000000e+00 : f32
    %157 = vector.broadcast %cst_66 : f32 to vector<16x128xf32>
    %158 = arith.addf %157, %156 : vector<16x128xf32>
    %159 = arith.divf %157, %158 : vector<16x128xf32>
    %160 = vector.extract_strided_slice %147 {offsets = [0, 256], sizes = [16, 128], strides = [1, 1]} : vector<16x512xf32> to vector<16x128xf32>
    %161 = math.tanh %160 : vector<16x128xf32>
    %162 = vector.extract_strided_slice %147 {offsets = [0, 384], sizes = [16, 128], strides = [1, 1]} : vector<16x512xf32> to vector<16x128xf32>
    %163 = arith.negf %162 : vector<16x128xf32>
    %164 = math.exp %163 : vector<16x128xf32>
    %cst_67 = arith.constant 1.000000e+00 : f32
    %165 = vector.broadcast %cst_67 : f32 to vector<16x128xf32>
    %166 = arith.addf %165, %164 : vector<16x128xf32>
    %167 = arith.divf %165, %166 : vector<16x128xf32>
    %168 = arith.mulf %159, %137 : vector<16x128xf32>
    %169 = arith.mulf %153, %161 : vector<16x128xf32>
    %170 = arith.addf %168, %169 : vector<16x128xf32>
    %171 = math.tanh %170 : vector<16x128xf32>
    %172 = arith.mulf %167, %171 : vector<16x128xf32>
    %173 = arith.truncf %172 : vector<16x128xf32> to vector<16x128xbf16>
    %174 = arith.index_cast %c3_i32 : i32 to index
    %c0_68 = arith.constant 0 : index
    %c0_69 = arith.constant 0 : index
    %175 = vector.load %arg5[%174, %c0_68, %c0_69] : memref<8x16x128xbf16, #tpu.memory_space<vmem>>, vector<1x16x128xbf16>
    %176 = vector.shape_cast %175 : vector<1x16x128xbf16> to vector<16x128xbf16>
    %177 = vector.shape_cast %173 : vector<16x128xbf16> to vector<1x16x128xbf16>
    tpu.vector_store %arg5[%174, %c0_68, %c0_69], %177 {strides = array<i32>} : memref<8x16x128xbf16, #tpu.memory_space<vmem>>, vector<1x16x128xbf16>,
    %c0_70 = arith.constant 0 : index
    %c0_71 = arith.constant 0 : index
    %178 = vector.load %arg7[%c0_70, %c0_71] : memref<16x128xf32, #tpu.memory_space<vmem>>, vector<16x128xf32>
    tpu.vector_store %arg7[%c0_70, %c0_71], %172 {strides = array<i32>} : memref<16x128xf32, #tpu.memory_space<vmem>>, vector<16x128xf32>,
    %c0_72 = arith.constant 0 : index
    %c0_73 = arith.constant 0 : index
    %179 = vector.load %arg8[%c0_72, %c0_73] : memref<16x128xf32, #tpu.memory_space<vmem>>, vector<16x128xf32>
    tpu.vector_store %arg8[%c0_72, %c0_73], %170 {strides = array<i32>} : memref<16x128xf32, #tpu.memory_space<vmem>>, vector<16x128xf32>,
    %c4_i32 = arith.constant 4 : i32
    %c0_74 = arith.constant 0 : index
    %c0_75 = arith.constant 0 : index
    %180 = vector.load %arg7[%c0_74, %c0_75] : memref<16x128xf32, #tpu.memory_space<vmem>>, vector<16x128xf32>
    %c0_76 = arith.constant 0 : index
    %c0_77 = arith.constant 0 : index
    %181 = vector.load %arg8[%c0_76, %c0_77] : memref<16x128xf32, #tpu.memory_space<vmem>>, vector<16x128xf32>
    %182 = arith.index_cast %c4_i32 : i32 to index
    %c0_78 = arith.constant 0 : index
    %c0_79 = arith.constant 0 : index
    %183 = vector.load %arg2[%182, %c0_78, %c0_79] : memref<8x16x512xbf16, #tpu.memory_space<vmem>>, vector<1x16x512xbf16>
    %184 = vector.shape_cast %183 : vector<1x16x512xbf16> to vector<16x512xbf16>
    %185 = arith.extf %184 : vector<16x512xbf16> to vector<16x512xf32>
    %186 = vector.broadcast %3 : vector<1x512xf32> to vector<16x512xf32>
    %187 = arith.addf %185, %186 : vector<16x512xf32>
    %188 = arith.truncf %180 : vector<16x128xf32> to vector<16x128xbf16>
    %c0_80 = arith.constant 0 : index
    %c0_81 = arith.constant 0 : index
    %189 = vector.load %arg6[%c0_80, %c0_81] : memref<128x512xbf16, #tpu.memory_space<vmem>>, vector<128x512xbf16>
    %cst_82 = arith.constant dense<0.000000e+00> : vector<16x512xf32>
    %190 = tpu.matmul %188, %189, %cst_82 {dimension_numbers = #tpu.dot_dimension_numbers<[1], [0], [0], [1], [0, 0, 1, 1], [], []>} : vector<16x128xbf16>, vector<128x512xbf16>, vector<16x512xf32> -> vector<16x512xf32>
    %191 = arith.addf %187, %190 : vector<16x512xf32>
    %192 = vector.extract_strided_slice %191 {offsets = [0, 0], sizes = [16, 128], strides = [1, 1]} : vector<16x512xf32> to vector<16x128xf32>
    %193 = arith.negf %192 : vector<16x128xf32>
    %194 = math.exp %193 : vector<16x128xf32>
    %cst_83 = arith.constant 1.000000e+00 : f32
    %195 = vector.broadcast %cst_83 : f32 to vector<16x128xf32>
    %196 = arith.addf %195, %194 : vector<16x128xf32>
    %197 = arith.divf %195, %196 : vector<16x128xf32>
    %198 = vector.extract_strided_slice %191 {offsets = [0, 128], sizes = [16, 128], strides = [1, 1]} : vector<16x512xf32> to vector<16x128xf32>
    %199 = arith.negf %198 : vector<16x128xf32>
    %200 = math.exp %199 : vector<16x128xf32>
    %cst_84 = arith.constant 1.000000e+00 : f32
    %201 = vector.broadcast %cst_84 : f32 to vector<16x128xf32>
    %202 = arith.addf %201, %200 : vector<16x128xf32>
    %203 = arith.divf %201, %202 : vector<16x128xf32>
    %204 = vector.extract_strided_slice %191 {offsets = [0, 256], sizes = [16, 128], strides = [1, 1]} : vector<16x512xf32> to vector<16x128xf32>
    %205 = math.tanh %204 : vector<16x128xf32>
    %206 = vector.extract_strided_slice %191 {offsets = [0, 384], sizes = [16, 128], strides = [1, 1]} : vector<16x512xf32> to vector<16x128xf32>
    %207 = arith.negf %206 : vector<16x128xf32>
    %208 = math.exp %207 : vector<16x128xf32>
    %cst_85 = arith.constant 1.000000e+00 : f32
    %209 = vector.broadcast %cst_85 : f32 to vector<16x128xf32>
    %210 = arith.addf %209, %208 : vector<16x128xf32>
    %211 = arith.divf %209, %210 : vector<16x128xf32>
    %212 = arith.mulf %203, %181 : vector<16x128xf32>
    %213 = arith.mulf %197, %205 : vector<16x128xf32>
    %214 = arith.addf %212, %213 : vector<16x128xf32>
    %215 = math.tanh %214 : vector<16x128xf32>
    %216 = arith.mulf %211, %215 : vector<16x128xf32>
    %217 = arith.truncf %216 : vector<16x128xf32> to vector<16x128xbf16>
    %218 = arith.index_cast %c4_i32 : i32 to index
    %c0_86 = arith.constant 0 : index
    %c0_87 = arith.constant 0 : index
    %219 = vector.load %arg5[%218, %c0_86, %c0_87] : memref<8x16x128xbf16, #tpu.memory_space<vmem>>, vector<1x16x128xbf16>
    %220 = vector.shape_cast %219 : vector<1x16x128xbf16> to vector<16x128xbf16>
    %221 = vector.shape_cast %217 : vector<16x128xbf16> to vector<1x16x128xbf16>
    tpu.vector_store %arg5[%218, %c0_86, %c0_87], %221 {strides = array<i32>} : memref<8x16x128xbf16, #tpu.memory_space<vmem>>, vector<1x16x128xbf16>,
    %c0_88 = arith.constant 0 : index
    %c0_89 = arith.constant 0 : index
    %222 = vector.load %arg7[%c0_88, %c0_89] : memref<16x128xf32, #tpu.memory_space<vmem>>, vector<16x128xf32>
    tpu.vector_store %arg7[%c0_88, %c0_89], %216 {strides = array<i32>} : memref<16x128xf32, #tpu.memory_space<vmem>>, vector<16x128xf32>,
    %c0_90 = arith.constant 0 : index
    %c0_91 = arith.constant 0 : index
    %223 = vector.load %arg8[%c0_90, %c0_91] : memref<16x128xf32, #tpu.memory_space<vmem>>, vector<16x128xf32>
    tpu.vector_store %arg8[%c0_90, %c0_91], %214 {strides = array<i32>} : memref<16x128xf32, #tpu.memory_space<vmem>>, vector<16x128xf32>,
    %c5_i32 = arith.constant 5 : i32
    %c0_92 = arith.constant 0 : index
    %c0_93 = arith.constant 0 : index
    %224 = vector.load %arg7[%c0_92, %c0_93] : memref<16x128xf32, #tpu.memory_space<vmem>>, vector<16x128xf32>
    %c0_94 = arith.constant 0 : index
    %c0_95 = arith.constant 0 : index
    %225 = vector.load %arg8[%c0_94, %c0_95] : memref<16x128xf32, #tpu.memory_space<vmem>>, vector<16x128xf32>
    %226 = arith.index_cast %c5_i32 : i32 to index
    %c0_96 = arith.constant 0 : index
    %c0_97 = arith.constant 0 : index
    %227 = vector.load %arg2[%226, %c0_96, %c0_97] : memref<8x16x512xbf16, #tpu.memory_space<vmem>>, vector<1x16x512xbf16>
    %228 = vector.shape_cast %227 : vector<1x16x512xbf16> to vector<16x512xbf16>
    %229 = arith.extf %228 : vector<16x512xbf16> to vector<16x512xf32>
    %230 = vector.broadcast %3 : vector<1x512xf32> to vector<16x512xf32>
    %231 = arith.addf %229, %230 : vector<16x512xf32>
    %232 = arith.truncf %224 : vector<16x128xf32> to vector<16x128xbf16>
    %c0_98 = arith.constant 0 : index
    %c0_99 = arith.constant 0 : index
    %233 = vector.load %arg6[%c0_98, %c0_99] : memref<128x512xbf16, #tpu.memory_space<vmem>>, vector<128x512xbf16>
    %cst_100 = arith.constant dense<0.000000e+00> : vector<16x512xf32>
    %234 = tpu.matmul %232, %233, %cst_100 {dimension_numbers = #tpu.dot_dimension_numbers<[1], [0], [0], [1], [0, 0, 1, 1], [], []>} : vector<16x128xbf16>, vector<128x512xbf16>, vector<16x512xf32> -> vector<16x512xf32>
    %235 = arith.addf %231, %234 : vector<16x512xf32>
    %236 = vector.extract_strided_slice %235 {offsets = [0, 0], sizes = [16, 128], strides = [1, 1]} : vector<16x512xf32> to vector<16x128xf32>
    %237 = arith.negf %236 : vector<16x128xf32>
    %238 = math.exp %237 : vector<16x128xf32>
    %cst_101 = arith.constant 1.000000e+00 : f32
    %239 = vector.broadcast %cst_101 : f32 to vector<16x128xf32>
    %240 = arith.addf %239, %238 : vector<16x128xf32>
    %241 = arith.divf %239, %240 : vector<16x128xf32>
    %242 = vector.extract_strided_slice %235 {offsets = [0, 128], sizes = [16, 128], strides = [1, 1]} : vector<16x512xf32> to vector<16x128xf32>
    %243 = arith.negf %242 : vector<16x128xf32>
    %244 = math.exp %243 : vector<16x128xf32>
    %cst_102 = arith.constant 1.000000e+00 : f32
    %245 = vector.broadcast %cst_102 : f32 to vector<16x128xf32>
    %246 = arith.addf %245, %244 : vector<16x128xf32>
    %247 = arith.divf %245, %246 : vector<16x128xf32>
    %248 = vector.extract_strided_slice %235 {offsets = [0, 256], sizes = [16, 128], strides = [1, 1]} : vector<16x512xf32> to vector<16x128xf32>
    %249 = math.tanh %248 : vector<16x128xf32>
    %250 = vector.extract_strided_slice %235 {offsets = [0, 384], sizes = [16, 128], strides = [1, 1]} : vector<16x512xf32> to vector<16x128xf32>
    %251 = arith.negf %250 : vector<16x128xf32>
    %252 = math.exp %251 : vector<16x128xf32>
    %cst_103 = arith.constant 1.000000e+00 : f32
    %253 = vector.broadcast %cst_103 : f32 to vector<16x128xf32>
    %254 = arith.addf %253, %252 : vector<16x128xf32>
    %255 = arith.divf %253, %254 : vector<16x128xf32>
    %256 = arith.mulf %247, %225 : vector<16x128xf32>
    %257 = arith.mulf %241, %249 : vector<16x128xf32>
    %258 = arith.addf %256, %257 : vector<16x128xf32>
    %259 = math.tanh %258 : vector<16x128xf32>
    %260 = arith.mulf %255, %259 : vector<16x128xf32>
    %261 = arith.truncf %260 : vector<16x128xf32> to vector<16x128xbf16>
    %262 = arith.index_cast %c5_i32 : i32 to index
    %c0_104 = arith.constant 0 : index
    %c0_105 = arith.constant 0 : index
    %263 = vector.load %arg5[%262, %c0_104, %c0_105] : memref<8x16x128xbf16, #tpu.memory_space<vmem>>, vector<1x16x128xbf16>
    %264 = vector.shape_cast %263 : vector<1x16x128xbf16> to vector<16x128xbf16>
    %265 = vector.shape_cast %261 : vector<16x128xbf16> to vector<1x16x128xbf16>
    tpu.vector_store %arg5[%262, %c0_104, %c0_105], %265 {strides = array<i32>} : memref<8x16x128xbf16, #tpu.memory_space<vmem>>, vector<1x16x128xbf16>,
    %c0_106 = arith.constant 0 : index
    %c0_107 = arith.constant 0 : index
    %266 = vector.load %arg7[%c0_106, %c0_107] : memref<16x128xf32, #tpu.memory_space<vmem>>, vector<16x128xf32>
    tpu.vector_store %arg7[%c0_106, %c0_107], %260 {strides = array<i32>} : memref<16x128xf32, #tpu.memory_space<vmem>>, vector<16x128xf32>,
    %c0_108 = arith.constant 0 : index
    %c0_109 = arith.constant 0 : index
    %267 = vector.load %arg8[%c0_108, %c0_109] : memref<16x128xf32, #tpu.memory_space<vmem>>, vector<16x128xf32>
    tpu.vector_store %arg8[%c0_108, %c0_109], %258 {strides = array<i32>} : memref<16x128xf32, #tpu.memory_space<vmem>>, vector<16x128xf32>,
    %c6_i32 = arith.constant 6 : i32
    %c0_110 = arith.constant 0 : index
    %c0_111 = arith.constant 0 : index
    %268 = vector.load %arg7[%c0_110, %c0_111] : memref<16x128xf32, #tpu.memory_space<vmem>>, vector<16x128xf32>
    %c0_112 = arith.constant 0 : index
    %c0_113 = arith.constant 0 : index
    %269 = vector.load %arg8[%c0_112, %c0_113] : memref<16x128xf32, #tpu.memory_space<vmem>>, vector<16x128xf32>
    %270 = arith.index_cast %c6_i32 : i32 to index
    %c0_114 = arith.constant 0 : index
    %c0_115 = arith.constant 0 : index
    %271 = vector.load %arg2[%270, %c0_114, %c0_115] : memref<8x16x512xbf16, #tpu.memory_space<vmem>>, vector<1x16x512xbf16>
    %272 = vector.shape_cast %271 : vector<1x16x512xbf16> to vector<16x512xbf16>
    %273 = arith.extf %272 : vector<16x512xbf16> to vector<16x512xf32>
    %274 = vector.broadcast %3 : vector<1x512xf32> to vector<16x512xf32>
    %275 = arith.addf %273, %274 : vector<16x512xf32>
    %276 = arith.truncf %268 : vector<16x128xf32> to vector<16x128xbf16>
    %c0_116 = arith.constant 0 : index
    %c0_117 = arith.constant 0 : index
    %277 = vector.load %arg6[%c0_116, %c0_117] : memref<128x512xbf16, #tpu.memory_space<vmem>>, vector<128x512xbf16>
    %cst_118 = arith.constant dense<0.000000e+00> : vector<16x512xf32>
    %278 = tpu.matmul %276, %277, %cst_118 {dimension_numbers = #tpu.dot_dimension_numbers<[1], [0], [0], [1], [0, 0, 1, 1], [], []>} : vector<16x128xbf16>, vector<128x512xbf16>, vector<16x512xf32> -> vector<16x512xf32>
    %279 = arith.addf %275, %278 : vector<16x512xf32>
    %280 = vector.extract_strided_slice %279 {offsets = [0, 0], sizes = [16, 128], strides = [1, 1]} : vector<16x512xf32> to vector<16x128xf32>
    %281 = arith.negf %280 : vector<16x128xf32>
    %282 = math.exp %281 : vector<16x128xf32>
    %cst_119 = arith.constant 1.000000e+00 : f32
    %283 = vector.broadcast %cst_119 : f32 to vector<16x128xf32>
    %284 = arith.addf %283, %282 : vector<16x128xf32>
    %285 = arith.divf %283, %284 : vector<16x128xf32>
    %286 = vector.extract_strided_slice %279 {offsets = [0, 128], sizes = [16, 128], strides = [1, 1]} : vector<16x512xf32> to vector<16x128xf32>
    %287 = arith.negf %286 : vector<16x128xf32>
    %288 = math.exp %287 : vector<16x128xf32>
    %cst_120 = arith.constant 1.000000e+00 : f32
    %289 = vector.broadcast %cst_120 : f32 to vector<16x128xf32>
    %290 = arith.addf %289, %288 : vector<16x128xf32>
    %291 = arith.divf %289, %290 : vector<16x128xf32>
    %292 = vector.extract_strided_slice %279 {offsets = [0, 256], sizes = [16, 128], strides = [1, 1]} : vector<16x512xf32> to vector<16x128xf32>
    %293 = math.tanh %292 : vector<16x128xf32>
    %294 = vector.extract_strided_slice %279 {offsets = [0, 384], sizes = [16, 128], strides = [1, 1]} : vector<16x512xf32> to vector<16x128xf32>
    %295 = arith.negf %294 : vector<16x128xf32>
    %296 = math.exp %295 : vector<16x128xf32>
    %cst_121 = arith.constant 1.000000e+00 : f32
    %297 = vector.broadcast %cst_121 : f32 to vector<16x128xf32>
    %298 = arith.addf %297, %296 : vector<16x128xf32>
    %299 = arith.divf %297, %298 : vector<16x128xf32>
    %300 = arith.mulf %291, %269 : vector<16x128xf32>
    %301 = arith.mulf %285, %293 : vector<16x128xf32>
    %302 = arith.addf %300, %301 : vector<16x128xf32>
    %303 = math.tanh %302 : vector<16x128xf32>
    %304 = arith.mulf %299, %303 : vector<16x128xf32>
    %305 = arith.truncf %304 : vector<16x128xf32> to vector<16x128xbf16>
    %306 = arith.index_cast %c6_i32 : i32 to index
    %c0_122 = arith.constant 0 : index
    %c0_123 = arith.constant 0 : index
    %307 = vector.load %arg5[%306, %c0_122, %c0_123] : memref<8x16x128xbf16, #tpu.memory_space<vmem>>, vector<1x16x128xbf16>
    %308 = vector.shape_cast %307 : vector<1x16x128xbf16> to vector<16x128xbf16>
    %309 = vector.shape_cast %305 : vector<16x128xbf16> to vector<1x16x128xbf16>
    tpu.vector_store %arg5[%306, %c0_122, %c0_123], %309 {strides = array<i32>} : memref<8x16x128xbf16, #tpu.memory_space<vmem>>, vector<1x16x128xbf16>,
    %c0_124 = arith.constant 0 : index
    %c0_125 = arith.constant 0 : index
    %310 = vector.load %arg7[%c0_124, %c0_125] : memref<16x128xf32, #tpu.memory_space<vmem>>, vector<16x128xf32>
    tpu.vector_store %arg7[%c0_124, %c0_125], %304 {strides = array<i32>} : memref<16x128xf32, #tpu.memory_space<vmem>>, vector<16x128xf32>,
    %c0_126 = arith.constant 0 : index
    %c0_127 = arith.constant 0 : index
    %311 = vector.load %arg8[%c0_126, %c0_127] : memref<16x128xf32, #tpu.memory_space<vmem>>, vector<16x128xf32>
    tpu.vector_store %arg8[%c0_126, %c0_127], %302 {strides = array<i32>} : memref<16x128xf32, #tpu.memory_space<vmem>>, vector<16x128xf32>,
    %c7_i32 = arith.constant 7 : i32
    %c0_128 = arith.constant 0 : index
    %c0_129 = arith.constant 0 : index
    %312 = vector.load %arg7[%c0_128, %c0_129] : memref<16x128xf32, #tpu.memory_space<vmem>>, vector<16x128xf32>
    %c0_130 = arith.constant 0 : index
    %c0_131 = arith.constant 0 : index
    %313 = vector.load %arg8[%c0_130, %c0_131] : memref<16x128xf32, #tpu.memory_space<vmem>>, vector<16x128xf32>
    %314 = arith.index_cast %c7_i32 : i32 to index
    %c0_132 = arith.constant 0 : index
    %c0_133 = arith.constant 0 : index
    %315 = vector.load %arg2[%314, %c0_132, %c0_133] : memref<8x16x512xbf16, #tpu.memory_space<vmem>>, vector<1x16x512xbf16>
    %316 = vector.shape_cast %315 : vector<1x16x512xbf16> to vector<16x512xbf16>
    %317 = arith.extf %316 : vector<16x512xbf16> to vector<16x512xf32>
    %318 = vector.broadcast %3 : vector<1x512xf32> to vector<16x512xf32>
    %319 = arith.addf %317, %318 : vector<16x512xf32>
    %320 = arith.truncf %312 : vector<16x128xf32> to vector<16x128xbf16>
    %c0_134 = arith.constant 0 : index
    %c0_135 = arith.constant 0 : index
    %321 = vector.load %arg6[%c0_134, %c0_135] : memref<128x512xbf16, #tpu.memory_space<vmem>>, vector<128x512xbf16>
    %cst_136 = arith.constant dense<0.000000e+00> : vector<16x512xf32>
    %322 = tpu.matmul %320, %321, %cst_136 {dimension_numbers = #tpu.dot_dimension_numbers<[1], [0], [0], [1], [0, 0, 1, 1], [], []>} : vector<16x128xbf16>, vector<128x512xbf16>, vector<16x512xf32> -> vector<16x512xf32>
    %323 = arith.addf %319, %322 : vector<16x512xf32>
    %324 = vector.extract_strided_slice %323 {offsets = [0, 0], sizes = [16, 128], strides = [1, 1]} : vector<16x512xf32> to vector<16x128xf32>
    %325 = arith.negf %324 : vector<16x128xf32>
    %326 = math.exp %325 : vector<16x128xf32>
    %cst_137 = arith.constant 1.000000e+00 : f32
    %327 = vector.broadcast %cst_137 : f32 to vector<16x128xf32>
    %328 = arith.addf %327, %326 : vector<16x128xf32>
    %329 = arith.divf %327, %328 : vector<16x128xf32>
    %330 = vector.extract_strided_slice %323 {offsets = [0, 128], sizes = [16, 128], strides = [1, 1]} : vector<16x512xf32> to vector<16x128xf32>
    %331 = arith.negf %330 : vector<16x128xf32>
    %332 = math.exp %331 : vector<16x128xf32>
    %cst_138 = arith.constant 1.000000e+00 : f32
    %333 = vector.broadcast %cst_138 : f32 to vector<16x128xf32>
    %334 = arith.addf %333, %332 : vector<16x128xf32>
    %335 = arith.divf %333, %334 : vector<16x128xf32>
    %336 = vector.extract_strided_slice %323 {offsets = [0, 256], sizes = [16, 128], strides = [1, 1]} : vector<16x512xf32> to vector<16x128xf32>
    %337 = math.tanh %336 : vector<16x128xf32>
    %338 = vector.extract_strided_slice %323 {offsets = [0, 384], sizes = [16, 128], strides = [1, 1]} : vector<16x512xf32> to vector<16x128xf32>
    %339 = arith.negf %338 : vector<16x128xf32>
    %340 = math.exp %339 : vector<16x128xf32>
    %cst_139 = arith.constant 1.000000e+00 : f32
    %341 = vector.broadcast %cst_139 : f32 to vector<16x128xf32>
    %342 = arith.addf %341, %340 : vector<16x128xf32>
    %343 = arith.divf %341, %342 : vector<16x128xf32>
    %344 = arith.mulf %335, %313 : vector<16x128xf32>
    %345 = arith.mulf %329, %337 : vector<16x128xf32>
    %346 = arith.addf %344, %345 : vector<16x128xf32>
    %347 = math.tanh %346 : vector<16x128xf32>
    %348 = arith.mulf %343, %347 : vector<16x128xf32>
    %349 = arith.truncf %348 : vector<16x128xf32> to vector<16x128xbf16>
    %350 = arith.index_cast %c7_i32 : i32 to index
    %c0_140 = arith.constant 0 : index
    %c0_141 = arith.constant 0 : index
    %351 = vector.load %arg5[%350, %c0_140, %c0_141] : memref<8x16x128xbf16, #tpu.memory_space<vmem>>, vector<1x16x128xbf16>
    %352 = vector.shape_cast %351 : vector<1x16x128xbf16> to vector<16x128xbf16>
    %353 = vector.shape_cast %349 : vector<16x128xbf16> to vector<1x16x128xbf16>
    tpu.vector_store %arg5[%350, %c0_140, %c0_141], %353 {strides = array<i32>} : memref<8x16x128xbf16, #tpu.memory_space<vmem>>, vector<1x16x128xbf16>,
    %c0_142 = arith.constant 0 : index
    %c0_143 = arith.constant 0 : index
    %354 = vector.load %arg7[%c0_142, %c0_143] : memref<16x128xf32, #tpu.memory_space<vmem>>, vector<16x128xf32>
    tpu.vector_store %arg7[%c0_142, %c0_143], %348 {strides = array<i32>} : memref<16x128xf32, #tpu.memory_space<vmem>>, vector<16x128xf32>,
    %c0_144 = arith.constant 0 : index
    %c0_145 = arith.constant 0 : index
    %355 = vector.load %arg8[%c0_144, %c0_145] : memref<16x128xf32, #tpu.memory_space<vmem>>, vector<16x128xf32>
    tpu.vector_store %arg8[%c0_144, %c0_145], %346 {strides = array<i32>} : memref<16x128xf32, #tpu.memory_space<vmem>>, vector<16x128xf32>,
    %c8_i32 = arith.constant 8 : i32
    return
  }
  func.func @transform_0(%arg0: i32, %arg1: i32) -> (i32, i32, i32) {
    %c0_i32 = arith.constant 0 : i32
    %c0_i32_0 = arith.constant 0 : i32
    return %arg1, %arg0, %c0_i32 : i32, i32, i32
  }
  func.func @transform_1(%arg0: i32, %arg1: i32) -> (i32, i32) {
    %c0_i32 = arith.constant 0 : i32
    %c0_i32_0 = arith.constant 0 : i32
    %c0_i32_1 = arith.constant 0 : i32
    return %c0_i32, %c0_i32_0 : i32, i32
  }
  func.func @transform_3(%arg0: i32, %arg1: i32) -> (i32, i32, i32) {
    %c0_i32 = arith.constant 0 : i32
    %c0_i32_0 = arith.constant 0 : i32
    return %arg1, %arg0, %c0_i32 : i32, i32, i32
  }
}

</mosaic_0001>

<bundles_post_ra>
// kernel: decoder_rnn_forward.5
= control target key start
LH: loop header
LB: loop body
LE: loop exit
PB: predicated region body
PF: predicated region fallthrough
CT: control target
= control target key end

     0   :  { %s483_s1 = inlined_call_operand.vmem [shape: bf16[128,128], index: 1, kind: input, shape index: {}]   ;;  %s484_s0 = inlined_call_operand.vmem [shape: bf16[128,128], index: 0, kind: input, shape index: {}]   ;;  %s485_s2 = inlined_call_operand.vmem [shape: f32[1,128], index: 2, kind: input, shape index: {}]   ;;  %s486_s3 = inlined_call_operand.vmem [shape: f32[128,128], index: 3, kind: output, shape index: {}]  }
   0x1   :  { %v348_v0 = vld [vmem:[%s483_s1 + $0x38] sm:$0xff]   ;;  %v349_v1 = vld [vmem:[%s483_s1 + $0x30] sm:$0xff]   ;;  %v350_v2 = vld [vmem:[%s483_s1 + $0x28] sm:$0xff]  }
   0x2   :  { %300 = vmatprep.subr.bf16.mxu0 %v348_v0  ;;  %332 = vmatprep.subr.bf16.mxu1 %v348_v0  ;;  %v351_v3 = vld [vmem:[%s483_s1 + $0x20] sm:$0xff]   ;;  %v352_v6 = vld [vmem:[%s483_s1 + $0x18] sm:$0xff]   ;;  %v353_v7 = vld [vmem:[%s483_s1 + $0x10] sm:$0xff]  }
   0x3   :  { %301 = vmatpush3.bf16.msra.mxu0 %v348_v0  ;;  %340 = vmatpush3.bf16.msra.mxu1 %v348_v0  ;;  %v356_v4 = vld [vmem:[%s484_s0] sm:$0xff]   ;;  %v354_v8 = vld [vmem:[%s483_s1 + $0x8] sm:$0xff]   ;;  %v360_v12 = vld [vmem:[%s484_s0 + $0x10] sm:$0xff]  }
   0x4   :  { %302 = vmatprep.subr.bf16.mxu0 %v349_v1  ;;  %333 = vmatprep.subr.bf16.mxu1 %v349_v1  ;;  %v357_v5 = vld [vmem:[%s484_s0 + $0x20] sm:$0xff]   ;;  %v358_v10 = vld [vmem:[%s484_s0 + $0x8] sm:$0xff]   ;;  %v361_v13 = vld [vmem:[%s484_s0 + $0x30] sm:$0xff]  }
   0x5   :  { %316 = vmatprep.mubr.bf16.mxu0 %v356_v4  ;;  %324 = vmatprep.mubr.bf16.mxu1 %v357_v5  ;;  %v355_v9 = vld [vmem:[%s483_s1] sm:$0xff]   ;;  %v359_v11 = vld [vmem:[%s484_s0 + $0x28] sm:$0xff]   ;;  %v362_v14 = vld [vmem:[%s484_s0 + $0x18] sm:$0xff]  }
   0x6   :  { %v363_v15 = vld [vmem:[%s484_s0 + $0x38] sm:$0xff]   ;;  %v267_v16 = vld [vmem:[%s485_s2] ss:$0 sm:$0xff] }
   0x7   :  { %303 = vmatpush3.bf16.msra.mxu0 %v349_v1  ;;  %341 = vmatpush3.bf16.msra.mxu1 %v349_v1 }
   0x8   :  { %304 = vmatprep.subr.bf16.mxu0 %v350_v2  ;;  %334 = vmatprep.subr.bf16.mxu1 %v350_v2 }
   0xb   :  { %305 = vmatpush3.bf16.msra.mxu0 %v350_v2  ;;  %342 = vmatpush3.bf16.msra.mxu1 %v350_v2 }
   0xc   :  { %306 = vmatprep.subr.bf16.mxu0 %v351_v3  ;;  %335 = vmatprep.subr.bf16.mxu1 %v351_v3 }
   0xf   :  { %307 = vmatpush3.bf16.msra.mxu0 %v351_v3  ;;  %343 = vmatpush3.bf16.msra.mxu1 %v351_v3 }
  0x10   :  { %308 = vmatprep.subr.bf16.mxu0 %v352_v6  ;;  %336 = vmatprep.subr.bf16.mxu1 %v352_v6 }
  0x13   :  { %309 = vmatpush3.bf16.msra.mxu0 %v352_v6  ;;  %344 = vmatpush3.bf16.msra.mxu1 %v352_v6 }
  0x14   :  { %310 = vmatprep.subr.bf16.mxu0 %v353_v7  ;;  %337 = vmatprep.subr.bf16.mxu1 %v353_v7 }
  0x17   :  { %311 = vmatpush3.bf16.msra.mxu0 %v353_v7  ;;  %345 = vmatpush3.bf16.msra.mxu1 %v353_v7 }
  0x18   :  { %312 = vmatprep.subr.bf16.mxu0 %v354_v8  ;;  %338 = vmatprep.subr.bf16.mxu1 %v354_v8 }
  0x1b   :  { %313 = vmatpush3.bf16.msra.mxu0 %v354_v8  ;;  %346 = vmatpush3.bf16.msra.mxu1 %v354_v8 }
  0x1c   :  { %314 = vmatprep.subr.bf16.mxu0 %v355_v9  ;;  %339 = vmatprep.subr.bf16.mxu1 %v355_v9 }
  0x1f   :  { %315 = vmatpush3.bf16.msra.mxu0 %v355_v9  ;;  %347 = vmatpush3.bf16.msra.mxu1 %v355_v9 }
  0x22   :  { %317 = vmatmul.mubr.bf16.vlgmr.msra.gmra.mxu0 %v358_v10  ;;  %325 = vmatmul.mubr.bf16.vlgmr.msra.gmra.mxu1 %v359_v11 }
  0x23   :  { %320 = vmatprep.mubr.bf16.mxu0 %v360_v12  ;;  %328 = vmatprep.mubr.bf16.mxu1 %v361_v13 }
  0x2a   :  { %321 = vmatmul.mubr.bf16.gmra.mxu0 %v362_v14  ;;  %329 = vmatmul.mubr.bf16.gmra.mxu1 %v363_v15 }
  0xe2   :  { %v318_v17 = vpop.f32.mrf.mxu0  ;;  %v326_v18 = vpop.f32.mrf.mxu1 }
  0xe3   :  { %v193_v19 = vadd.f32 %v318_v17, %v267_v16  ;;  %v225_v20 = vadd.f32 %v326_v18, %v267_v16 }
  0xe4   :  { %v184_v21 = vpop.f32.mrf.mxu0  ;;  %v216_v22 = vpop.f32.mrf.mxu1 }
  0xe5   :  { %249 = vst [vmem:[%s486_s3 + $0x10] sm:$0xff] %v193_v19  ;;  %257 = vst [vmem:[%s486_s3 + $0x50] sm:$0xff] %v225_v20  ;;  %v185_v23 = vadd.f32 %v267_v16, %v184_v21  ;;  %v217_v24 = vadd.f32 %v267_v16, %v216_v22 }
  0xe6   :  { %v319_v25 = vpop.f32.mrf.mxu0  ;;  %v327_v26 = vpop.f32.mrf.mxu1 }
  0xe7   :  { %247 = vst [vmem:[%s486_s3] sm:$0xff] %v185_v23  ;;  %255 = vst [vmem:[%s486_s3 + $0x40] sm:$0xff] %v217_v24  ;;  %v196_v27 = vadd.f32 %v319_v25, %v267_v16  ;;  %v228_v28 = vadd.f32 %v327_v26, %v267_v16 }
  0xe8   :  { %v187_v29 = vpop.f32.mrf.mxu0  ;;  %v219_v30 = vpop.f32.mrf.mxu1 }
  0xe9   :  { %250 = vst [vmem:[%s486_s3 + $0x18] sm:$0xff] %v196_v27  ;;  %258 = vst [vmem:[%s486_s3 + $0x58] sm:$0xff] %v228_v28  ;;  %v188_v31 = vadd.f32 %v267_v16, %v187_v29  ;;  %v220_v32 = vadd.f32 %v267_v16, %v219_v30 }
  0xea   :  { %v322_v33 = vpop.f32.mrf.mxu0  ;;  %v330_v34 = vpop.f32.mrf.mxu1 }
  0xeb   :  { %248 = vst [vmem:[%s486_s3 + $0x8] sm:$0xff] %v188_v31  ;;  %256 = vst [vmem:[%s486_s3 + $0x48] sm:$0xff] %v220_v32  ;;  %v209_v35 = vadd.f32 %v322_v33, %v267_v16  ;;  %v241_v36 = vadd.f32 %v330_v34, %v267_v16 }
  0xec   :  { %v200_v37 = vpop.f32.mrf.mxu0  ;;  %v232_v38 = vpop.f32.mrf.mxu1 }
  0xed   :  { %253 = vst [vmem:[%s486_s3 + $0x30] sm:$0xff] %v209_v35  ;;  %261 = vst [vmem:[%s486_s3 + $0x70] sm:$0xff] %v241_v36  ;;  %v201_v39 = vadd.f32 %v267_v16, %v200_v37  ;;  %v233_v40 = vadd.f32 %v267_v16, %v232_v38 }
  0xee   :  { %v323_v41 = vpop.f32.mrf.mxu0  ;;  %v331_v42 = vpop.f32.mrf.mxu1 }
  0xef   :  { %251 = vst [vmem:[%s486_s3 + $0x20] sm:$0xff] %v201_v39  ;;  %259 = vst [vmem:[%s486_s3 + $0x60] sm:$0xff] %v233_v40  ;;  %v212_v43 = vadd.f32 %v323_v41, %v267_v16  ;;  %v244_v44 = vadd.f32 %v331_v42, %v267_v16 }
  0xf0   :  { %v203_v45 = vpop.f32.mrf.mxu0  ;;  %v235_v46 = vpop.f32.mrf.mxu1 }
  0xf1   :  { %254 = vst [vmem:[%s486_s3 + $0x38] sm:$0xff] %v212_v43  ;;  %262 = vst [vmem:[%s486_s3 + $0x78] sm:$0xff] %v244_v44  ;;  %v204_v47 = vadd.f32 %v267_v16, %v203_v45  ;;  %v236_v48 = vadd.f32 %v267_v16, %v235_v46 }
  0xf3   :  { %252 = vst [vmem:[%s486_s3 + $0x28] sm:$0xff] %v204_v47  ;;  %260 = vst [vmem:[%s486_s3 + $0x68] sm:$0xff] %v236_v48 }

// kernel: decoder_rnn_forward.3
= control target key start
LH: loop header
LB: loop body
LE: loop exit
PB: predicated region body
PF: predicated region fallthrough
CT: control target
= control target key end

     0   :  { %v883_v1 = vmov 0   ;;  %s1131_s1 = inlined_call_operand.vmem [shape: bf16[128,512], index: 1, kind: input, shape index: {}]   ;;  %s1132_s0 = inlined_call_operand.vmem [shape: bf16[128,128], index: 0, kind: input, shape index: {}]   ;;  %s1133_s2 = inlined_call_operand.vmem [shape: bf16[128,512], index: 2, kind: output, shape index: {}]  }
   0x1   :  { %v827_v0 = vld [vmem:[%s1131_s1 + $0xe4] ss:$16 sps:$4 sm:$0xff]   ;;  %300 = vmatprep.mubr.bf16.mxu0 %v883_v1  ;;  %413 = vmatprep.mubr.bf16.mxu1 %v883_v1  ;;  %v829_v2 = vld [vmem:[%s1131_s1 + $0xec] ss:$16 sps:$4 sm:$0xff]   ;;  %v831_v3 = vld [vmem:[%s1131_s1 + $0xe0] ss:$16 sps:$4 sm:$0xff]  }
   0x2   :  { %268 = vmatprep.subr.bf16.mxu0 %v827_v0  ;;  %v832_v4 = vld [vmem:[%s1131_s1 + $0xe8] ss:$16 sps:$4 sm:$0xff]   ;;  %381 = vmatprep.subr.bf16.mxu1 %v829_v2  ;;  %v833_v5 = vld [vmem:[%s1131_s1 + $0xc4] ss:$16 sps:$4 sm:$0xff]   ;;  %v835_v6 = vld [vmem:[%s1131_s1 + $0xcc] ss:$16 sps:$4 sm:$0xff]  }
   0x3   :  { %269 = vmatpush1.bf16.msra.mxu0 %v831_v3  ;;  %382 = vmatpush1.bf16.msra.mxu1 %v832_v4  ;;  %v837_v7 = vld [vmem:[%s1131_s1 + $0xc0] ss:$16 sps:$4 sm:$0xff]   ;;  %v838_v8 = vld [vmem:[%s1131_s1 + $0xc8] ss:$16 sps:$4 sm:$0xff]   ;;  %v839_v9 = vld [vmem:[%s1131_s1 + $0xa4] ss:$16 sps:$4 sm:$0xff]  }
   0x4   :  { %270 = vmatprep.subr.bf16.mxu0 %v833_v5  ;;  %383 = vmatprep.subr.bf16.mxu1 %v835_v6  ;;  %v841_v10 = vld [vmem:[%s1131_s1 + $0xac] ss:$16 sps:$4 sm:$0xff]   ;;  %v843_v11 = vld [vmem:[%s1131_s1 + $0xa0] ss:$16 sps:$4 sm:$0xff]   ;;  %v844_v12 = vld [vmem:[%s1131_s1 + $0xa8] ss:$16 sps:$4 sm:$0xff]  }
   0x5   :  { %v845_v13 = vld [vmem:[%s1131_s1 + $0x84] ss:$16 sps:$4 sm:$0xff]   ;;  %v847_v14 = vld [vmem:[%s1131_s1 + $0x8c] ss:$16 sps:$4 sm:$0xff]   ;;  %v849_v15 = vld [vmem:[%s1131_s1 + $0x80] ss:$16 sps:$4 sm:$0xff]  }
   0x6   :  { %v850_v16 = vld [vmem:[%s1131_s1 + $0x88] ss:$16 sps:$4 sm:$0xff]   ;;  %v851_v17 = vld [vmem:[%s1131_s1 + $0x64] ss:$16 sps:$4 sm:$0xff]   ;;  %v853_v18 = vld [vmem:[%s1131_s1 + $0x6c] ss:$16 sps:$4 sm:$0xff]  }
   0x7   :  { %271 = vmatpush1.bf16.msra.mxu0 %v837_v7  ;;  %384 = vmatpush1.bf16.msra.mxu1 %v838_v8  ;;  %v855_v19 = vld [vmem:[%s1131_s1 + $0x60] ss:$16 sps:$4 sm:$0xff]   ;;  %v856_v20 = vld [vmem:[%s1131_s1 + $0x68] ss:$16 sps:$4 sm:$0xff]   ;;  %v857_v21 = vld [vmem:[%s1131_s1 + $0x44] ss:$16 sps:$4 sm:$0xff]  }
   0x8   :  { %272 = vmatprep.subr.bf16.mxu0 %v839_v9  ;;  %385 = vmatprep.subr.bf16.mxu1 %v841_v10  ;;  %v859_v22 = vld [vmem:[%s1131_s1 + $0x4c] ss:$16 sps:$4 sm:$0xff]   ;;  %v861_v23 = vld [vmem:[%s1131_s1 + $0x40] ss:$16 sps:$4 sm:$0xff]   ;;  %v862_v24 = vld [vmem:[%s1131_s1 + $0x48] ss:$16 sps:$4 sm:$0xff]  }
   0x9   :  { %v863_v25 = vld [vmem:[%s1131_s1 + $0x24] ss:$16 sps:$4 sm:$0xff]   ;;  %v865_v26 = vld [vmem:[%s1131_s1 + $0x2c] ss:$16 sps:$4 sm:$0xff]   ;;  %v867_v27 = vld [vmem:[%s1131_s1 + $0x20] ss:$16 sps:$4 sm:$0xff]  }
   0xa   :  { %v868_v28 = vld [vmem:[%s1131_s1 + $0x28] ss:$16 sps:$4 sm:$0xff]   ;;  %v869_v29 = vld [vmem:[%s1131_s1 + $0x4] ss:$16 sps:$4 sm:$0xff]   ;;  %v871_v30 = vld [vmem:[%s1131_s1 + $0xc] ss:$16 sps:$4 sm:$0xff]  }
   0xb   :  { %273 = vmatpush1.bf16.msra.mxu0 %v843_v11  ;;  %386 = vmatpush1.bf16.msra.mxu1 %v844_v12  ;;  %v873_v31 = vld [vmem:[%s1131_s1] ss:$16 sps:$4 sm:$0xff]   ;;  %v874_v32 = vld [vmem:[%s1131_s1 + $0x8] ss:$16 sps:$4 sm:$0xff]  }
   0xc   :  { %274 = vmatprep.subr.bf16.mxu0 %v845_v13  ;;  %387 = vmatprep.subr.bf16.mxu1 %v847_v14  ;;  %v875_v33 = vld [vmem:[%s1132_s0] sm:$0xff]   ;;  %v876_v34 = vld [vmem:[%s1132_s0 + $0x8] sm:$0xff]   ;;  %v877_v35 = vld [vmem:[%s1132_s0 + $0x10] sm:$0xff]  }
   0xd   :  { %v878_v36 = vld [vmem:[%s1132_s0 + $0x18] sm:$0xff]   ;;  %v879_v37 = vld [vmem:[%s1132_s0 + $0x20] sm:$0xff]   ;;  %v880_v38 = vld [vmem:[%s1132_s0 + $0x28] sm:$0xff]  }
   0xe   :  { %v881_v39 = vld [vmem:[%s1132_s0 + $0x30] sm:$0xff]   ;;  %v882_v40 = vld [vmem:[%s1132_s0 + $0x38] sm:$0xff]  }
   0xf   :  { %275 = vmatpush1.bf16.msra.mxu0 %v849_v15  ;;  %388 = vmatpush1.bf16.msra.mxu1 %v850_v16 }
  0x10   :  { %276 = vmatprep.subr.bf16.mxu0 %v851_v17  ;;  %389 = vmatprep.subr.bf16.mxu1 %v853_v18 }
  0x13   :  { %277 = vmatpush1.bf16.msra.mxu0 %v855_v19  ;;  %390 = vmatpush1.bf16.msra.mxu1 %v856_v20 }
  0x14   :  { %278 = vmatprep.subr.bf16.mxu0 %v857_v21  ;;  %391 = vmatprep.subr.bf16.mxu1 %v859_v22 }
  0x17   :  { %279 = vmatpush1.bf16.msra.mxu0 %v861_v23  ;;  %392 = vmatpush1.bf16.msra.mxu1 %v862_v24 }
  0x18   :  { %280 = vmatprep.subr.bf16.mxu0 %v863_v25  ;;  %393 = vmatprep.subr.bf16.mxu1 %v865_v26 }
  0x1b   :  { %281 = vmatpush1.bf16.msra.mxu0 %v867_v27  ;;  %394 = vmatpush1.bf16.msra.mxu1 %v868_v28 }
  0x1c   :  { %282 = vmatprep.subr.bf16.mxu0 %v869_v29  ;;  %395 = vmatprep.subr.bf16.mxu1 %v871_v30 }
  0x1f   :  { %283 = vmatpush1.bf16.msra.mxu0 %v873_v31  ;;  %396 = vmatpush1.bf16.msra.mxu1 %v874_v32 }
  0x22   :  { %301 = vmatmul.mubr.bf16.vlgmr.msra.gmra.mxu0 %v875_v33  ;;  %414 = vmatmul.mubr.bf16.vlgmr.msra.gmra.mxu1 %v875_v33 }
  0x23   :  { %310 = vmatprep.mubr.bf16.mxu0 %v883_v1  ;;  %423 = vmatprep.mubr.bf16.mxu1 %v883_v1 }
  0x2a   :  { %311 = vmatmul.mubr.bf16.gmra.mxu0 %v876_v34  ;;  %424 = vmatmul.mubr.bf16.gmra.mxu1 %v876_v34 }
  0x2b   :  { %320 = vmatprep.mubr.bf16.mxu0 %v883_v1  ;;  %433 = vmatprep.mubr.bf16.mxu1 %v883_v1 }
  0x32   :  { %321 = vmatmul.mubr.bf16.gmra.mxu0 %v877_v35  ;;  %434 = vmatmul.mubr.bf16.gmra.mxu1 %v877_v35 }
  0x33   :  { %330 = vmatprep.mubr.bf16.mxu0 %v883_v1  ;;  %443 = vmatprep.mubr.bf16.mxu1 %v883_v1 }
  0x3a   :  { %331 = vmatmul.mubr.bf16.gmra.mxu0 %v878_v36  ;;  %444 = vmatmul.mubr.bf16.gmra.mxu1 %v878_v36 }
  0x3b   :  { %340 = vmatprep.mubr.bf16.mxu0 %v883_v1  ;;  %453 = vmatprep.mubr.bf16.mxu1 %v883_v1 }
  0x42   :  { %341 = vmatmul.mubr.bf16.gmra.mxu0 %v879_v37  ;;  %454 = vmatmul.mubr.bf16.gmra.mxu1 %v879_v37 }
  0x43   :  { %350 = vmatprep.mubr.bf16.mxu0 %v883_v1  ;;  %463 = vmatprep.mubr.bf16.mxu1 %v883_v1 }
  0x4a   :  { %351 = vmatmul.mubr.bf16.gmra.mxu0 %v880_v38  ;;  %464 = vmatmul.mubr.bf16.gmra.mxu1 %v880_v38 }
  0x4b   :  { %360 = vmatprep.mubr.bf16.mxu0 %v883_v1  ;;  %473 = vmatprep.mubr.bf16.mxu1 %v883_v1 }
  0x52   :  { %361 = vmatmul.mubr.bf16.gmra.mxu0 %v881_v39  ;;  %474 = vmatmul.mubr.bf16.gmra.mxu1 %v881_v39 }
  0x53   :  { %370 = vmatprep.mubr.bf16.mxu0 %v883_v1  ;;  %483 = vmatprep.mubr.bf16.mxu1 %v883_v1 }
  0x5a   :  { %371 = vmatmul.mubr.bf16.gmra.mxu0 %v882_v40  ;;  %484 = vmatmul.mubr.bf16.gmra.mxu1 %v882_v40 }
  0xe2   :  { %v302_v41 = vpop.f32.mrf.mxu0  ;;  %v415_v42 = vpop.f32.mrf.mxu1 }
  0xe4   :  { %v304_v43 = vpop.f32.mrf.mxu0  ;;  %v417_v44 = vpop.f32.mrf.mxu1 }
  0xe5   :  { %v794_v45 = vpack.c.bf16 %v304_v43, %v302_v41  ;;  %v795_v46 = vpack.c.bf16 %v417_v44, %v415_v42 }
  0xe6   :  { %v306_v47 = vpop.f32.mrf.mxu0  ;;  %v419_v48 = vpop.f32.mrf.mxu1 }
  0xe7   :  { %686 = vst [vmem:[%s1133_s2] sm:$0xff] %v794_v45  ;;  %687 = vst [vmem:[%s1133_s2 + $0x8] sm:$0xff] %v795_v46 }
  0xe8   :  { %v308_v49 = vpop.f32.mrf.mxu0  ;;  %v421_v50 = vpop.f32.mrf.mxu1 }
  0xe9   :  { %v796_v51 = vpack.c.bf16 %v308_v49, %v306_v47  ;;  %v797_v52 = vpack.c.bf16 %v421_v50, %v419_v48 }
  0xea   :  { %v312_v53 = vpop.f32.mrf.mxu0  ;;  %v425_v54 = vpop.f32.mrf.mxu1 }
  0xeb   :  { %688 = vst [vmem:[%s1133_s2 + $0x10] sm:$0xff] %v796_v51  ;;  %689 = vst [vmem:[%s1133_s2 + $0x18] sm:$0xff] %v797_v52 }
  0xec   :  { %v314_v55 = vpop.f32.mrf.mxu0  ;;  %v427_v56 = vpop.f32.mrf.mxu1 }
  0xed   :  { %v798_v57 = vpack.c.bf16 %v314_v55, %v312_v53  ;;  %v799_v58 = vpack.c.bf16 %v427_v56, %v425_v54 }
  0xee   :  { %v316_v59 = vpop.f32.mrf.mxu0  ;;  %v429_v60 = vpop.f32.mrf.mxu1 }
  0xef   :  { %690 = vst [vmem:[%s1133_s2 + $0x20] sm:$0xff] %v798_v57  ;;  %691 = vst [vmem:[%s1133_s2 + $0x28] sm:$0xff] %v799_v58 }
  0xf0   :  { %v318_v61 = vpop.f32.mrf.mxu0  ;;  %v431_v62 = vpop.f32.mrf.mxu1 }
  0xf1   :  { %v800_v63 = vpack.c.bf16 %v318_v61, %v316_v59  ;;  %v801_v0 = vpack.c.bf16 %v431_v62, %v429_v60 }
  0xf2   :  { %v322_v1 = vpop.f32.mrf.mxu0  ;;  %v435_v2 = vpop.f32.mrf.mxu1 }
  0xf3   :  { %692 = vst [vmem:[%s1133_s2 + $0x30] sm:$0xff] %v800_v63  ;;  %693 = vst [vmem:[%s1133_s2 + $0x38] sm:$0xff] %v801_v0 }
  0xf4   :  { %v324_v3 = vpop.f32.mrf.mxu0  ;;  %v437_v4 = vpop.f32.mrf.mxu1 }
  0xf5   :  { %v802_v5 = vpack.c.bf16 %v324_v3, %v322_v1  ;;  %v803_v6 = vpack.c.bf16 %v437_v4, %v435_v2 }
  0xf6   :  { %v326_v7 = vpop.f32.mrf.mxu0  ;;  %v439_v8 = vpop.f32.mrf.mxu1 }
  0xf7   :  { %694 = vst [vmem:[%s1133_s2 + $0x40] sm:$0xff] %v802_v5  ;;  %695 = vst [vmem:[%s1133_s2 + $0x48] sm:$0xff] %v803_v6 }
  0xf8   :  { %v328_v9 = vpop.f32.mrf.mxu0  ;;  %v441_v10 = vpop.f32.mrf.mxu1 }
  0xf9   :  { %v804_v11 = vpack.c.bf16 %v328_v9, %v326_v7  ;;  %v805_v12 = vpack.c.bf16 %v441_v10, %v439_v8 }
  0xfa   :  { %v332_v13 = vpop.f32.mrf.mxu0  ;;  %v445_v14 = vpop.f32.mrf.mxu1 }
  0xfb   :  { %696 = vst [vmem:[%s1133_s2 + $0x50] sm:$0xff] %v804_v11  ;;  %697 = vst [vmem:[%s1133_s2 + $0x58] sm:$0xff] %v805_v12 }
  0xfc   :  { %v334_v15 = vpop.f32.mrf.mxu0  ;;  %v447_v16 = vpop.f32.mrf.mxu1 }
  0xfd   :  { %v806_v17 = vpack.c.bf16 %v334_v15, %v332_v13  ;;  %v807_v18 = vpack.c.bf16 %v447_v16, %v445_v14 }
  0xfe   :  { %v336_v19 = vpop.f32.mrf.mxu0  ;;  %v449_v20 = vpop.f32.mrf.mxu1 }
  0xff   :  { %698 = vst [vmem:[%s1133_s2 + $0x60] sm:$0xff] %v806_v17  ;;  %699 = vst [vmem:[%s1133_s2 + $0x68] sm:$0xff] %v807_v18 }
 0x100   :  { %v338_v21 = vpop.f32.mrf.mxu0  ;;  %v451_v22 = vpop.f32.mrf.mxu1 }
 0x101   :  { %v808_v23 = vpack.c.bf16 %v338_v21, %v336_v19  ;;  %v809_v24 = vpack.c.bf16 %v451_v22, %v449_v20 }
 0x102   :  { %v342_v25 = vpop.f32.mrf.mxu0  ;;  %v455_v26 = vpop.f32.mrf.mxu1 }
 0x103   :  { %700 = vst [vmem:[%s1133_s2 + $0x70] sm:$0xff] %v808_v23  ;;  %701 = vst [vmem:[%s1133_s2 + $0x78] sm:$0xff] %v809_v24 }
 0x104   :  { %v344_v27 = vpop.f32.mrf.mxu0  ;;  %v457_v28 = vpop.f32.mrf.mxu1 }
 0x105   :  { %v810_v29 = vpack.c.bf16 %v344_v27, %v342_v25  ;;  %v811_v30 = vpack.c.bf16 %v457_v28, %v455_v26 }
 0x106   :  { %v346_v31 = vpop.f32.mrf.mxu0  ;;  %v459_v32 = vpop.f32.mrf.mxu1 }
 0x107   :  { %702 = vst [vmem:[%s1133_s2 + $0x80] sm:$0xff] %v810_v29  ;;  %703 = vst [vmem:[%s1133_s2 + $0x88] sm:$0xff] %v811_v30 }
 0x108   :  { %v348_v33 = vpop.f32.mrf.mxu0  ;;  %v461_v34 = vpop.f32.mrf.mxu1 }
 0x109   :  { %v812_v35 = vpack.c.bf16 %v348_v33, %v346_v31  ;;  %v813_v36 = vpack.c.bf16 %v461_v34, %v459_v32 }
 0x10a   :  { %v352_v37 = vpop.f32.mrf.mxu0  ;;  %v465_v38 = vpop.f32.mrf.mxu1 }
 0x10b   :  { %704 = vst [vmem:[%s1133_s2 + $0x90] sm:$0xff] %v812_v35  ;;  %705 = vst [vmem:[%s1133_s2 + $0x98] sm:$0xff] %v813_v36 }
 0x10c   :  { %v354_v39 = vpop.f32.mrf.mxu0  ;;  %v467_v40 = vpop.f32.mrf.mxu1 }
 0x10d   :  { %v814_v41 = vpack.c.bf16 %v354_v39, %v352_v37  ;;  %v815_v42 = vpack.c.bf16 %v467_v40, %v465_v38 }
 0x10e   :  { %v356_v43 = vpop.f32.mrf.mxu0  ;;  %v469_v44 = vpop.f32.mrf.mxu1 }
 0x10f   :  { %706 = vst [vmem:[%s1133_s2 + $0xa0] sm:$0xff] %v814_v41  ;;  %707 = vst [vmem:[%s1133_s2 + $0xa8] sm:$0xff] %v815_v42 }
 0x110   :  { %v358_v45 = vpop.f32.mrf.mxu0  ;;  %v471_v46 = vpop.f32.mrf.mxu1 }
 0x111   :  { %v816_v47 = vpack.c.bf16 %v358_v45, %v356_v43  ;;  %v817_v48 = vpack.c.bf16 %v471_v46, %v469_v44 }
 0x112   :  { %v362_v49 = vpop.f32.mrf.mxu0  ;;  %v475_v50 = vpop.f32.mrf.mxu1 }
 0x113   :  { %708 = vst [vmem:[%s1133_s2 + $0xb0] sm:$0xff] %v816_v47  ;;  %709 = vst [vmem:[%s1133_s2 + $0xb8] sm:$0xff] %v817_v48 }
 0x114   :  { %v364_v51 = vpop.f32.mrf.mxu0  ;;  %v477_v52 = vpop.f32.mrf.mxu1 }
 0x115   :  { %v818_v53 = vpack.c.bf16 %v364_v51, %v362_v49  ;;  %v819_v54 = vpack.c.bf16 %v477_v52, %v475_v50 }
 0x116   :  { %v366_v55 = vpop.f32.mrf.mxu0  ;;  %v479_v56 = vpop.f32.mrf.mxu1 }
 0x117   :  { %710 = vst [vmem:[%s1133_s2 + $0xc0] sm:$0xff] %v818_v53  ;;  %711 = vst [vmem:[%s1133_s2 + $0xc8] sm:$0xff] %v819_v54 }
 0x118   :  { %v368_v57 = vpop.f32.mrf.mxu0  ;;  %v481_v58 = vpop.f32.mrf.mxu1 }
 0x119   :  { %v820_v59 = vpack.c.bf16 %v368_v57, %v366_v55  ;;  %v821_v60 = vpack.c.bf16 %v481_v58, %v479_v56 }
 0x11a   :  { %v372_v61 = vpop.f32.mrf.mxu0  ;;  %v485_v62 = vpop.f32.mrf.mxu1 }
 0x11b   :  { %712 = vst [vmem:[%s1133_s2 + $0xd0] sm:$0xff] %v820_v59  ;;  %713 = vst [vmem:[%s1133_s2 + $0xd8] sm:$0xff] %v821_v60 }
 0x11c   :  { %v374_v63 = vpop.f32.mrf.mxu0  ;;  %v487_v0 = vpop.f32.mrf.mxu1 }
 0x11d   :  { %v822_v1 = vpack.c.bf16 %v374_v63, %v372_v61  ;;  %v823_v2 = vpack.c.bf16 %v487_v0, %v485_v62 }
 0x11e   :  { %v376_v3 = vpop.f32.mrf.mxu0  ;;  %v489_v4 = vpop.f32.mrf.mxu1 }
 0x11f   :  { %714 = vst [vmem:[%s1133_s2 + $0xe0] sm:$0xff] %v822_v1  ;;  %715 = vst [vmem:[%s1133_s2 + $0xe8] sm:$0xff] %v823_v2 }
 0x120   :  { %v378_v5 = vpop.f32.mrf.mxu0  ;;  %v491_v6 = vpop.f32.mrf.mxu1 }
 0x121   :  { %v824_v7 = vpack.c.bf16 %v378_v5, %v376_v3  ;;  %v825_v8 = vpack.c.bf16 %v491_v6, %v489_v4 }
 0x123   :  { %716 = vst [vmem:[%s1133_s2 + $0xf0] sm:$0xff] %v824_v7  ;;  %717 = vst [vmem:[%s1133_s2 + $0xf8] sm:$0xff] %v825_v8 }

// kernel: decoder_rnn_forward.4
= control target key start
LH: loop header
LB: loop body
LE: loop exit
PB: predicated region body
PF: predicated region fallthrough
CT: control target
= control target key end

     0   :  { %s4607_s0 = inlined_call_operand.vmem [shape: bf16[8,16,512], index: 0, kind: input, shape index: {}]   ;;  %s4608_s1 = inlined_call_operand.vmem [shape: f32[1,512], index: 1, kind: input, shape index: {}]   ;;  %s4609_s2 = inlined_call_operand.vmem [shape: bf16[128,512], index: 2, kind: input, shape index: {}]   ;;  %s4610_s3 = inlined_call_operand.vmem [shape: bf16[8,16,128], index: 3, kind: output, shape index: {}]  }
   0x1   :  { %v3879_v0 = vld [vmem:[%s4609_s2] sm:$0xff]  ;;  %v3884_v1 = vld [vmem:[%s4609_s2 + $0x8] sm:$0xff]  ;;  %v3889_v2 = vld [vmem:[%s4609_s2 + $0x10] sm:$0xff] }
   0x2   :  { %v3894_v3 = vld [vmem:[%s4609_s2 + $0x18] sm:$0xff]  ;;  %v3899_v4 = vld [vmem:[%s4609_s2 + $0x20] sm:$0xff]  ;;  %v3904_v5 = vld [vmem:[%s4609_s2 + $0x28] sm:$0xff] }
   0x3   :  { %v3909_v6 = vld [vmem:[%s4609_s2 + $0x30] sm:$0xff]  ;;  %v3914_v7 = vld [vmem:[%s4609_s2 + $0x38] sm:$0xff]  ;;  %v3919_v8 = vld [vmem:[%s4609_s2 + $0x40] sm:$0xff] }
   0x4   :  { %v3924_v9 = vld [vmem:[%s4609_s2 + $0x48] sm:$0xff]  ;;  %v3929_v10 = vld [vmem:[%s4609_s2 + $0x50] sm:$0xff]  ;;  %v3934_v11 = vld [vmem:[%s4609_s2 + $0x58] sm:$0xff] }
   0x5   :  { %v74_v12 = vld [vmem:[%s4609_s2 + $0x60] sm:$0xff]  ;;  %v76_v13 = vld [vmem:[%s4609_s2 + $0x68] sm:$0xff]  ;;  %v78_v14 = vld [vmem:[%s4609_s2 + $0x70] sm:$0xff] }
   0x6   :  { %v80_v15 = vld [vmem:[%s4609_s2 + $0x78] sm:$0xff]  ;;  %v82_v16 = vld [vmem:[%s4609_s2 + $0x80] sm:$0xff]  ;;  %v84_v17 = vld [vmem:[%s4609_s2 + $0x88] sm:$0xff] }
   0x7   :  { %v86_v18 = vld [vmem:[%s4609_s2 + $0x90] sm:$0xff]  ;;  %v88_v19 = vld [vmem:[%s4609_s2 + $0x98] sm:$0xff]  ;;  %v90_v20 = vld [vmem:[%s4609_s2 + $0xa0] sm:$0xff] }
   0x8   :  { %v92_v21 = vld [vmem:[%s4609_s2 + $0xa8] sm:$0xff]  ;;  %v94_v22 = vld [vmem:[%s4609_s2 + $0xb0] sm:$0xff]  ;;  %v96_v23 = vld [vmem:[%s4609_s2 + $0xb8] sm:$0xff] }
   0x9   :  { %v98_v24 = vld [vmem:[%s4609_s2 + $0xc0] sm:$0xff]  ;;  %v100_v25 = vld [vmem:[%s4609_s2 + $0xc8] sm:$0xff]  ;;  %v102_v26 = vld [vmem:[%s4609_s2 + $0xd0] sm:$0xff] }
   0xa   :  { %v104_v27 = vld [vmem:[%s4609_s2 + $0xd8] sm:$0xff]  ;;  %v106_v28 = vld [vmem:[%s4609_s2 + $0xe0] sm:$0xff]  ;;  %v108_v29 = vld [vmem:[%s4609_s2 + $0xe8] sm:$0xff] }
   0xb   :  { %v110_v30 = vld [vmem:[%s4609_s2 + $0xf0] sm:$0xff]  ;;  %v112_v31 = vld [vmem:[%s4609_s2 + $0xf8] sm:$0xff] }
   0xc   :  { %121 = vsyncadd [#allocation5], 4096  ;;  %v3996_v32 = vcombine.high %v106_v28, %v110_v30  ;;  %v3998_v33 = vcombine.low %v106_v28, %v110_v30  ;;  %v4000_v34 = vcombine.high %v98_v24, %v102_v26 }
   0xd   :  { %3852 = dma.done.wait [#allocation5], 4096 }
   0xe   :  { %3853 = vsyncadd [#allocation5], 4294963200  ;;  %v4002_v35 = vcombine.high %v108_v29, %v112_v31  ;;  %369 = vmatprep.subr.bf16.mxu0 %v3996_v32  ;;  %v4005_v36 = vcombine.low %v108_v29, %v112_v31  ;;  %v4007_v37 = vcombine.high %v100_v25, %v104_v27  ;;  %v4010_v38 = vcombine.low %v98_v24, %v102_v26  ;;  %v136_v26 = vld [vmem:[%s4607_s0 + $0x8] sm:$0xff] }
   0xf   :  { %370 = vmatpush1.bf16.msra.mxu0 %v3998_v33  ;;  %v4014_v39 = vcombine.high %v90_v20, %v94_v22  ;;  %v4017_v40 = vcombine.low %v100_v25, %v104_v27  ;;  %v4020_v41 = vcombine.high %v92_v21, %v96_v23  ;;  %v3854_v42 = vmov 0  }
  0x10   :  { %412 = vmatprep.subr.bf16.mxu1 %v4002_v35  ;;  %371 = vmatprep.subr.bf16.mxu0 %v4000_v34  ;;  %v4024_v43 = vcombine.low %v90_v20, %v94_v22  ;;  %v4027_v44 = vcombine.high %v82_v16, %v86_v18  ;;  %v4030_v45 = vcombine.low %v92_v21, %v96_v23 }
  0x11   :  { %413 = vmatpush1.bf16.msra.mxu1 %v4005_v36  ;;  %401 = vmatprep.mubr.bf16.mxu0 %v3854_v42  ;;  %v4033_v46 = vcombine.high %v84_v17, %v88_v19  ;;  %v4037_v47 = vcombine.low %v82_v16, %v86_v18  ;;  %v4040_v48 = vcombine.high %v74_v12, %v78_v14 }
  0x12   :  { %414 = vmatprep.subr.bf16.mxu1 %v4007_v37  ;;  %444 = vmatprep.mubr.bf16.mxu1 %v3854_v42  ;;  %v4043_v49 = vcombine.low %v84_v17, %v88_v19  ;;  %v4046_v50 = vcombine.high %v76_v13, %v80_v15  ;;  %v4049_v51 = vcombine.low %v74_v12, %v78_v14 }
  0x13   :  { %372 = vmatpush1.bf16.msra.mxu0 %v4010_v38  ;;  %v4054_v52 = vcombine.high %v3919_v8, %v3929_v10  ;;  %v4057_v53 = vcombine.low %v76_v13, %v80_v15  ;;  %v4062_v54 = vcombine.high %v3924_v9, %v3934_v11  ;;  %v4067_v55 = vcombine.low %v3919_v8, %v3929_v10  ;;  %v137_v10 = vld [vmem:[%s4607_s0 + $0x10] sm:$0xff] }
  0x14   :  { %373 = vmatprep.subr.bf16.mxu0 %v4014_v39  ;;  %v4072_v56 = vcombine.high %v3899_v4, %v3909_v6  ;;  %v4077_v57 = vcombine.low %v3924_v9, %v3934_v11  ;;  %v4082_v58 = vcombine.high %v3904_v5, %v3914_v7  ;;  %v4087_v59 = vcombine.low %v3899_v4, %v3909_v6  ;;  %v135_v6 = vld [vmem:[%s4607_s0] sm:$0xff] }
  0x15   :  { %415 = vmatpush1.bf16.msra.mxu1 %v4017_v40  ;;  %v4092_v60 = vcombine.high %v3879_v0, %v3889_v2  ;;  %v4097_v61 = vcombine.low %v3904_v5, %v3914_v7  ;;  %v4102_v62 = vcombine.high %v3884_v1, %v3894_v3  ;;  %v4107_v63 = vcombine.low %v3879_v0, %v3889_v2  ;;  %v130_v5 = vld [vmem:[%s4608_s1] sm:$0xf] }
  0x16   :  { %416 = vmatprep.subr.bf16.mxu1 %v4020_v41  ;;  %v4113_v4 = vcombine.low %v3884_v1, %v3894_v3  ;;  %v3855_v0 = vmov 0.0|0.0   ;;  %v148_v1 = vlaneseq  ;;  %v139_v8 = vunpack.c.l.bf16 %v135_v6 }
  0x17   :  { %374 = vmatpush1.bf16.msra.mxu0 %v4024_v43  ;;  %v140_v11 = vunpack.c.h.bf16 %v135_v6  ;;  %v143_v14 = vunpack.c.l.bf16 %v137_v10  ;;  %v144_v16 = vunpack.c.h.bf16 %v137_v10  ;;  %v141_v10 = vunpack.c.l.bf16 %v136_v26 }
  0x18   :  { %375 = vmatprep.subr.bf16.mxu0 %v4027_v44  ;;  %v149_v2 = vshrl.u32 %v148_v1, 7 }
  0x19   :  { %417 = vmatpush1.bf16.msra.mxu1 %v4030_v45 }
  0x1a   :  { %418 = vmatprep.subr.bf16.mxu1 %v4033_v46  ;;  %v150_v3 = vsub.s32 0, %v149_v2  ;;  %v154_v7 = vsub.s32 1, %v149_v2  ;;  %v162_v22 = vsub.s32 3, %v149_v2  ;;  %v158_v28 = vsub.s32 2, %v149_v2 }
  0x1b   :  { %376 = vmatpush1.bf16.msra.mxu0 %v4037_v47 }
  0x1c   :  { %377 = vmatprep.subr.bf16.mxu0 %v4040_v48  ;;  %v4160_v9 = vrot.slane %v130_v5, %v150_v3  ;;  %v4165_v12 = vrot.slane %v130_v5, %v154_v7  ;;  %v142_v3 = vunpack.c.h.bf16 %v136_v26  ;;  %v4177_v6 = vrot.slane %v130_v5, %v162_v22 }
  0x1d   :  { %419 = vmatpush1.bf16.msra.mxu1 %v4043_v49 }
  0x1e   :  { %420 = vmatprep.subr.bf16.mxu1 %v4046_v50  ;;  %v168_v13 = vadd.f32 %v4160_v9, %v139_v8  ;;  %v169_v15 = vadd.f32 %v4165_v12, %v140_v11  ;;  %v172_v19 = vadd.f32 %v4160_v9, %v143_v14  ;;  %v173_v25 = vadd.f32 %v4165_v12, %v144_v16 }
  0x1f   :  { %378 = vmatpush1.bf16.msra.mxu0 %v4049_v51  ;;  %v4179_v11 = vrot.slane %v130_v5, %v158_v28 }
  0x20   :  { %379 = vmatprep.subr.bf16.mxu0 %v4054_v52 }
  0x21   :  { %421 = vmatpush1.bf16.msra.mxu1 %v4057_v53  ;;  %v170_v16 = vadd.f32 %v4179_v11, %v141_v10 }
  0x22   :  { %422 = vmatprep.subr.bf16.mxu1 %v4062_v54 }
  0x23   :  { %380 = vmatpush1.bf16.msra.mxu0 %v4067_v55 }
  0x24   :  { %381 = vmatprep.subr.bf16.mxu0 %v4072_v56 }
  0x25   :  { %423 = vmatpush1.bf16.msra.mxu1 %v4077_v57 }
  0x26   :  { %424 = vmatprep.subr.bf16.mxu1 %v4082_v58 }
  0x27   :  { %382 = vmatpush1.bf16.msra.mxu0 %v4087_v59 }
  0x28   :  { %383 = vmatprep.subr.bf16.mxu0 %v4092_v60 }
  0x29   :  { %425 = vmatpush1.bf16.msra.mxu1 %v4097_v61 }
  0x2a   :  { %426 = vmatprep.subr.bf16.mxu1 %v4102_v62 }
  0x2b   :  { %384 = vmatpush1.bf16.msra.mxu0 %v4107_v63 }
  0x2c   :  { %743 = vmatprep.subr.bf16.mxu0 %v3996_v32 }
  0x2d   :  { %427 = vmatpush1.bf16.msra.mxu1 %v4113_v4 }
  0x2e   :  { %786 = vmatprep.subr.bf16.mxu1 %v4002_v35  ;;  %402 = vmatmul.mubr.bf16.vlgmr.msra.gmra.mxu0 %v3855_v0 }
  0x2f   :  { %744 = vmatpush1.bf16.msra.mxu0 %v3998_v33  ;;  %775 = vmatprep.mubr.bf16.mxu0 %v3854_v42 }
  0x30   :  { %445 = vmatmul.mubr.bf16.vlgmr.msra.gmra.mxu1 %v3855_v0  ;;  %745 = vmatprep.subr.bf16.mxu0 %v4000_v34  ;;  %v138_v0 = vld [vmem:[%s4607_s0 + $0x18] sm:$0xff] }
  0x31   :  { %787 = vmatpush1.bf16.msra.mxu1 %v4005_v36  ;;  %818 = vmatprep.mubr.bf16.mxu1 %v3854_v42 }
  0x32   :  { %788 = vmatprep.subr.bf16.mxu1 %v4007_v37 }
  0x33   :  { %746 = vmatpush1.bf16.msra.mxu0 %v4010_v38 }
  0x34   :  { %747 = vmatprep.subr.bf16.mxu0 %v4014_v39 }
  0x35   :  { %789 = vmatpush1.bf16.msra.mxu1 %v4017_v40 }
  0x36   :  { %790 = vmatprep.subr.bf16.mxu1 %v4020_v41 }
  0x37   :  { %748 = vmatpush1.bf16.msra.mxu0 %v4024_v43 }
  0x38   :  { %749 = vmatprep.subr.bf16.mxu0 %v4027_v44 }
  0x39   :  { %791 = vmatpush1.bf16.msra.mxu1 %v4030_v45 }
  0x3a   :  { %792 = vmatprep.subr.bf16.mxu1 %v4033_v46 }
  0x3b   :  { %750 = vmatpush1.bf16.msra.mxu0 %v4037_v47 }
  0x3c   :  { %751 = vmatprep.subr.bf16.mxu0 %v4040_v48 }
  0x3d   :  { %793 = vmatpush1.bf16.msra.mxu1 %v4043_v49 }
  0x3e   :  { %794 = vmatprep.subr.bf16.mxu1 %v4046_v50 }
  0x3f   :  { %752 = vmatpush1.bf16.msra.mxu0 %v4049_v51 }
  0x40   :  { %753 = vmatprep.subr.bf16.mxu0 %v4054_v52 }
  0x41   :  { %795 = vmatpush1.bf16.msra.mxu1 %v4057_v53 }
  0x42   :  { %796 = vmatprep.subr.bf16.mxu1 %v4062_v54 }
  0x43   :  { %754 = vmatpush1.bf16.msra.mxu0 %v4067_v55 }
  0x44   :  { %755 = vmatprep.subr.bf16.mxu0 %v4072_v56 }
  0x45   :  { %797 = vmatpush1.bf16.msra.mxu1 %v4077_v57 }
  0x46   :  { %798 = vmatprep.subr.bf16.mxu1 %v4082_v58 }
  0x47   :  { %756 = vmatpush1.bf16.msra.mxu0 %v4087_v59 }
  0x48   :  { %757 = vmatprep.subr.bf16.mxu0 %v4092_v60 }
  0x49   :  { %799 = vmatpush1.bf16.msra.mxu1 %v4097_v61 }
  0x4a   :  { %800 = vmatprep.subr.bf16.mxu1 %v4102_v62 }
  0x4b   :  { %758 = vmatpush1.bf16.msra.mxu0 %v4107_v63 }
  0x4c   :  { %1118 = vmatprep.subr.bf16.mxu0 %v3996_v32 }
  0x4d   :  { %801 = vmatpush1.bf16.msra.mxu1 %v4113_v4 }
  0x4e   :  { %1161 = vmatprep.subr.bf16.mxu1 %v4002_v35 }
  0xee   :  { %v403_v17 = vpop.f32.mrf.mxu0 }
  0xef   :  { %v455_v18 = vadd.f32 %v403_v17, %v168_v13  ;;  %v146_v13 = vunpack.c.h.bf16 %v138_v0 }
  0xf0   :  { %v446_v20 = vpop.f32.mrf.mxu1  ;;  %v405_v21 = vpop.f32.mrf.mxu0 }
  0xf1   :  { %v3200_v23 = vmul.f32 -1.442695, %v455_v18  ;;  %v456_v24 = vadd.f32 %v405_v21, %v169_v15  ;;  %v171_v15 = vadd.f32 %v4177_v6, %v142_v3  ;;  %v175_v17 = vadd.f32 %v4177_v6, %v146_v13 }
  0xf2   :  { %v407_v27 = vpop.f32.mrf.mxu0  ;;  %v448_v31 = vpop.f32.mrf.mxu1  ;;  %v145_v21 = vunpack.c.l.bf16 %v138_v0  ;;  %v457_v22 = vadd.f32 %v446_v20, %v170_v16 }
  0xf3   :  { %3596 = vpow2.f32 %v3200_v23  ;;  %v3202_v29 = vmul.f32 -1.442695, %v456_v24  ;;  %v459_v30 = vadd.f32 %v407_v27, %v172_v19  ;;  %v458_v19 = vadd.f32 %v448_v31, %v171_v15 }
  0xf4   :  { %v409_v1 = vpop.f32.mrf.mxu0  ;;  %v450_v14 = vpop.f32.mrf.mxu1  ;;  %v174_v5 = vadd.f32 %v4179_v11, %v145_v21 }
  0xf5   :  { %3598 = vpow2.f32 %v3202_v29  ;;  %v3201_v7 = vmul.f32 -1.442695, %v459_v30  ;;  %v460_v8 = vadd.f32 %v409_v1, %v173_v25  ;;  %v3204_v25 = vmul.f32 -1.442695, %v458_v19 }
  0xf6   :  { %v452_v18 = vpop.f32.mrf.mxu1  ;;  %v461_v1 = vadd.f32 %v450_v14, %v174_v5 }
  0xf7   :  { %3600 = vpow2.f32 %v3201_v7  ;;  %v3203_v2 = vmul.f32 -1.442695, %v460_v8  ;;  %v462_v23 = vadd.f32 %v452_v18, %v175_v17 }
  0xf9   :  { %3602 = vpow2.f32 %v3203_v2  ;;  %v3205_v28 = vmul.f32 -1.442695, %v462_v23 }
  0xfa   :  { %3604 = vtanh.f32 %v457_v22 }
 0x100   :  { %v3597_v24 = vpop.eup %3596 }
 0x101   :  { %v469_v26 = vadd.f32 1.0, %v3597_v24 }
 0x102   :  { %v3599_v27 = vpop.eup %3598 }
 0x103   :  { %3606 = vrcp.f32 %v469_v26  ;;  %v481_v29 = vadd.f32 1.0, %v3599_v27 }
 0x104   :  { %v3601_v30 = vpop.eup %3600  ;;  %3608 = vpow2.f32 %v3204_v25 }
 0x105   :  { %3610 = vrcp.f32 %v481_v29  ;;  %v470_v3 = vadd.f32 1.0, %v3601_v30 }
 0x106   :  { %v3603_v7 = vpop.eup %3602  ;;  %3612 = vpow2.f32 %v3205_v28 }
 0x107   :  { %3614 = vrcp.f32 %v470_v3  ;;  %v482_v20 = vadd.f32 1.0, %v3603_v7  ;;  %v3605_v31 = vpop.eup %3604  ;;  %v3210_v7 = vld [vmem:[%s4607_s0 + $0x30] sm:$0xff] }
 0x108   :  { %3616 = vtanh.f32 %v461_v1  ;;  %v3208_v1 = vld [vmem:[%s4607_s0 + $0x20] sm:$0xff] }
 0x109   :  { %3618 = vrcp.f32 %v482_v20  ;;  %v534_v3 = vunpack.c.l.bf16 %v3208_v1  ;;  %v535_v20 = vunpack.c.h.bf16 %v3208_v1 }
 0x110   :  { %v3607_v0 = vpop.eup %3606 }
 0x111   :  { %v3609_v8 = vpop.eup %3608  ;;  %v503_v15 = vmul.f32 %v3607_v0, %v3605_v31  ;;  %v542_v31 = vadd.f32 %v534_v3, %v4160_v9  ;;  %v538_v0 = vunpack.c.l.bf16 %v3210_v7 }
 0x112   :  { %v3611_v10 = vpop.eup %3610  ;;  %v495_v17 = vadd.f32 1.0, %v3609_v8  ;;  %v543_v8 = vadd.f32 %v535_v20, %v4165_v12 }
 0x113   :  { %v3613_v13 = vpop.eup %3612  ;;  %v501_v2 = vmul.f32 0.0, %v3611_v10  ;;  %v539_v10 = vunpack.c.h.bf16 %v3210_v7 }
 0x114   :  { %v3615_v16 = vpop.eup %3614  ;;  %v496_v21 = vadd.f32 1.0, %v3613_v13  ;;  %3620 = vrcp.f32 %v495_v17 }
 0x115   :  { %v3617_v18 = vpop.eup %3616  ;;  %v4185_v19 = vadd.f32 %v503_v15, %v501_v2 }
 0x116   :  { %v3619_v14 = vpop.eup %3618  ;;  %v504_v23 = vmul.f32 %v3617_v18, %v3615_v16  ;;  %v546_v16 = vadd.f32 %v538_v0, %v4160_v9 }
 0x117   :  { %v502_v22 = vmul.f32 0.0, %v3619_v14  ;;  %3622 = vtanh.f32 %v4185_v19 }
 0x118   :  { %3624 = vrcp.f32 %v496_v21  ;;  %v547_v21 = vadd.f32 %v539_v10, %v4165_v12 }
 0x119   :  { %v4188_v24 = vadd.f32 %v504_v23, %v502_v22  ;;  %v3209_v23 = vld [vmem:[%s4607_s0 + $0x28] sm:$0xff] }
 0x11a   :  { %v536_v3 = vunpack.c.l.bf16 %v3209_v23 }
 0x11b   :  { %3626 = vtanh.f32 %v4188_v24 }
 0x121   :  { %v3621_v25 = vpop.eup %3620 }
 0x124   :  { %v3623_v5 = vpop.eup %3622 }
 0x125   :  { %v3625_v26 = vpop.eup %3624  ;;  %v509_v28 = vmul.f32 %v3623_v5, %v3621_v25 }
 0x128   :  { %v3627_v27 = vpop.eup %3626 }
 0x129   :  { %v510_v29 = vmul.f32 %v3627_v27, %v3625_v26  ;;  %v537_v27 = vunpack.c.h.bf16 %v3209_v23 }
 0x12b   :  { %v3550_v30 = vpack.c.bf16 %v510_v29, %v509_v28  ;;  %v545_v0 = vadd.f32 %v537_v27, %v4177_v6 }
 0x12d   :  { %3551 = vst [vmem:[%s4610_s3] sm:$0xff] %v3550_v30   ;;  %776 = vmatmul.mubr.bf16.vlgmr.msra.gmra.mxu0 %v3550_v30  ;;  %819 = vmatmul.mubr.bf16.vlgmr.msra.gmra.mxu1 %v3550_v30  ;;  %v3211_v30 = vld [vmem:[%s4607_s0 + $0x38] sm:$0xff] }
 0x12e   :  { %1119 = vmatpush1.bf16.msra.mxu0 %v3998_v33  ;;  %1162 = vmatpush1.bf16.msra.mxu1 %v4005_v36  ;;  %v541_v7 = vunpack.c.h.bf16 %v3211_v30 }
 0x12f   :  { %1120 = vmatprep.subr.bf16.mxu0 %v4000_v34  ;;  %1163 = vmatprep.subr.bf16.mxu1 %v4007_v37 }
 0x130   :  { %1150 = vmatprep.mubr.bf16.mxu0 %v3854_v42  ;;  %1193 = vmatprep.mubr.bf16.mxu1 %v3854_v42  ;;  %v549_v10 = vadd.f32 %v541_v7, %v4177_v6 }
 0x132   :  { %1121 = vmatpush1.bf16.msra.mxu0 %v4010_v38  ;;  %1164 = vmatpush1.bf16.msra.mxu1 %v4017_v40 }
 0x133   :  { %1122 = vmatprep.subr.bf16.mxu0 %v4014_v39  ;;  %1165 = vmatprep.subr.bf16.mxu1 %v4020_v41 }
 0x136   :  { %1123 = vmatpush1.bf16.msra.mxu0 %v4024_v43  ;;  %1166 = vmatpush1.bf16.msra.mxu1 %v4030_v45 }
 0x137   :  { %1124 = vmatprep.subr.bf16.mxu0 %v4027_v44  ;;  %1167 = vmatprep.subr.bf16.mxu1 %v4033_v46 }
 0x13a   :  { %1125 = vmatpush1.bf16.msra.mxu0 %v4037_v47  ;;  %1168 = vmatpush1.bf16.msra.mxu1 %v4043_v49 }
 0x13b   :  { %1126 = vmatprep.subr.bf16.mxu0 %v4040_v48  ;;  %1169 = vmatprep.subr.bf16.mxu1 %v4046_v50 }
 0x13e   :  { %1127 = vmatpush1.bf16.msra.mxu0 %v4049_v51  ;;  %1170 = vmatpush1.bf16.msra.mxu1 %v4057_v53 }
 0x13f   :  { %1128 = vmatprep.subr.bf16.mxu0 %v4054_v52  ;;  %1171 = vmatprep.subr.bf16.mxu1 %v4062_v54 }
 0x142   :  { %1129 = vmatpush1.bf16.msra.mxu0 %v4067_v55  ;;  %1172 = vmatpush1.bf16.msra.mxu1 %v4077_v57 }
 0x143   :  { %1130 = vmatprep.subr.bf16.mxu0 %v4072_v56  ;;  %1173 = vmatprep.subr.bf16.mxu1 %v4082_v58 }
 0x146   :  { %1131 = vmatpush1.bf16.msra.mxu0 %v4087_v59  ;;  %1174 = vmatpush1.bf16.msra.mxu1 %v4097_v61 }
 0x147   :  { %1132 = vmatprep.subr.bf16.mxu0 %v4092_v60  ;;  %1175 = vmatprep.subr.bf16.mxu1 %v4102_v62 }
 0x14a   :  { %1133 = vmatpush1.bf16.msra.mxu0 %v4107_v63  ;;  %1176 = vmatpush1.bf16.msra.mxu1 %v4113_v4 }
 0x14b   :  { %1493 = vmatprep.subr.bf16.mxu0 %v3996_v32  ;;  %1536 = vmatprep.subr.bf16.mxu1 %v4002_v35 }
 0x1ed   :  { %v777_v13 = vpop.f32.mrf.mxu0  ;;  %v820_v15 = vpop.f32.mrf.mxu1 }
 0x1ee   :  { %v829_v2 = vadd.f32 %v777_v13, %v542_v31 }
 0x1ef   :  { %v779_v17 = vpop.f32.mrf.mxu0  ;;  %v822_v5 = vpop.f32.mrf.mxu1 }
 0x1f0   :  { %v3244_v18 = vmul.f32 -1.442695, %v829_v2  ;;  %v830_v14 = vadd.f32 %v779_v17, %v543_v8  ;;  %v544_v8 = vadd.f32 %v536_v3, %v4179_v11  ;;  %v832_v2 = vadd.f32 %v822_v5, %v545_v0 }
 0x1f1   :  { %v781_v22 = vpop.f32.mrf.mxu0  ;;  %v824_v20 = vpop.f32.mrf.mxu1 }
 0x1f2   :  { %3628 = vpow2.f32 %v3244_v18  ;;  %v3246_v25 = vmul.f32 -1.442695, %v830_v14  ;;  %v833_v26 = vadd.f32 %v781_v22, %v546_v16  ;;  %v540_v16 = vunpack.c.l.bf16 %v3211_v30 }
 0x1f3   :  { %v783_v28 = vpop.f32.mrf.mxu0  ;;  %v826_v13 = vpop.f32.mrf.mxu1  ;;  %v831_v17 = vadd.f32 %v820_v15, %v544_v8  ;;  %v3248_v22 = vmul.f32 -1.442695, %v832_v2 }
 0x1f4   :  { %3630 = vpow2.f32 %v3246_v25  ;;  %v3245_v29 = vmul.f32 -1.442695, %v833_v26  ;;  %v834_v1 = vadd.f32 %v783_v28, %v547_v21  ;;  %v836_v18 = vadd.f32 %v826_v13, %v549_v10 }
 0x1f5   :  { %v548_v21 = vadd.f32 %v540_v16, %v4179_v11 }
 0x1f6   :  { %3632 = vpow2.f32 %v3245_v29  ;;  %v3247_v31 = vmul.f32 -1.442695, %v834_v1  ;;  %v3249_v26 = vmul.f32 -1.442695, %v836_v18 }
 0x1f7   :  { %v835_v29 = vadd.f32 %v824_v20, %v548_v21 }
 0x1f8   :  { %3634 = vpow2.f32 %v3247_v31 }
 0x1f9   :  { %3636 = vtanh.f32 %v831_v17 }
 0x1ff   :  { %v3629_v14 = vpop.eup %3628 }
 0x200   :  { %v843_v23 = vadd.f32 1.0, %v3629_v14 }
 0x201   :  { %v3631_v25 = vpop.eup %3630 }
 0x202   :  { %3638 = vrcp.f32 %v843_v23  ;;  %v855_v27 = vadd.f32 1.0, %v3631_v25 }
 0x203   :  { %v3633_v28 = vpop.eup %3632  ;;  %3640 = vpow2.f32 %v3248_v22 }
 0x204   :  { %3642 = vrcp.f32 %v855_v27  ;;  %v844_v1 = vadd.f32 1.0, %v3633_v28 }
 0x205   :  { %v3635_v3 = vpop.eup %3634  ;;  %3644 = vpow2.f32 %v3249_v26 }
 0x206   :  { %3646 = vrcp.f32 %v844_v1  ;;  %v856_v15 = vadd.f32 1.0, %v3635_v3  ;;  %v3637_v5 = vpop.eup %3636  ;;  %v3256_v3 = vld [vmem:[%s4607_s0 + $0x50] sm:$0xff] }
 0x207   :  { %3648 = vtanh.f32 %v835_v29 }
 0x208   :  { %3650 = vrcp.f32 %v856_v15 }
 0x20f   :  { %v3639_v30 = vpop.eup %3638 }
 0x210   :  { %v3641_v7 = vpop.eup %3640  ;;  %v877_v8 = vmul.f32 %v3639_v30, %v3637_v5  ;;  %v913_v30 = vunpack.c.l.bf16 %v3256_v3 }
 0x211   :  { %v3643_v31 = vpop.eup %3642  ;;  %v869_v2 = vadd.f32 1.0, %v3641_v7 }
 0x212   :  { %v3645_v0 = vpop.eup %3644  ;;  %v875_v10 = vmul.f32 %v3643_v31, %v4185_v19  ;;  %v914_v31 = vunpack.c.h.bf16 %v3256_v3 }
 0x213   :  { %v3647_v13 = vpop.eup %3646  ;;  %v870_v18 = vadd.f32 1.0, %v3645_v0  ;;  %3652 = vrcp.f32 %v869_v2 }
 0x214   :  { %v3649_v16 = vpop.eup %3648  ;;  %v4249_v20 = vadd.f32 %v877_v8, %v875_v10 }
 0x215   :  { %v3651_v17 = vpop.eup %3650  ;;  %v878_v14 = vmul.f32 %v3649_v16, %v3647_v13  ;;  %v921_v13 = vadd.f32 %v913_v30, %v4160_v9 }
 0x216   :  { %v876_v22 = vmul.f32 %v3651_v17, %v4188_v24  ;;  %3654 = vtanh.f32 %v4249_v20  ;;  %v3254_v24 = vld [vmem:[%s4607_s0 + $0x40] sm:$0xff] }
 0x217   :  { %3656 = vrcp.f32 %v870_v18  ;;  %v909_v1 = vunpack.c.l.bf16 %v3254_v24  ;;  %v910_v15 = vunpack.c.h.bf16 %v3254_v24  ;;  %v922_v18 = vadd.f32 %v914_v31, %v4165_v12 }
 0x218   :  { %v4252_v21 = vadd.f32 %v878_v14, %v876_v22  ;;  %v3255_v22 = vld [vmem:[%s4607_s0 + $0x48] sm:$0xff] }
 0x219   :  { %v917_v5 = vadd.f32 %v909_v1, %v4160_v9  ;;  %v918_v7 = vadd.f32 %v910_v15, %v4165_v12  ;;  %v911_v1 = vunpack.c.l.bf16 %v3255_v22 }
 0x21a   :  { %3658 = vtanh.f32 %v4252_v21 }
 0x220   :  { %v3653_v23 = vpop.eup %3652 }
 0x223   :  { %v3655_v19 = vpop.eup %3654 }
 0x224   :  { %v3657_v25 = vpop.eup %3656  ;;  %v883_v27 = vmul.f32 %v3655_v19, %v3653_v23 }
 0x227   :  { %v3659_v26 = vpop.eup %3658 }
 0x228   :  { %v884_v28 = vmul.f32 %v3659_v26, %v3657_v25  ;;  %v912_v26 = vunpack.c.h.bf16 %v3255_v22 }
 0x22a   :  { %v3555_v29 = vpack.c.bf16 %v884_v28, %v883_v27  ;;  %v920_v30 = vadd.f32 %v912_v26, %v4177_v6 }
 0x22c   :  { %3587 = vst [vmem:[%s4610_s3 + $0x8] sm:$0xff] %v3555_v29   ;;  %1151 = vmatmul.mubr.bf16.vlgmr.msra.gmra.mxu0 %v3555_v29  ;;  %1194 = vmatmul.mubr.bf16.vlgmr.msra.gmra.mxu1 %v3555_v29  ;;  %v3257_v29 = vld [vmem:[%s4607_s0 + $0x58] sm:$0xff] }
 0x22d   :  { %1494 = vmatpush1.bf16.msra.mxu0 %v3998_v33  ;;  %1537 = vmatpush1.bf16.msra.mxu1 %v4005_v36  ;;  %v916_v3 = vunpack.c.h.bf16 %v3257_v29 }
 0x22e   :  { %1495 = vmatprep.subr.bf16.mxu0 %v4000_v34  ;;  %1538 = vmatprep.subr.bf16.mxu1 %v4007_v37 }
 0x22f   :  { %1525 = vmatprep.mubr.bf16.mxu0 %v3854_v42  ;;  %1568 = vmatprep.mubr.bf16.mxu1 %v3854_v42  ;;  %v924_v31 = vadd.f32 %v916_v3, %v4177_v6 }
 0x231   :  { %1496 = vmatpush1.bf16.msra.mxu0 %v4010_v38  ;;  %1539 = vmatpush1.bf16.msra.mxu1 %v4017_v40 }
 0x232   :  { %1497 = vmatprep.subr.bf16.mxu0 %v4014_v39  ;;  %1540 = vmatprep.subr.bf16.mxu1 %v4020_v41 }
 0x235   :  { %1498 = vmatpush1.bf16.msra.mxu0 %v4024_v43  ;;  %1541 = vmatpush1.bf16.msra.mxu1 %v4030_v45 }
 0x236   :  { %1499 = vmatprep.subr.bf16.mxu0 %v4027_v44  ;;  %1542 = vmatprep.subr.bf16.mxu1 %v4033_v46 }
 0x239   :  { %1500 = vmatpush1.bf16.msra.mxu0 %v4037_v47  ;;  %1543 = vmatpush1.bf16.msra.mxu1 %v4043_v49 }
 0x23a   :  { %1501 = vmatprep.subr.bf16.mxu0 %v4040_v48  ;;  %1544 = vmatprep.subr.bf16.mxu1 %v4046_v50 }
 0x23d   :  { %1502 = vmatpush1.bf16.msra.mxu0 %v4049_v51  ;;  %1545 = vmatpush1.bf16.msra.mxu1 %v4057_v53 }
 0x23e   :  { %1503 = vmatprep.subr.bf16.mxu0 %v4054_v52  ;;  %1546 = vmatprep.subr.bf16.mxu1 %v4062_v54 }
 0x241   :  { %1504 = vmatpush1.bf16.msra.mxu0 %v4067_v55  ;;  %1547 = vmatpush1.bf16.msra.mxu1 %v4077_v57 }
 0x242   :  { %1505 = vmatprep.subr.bf16.mxu0 %v4072_v56  ;;  %1548 = vmatprep.subr.bf16.mxu1 %v4082_v58 }
 0x245   :  { %1506 = vmatpush1.bf16.msra.mxu0 %v4087_v59  ;;  %1549 = vmatpush1.bf16.msra.mxu1 %v4097_v61 }
 0x246   :  { %1507 = vmatprep.subr.bf16.mxu0 %v4092_v60  ;;  %1550 = vmatprep.subr.bf16.mxu1 %v4102_v62 }
 0x249   :  { %1508 = vmatpush1.bf16.msra.mxu0 %v4107_v63  ;;  %1551 = vmatpush1.bf16.msra.mxu1 %v4113_v4 }
 0x24a   :  { %1868 = vmatprep.subr.bf16.mxu0 %v3996_v32  ;;  %1911 = vmatprep.subr.bf16.mxu1 %v4002_v35 }
 0x2ec   :  { %v1152_v0 = vpop.f32.mrf.mxu0  ;;  %v1195_v10 = vpop.f32.mrf.mxu1 }
 0x2ed   :  { %v1204_v8 = vadd.f32 %v1152_v0, %v917_v5 }
 0x2ee   :  { %v1154_v2 = vpop.f32.mrf.mxu0  ;;  %v1197_v19 = vpop.f32.mrf.mxu1 }
 0x2ef   :  { %v3290_v16 = vmul.f32 -1.442695, %v1204_v8  ;;  %v1205_v17 = vadd.f32 %v1154_v2, %v918_v7  ;;  %v919_v7 = vadd.f32 %v911_v1, %v4179_v11  ;;  %v1207_v8 = vadd.f32 %v1197_v19, %v920_v30 }
 0x2f0   :  { %v1156_v14 = vpop.f32.mrf.mxu0  ;;  %v1199_v15 = vpop.f32.mrf.mxu1 }
 0x2f1   :  { %3660 = vpow2.f32 %v3290_v16  ;;  %v3292_v23 = vmul.f32 -1.442695, %v1205_v17  ;;  %v1208_v25 = vadd.f32 %v1156_v14, %v921_v13  ;;  %v915_v13 = vunpack.c.l.bf16 %v3257_v29 }
 0x2f2   :  { %v1158_v27 = vpop.f32.mrf.mxu0  ;;  %v1201_v0 = vpop.f32.mrf.mxu1  ;;  %v1206_v2 = vadd.f32 %v1195_v10, %v919_v7  ;;  %v3294_v14 = vmul.f32 -1.442695, %v1207_v8 }
 0x2f3   :  { %3662 = vpow2.f32 %v3292_v23  ;;  %v3291_v28 = vmul.f32 -1.442695, %v1208_v25  ;;  %v1209_v24 = vadd.f32 %v1158_v27, %v922_v18  ;;  %v1211_v16 = vadd.f32 %v1201_v0, %v924_v31 }
 0x2f4   :  { %v923_v18 = vadd.f32 %v915_v13, %v4179_v11 }
 0x2f5   :  { %3664 = vpow2.f32 %v3291_v28  ;;  %v3293_v5 = vmul.f32 -1.442695, %v1209_v24  ;;  %v3295_v25 = vmul.f32 -1.442695, %v1211_v16 }
 0x2f6   :  { %v1210_v28 = vadd.f32 %v1199_v15, %v923_v18 }
 0x2f7   :  { %3666 = vpow2.f32 %v3293_v5 }
 0x2f8   :  { %3668 = vtanh.f32 %v1206_v2 }
 0x2fe   :  { %v3661_v17 = vpop.eup %3660 }
 0x2ff   :  { %v1218_v22 = vadd.f32 1.0, %v3661_v17 }
 0x300   :  { %v3663_v23 = vpop.eup %3662 }
 0x301   :  { %3670 = vrcp.f32 %v1218_v22  ;;  %v1230_v26 = vadd.f32 1.0, %v3663_v23 }
 0x302   :  { %v3665_v27 = vpop.eup %3664  ;;  %3672 = vpow2.f32 %v3294_v14 }
 0x303   :  { %3674 = vrcp.f32 %v1230_v26  ;;  %v1219_v24 = vadd.f32 1.0, %v3665_v27 }
 0x304   :  { %v3667_v1 = vpop.eup %3666  ;;  %3676 = vpow2.f32 %v3295_v25 }
 0x305   :  { %3678 = vrcp.f32 %v1219_v24  ;;  %v1231_v10 = vadd.f32 1.0, %v3667_v1  ;;  %v3669_v19 = vpop.eup %3668  ;;  %v3302_v1 = vld [vmem:[%s4607_s0 + $0x70] sm:$0xff] }
 0x306   :  { %3680 = vtanh.f32 %v1210_v28 }
 0x307   :  { %3682 = vrcp.f32 %v1231_v10 }
 0x30e   :  { %v3671_v29 = vpop.eup %3670 }
 0x30f   :  { %v3673_v3 = vpop.eup %3672  ;;  %v1252_v7 = vmul.f32 %v3671_v29, %v3669_v19  ;;  %v1288_v29 = vunpack.c.l.bf16 %v3302_v1 }
 0x310   :  { %v3675_v5 = vpop.eup %3674  ;;  %v1244_v8 = vadd.f32 1.0, %v3673_v3 }
 0x311   :  { %v3677_v30 = vpop.eup %3676  ;;  %v1250_v31 = vmul.f32 %v3675_v5, %v4249_v20  ;;  %v1289_v5 = vunpack.c.h.bf16 %v3302_v1 }
 0x312   :  { %v3679_v0 = vpop.eup %3678  ;;  %v1245_v16 = vadd.f32 1.0, %v3677_v30  ;;  %3684 = vrcp.f32 %v1244_v8 }
 0x313   :  { %v3681_v13 = vpop.eup %3680  ;;  %v4314_v15 = vadd.f32 %v1252_v7, %v1250_v31 }
 0x314   :  { %v3683_v2 = vpop.eup %3682  ;;  %v1253_v17 = vmul.f32 %v3681_v13, %v3679_v0  ;;  %v1296_v0 = vadd.f32 %v1288_v29, %v4160_v9 }
 0x315   :  { %v1251_v14 = vmul.f32 %v3683_v2, %v4252_v21  ;;  %3686 = vtanh.f32 %v4314_v15  ;;  %v3300_v21 = vld [vmem:[%s4607_s0 + $0x60] sm:$0xff] }
 0x316   :  { %3688 = vrcp.f32 %v1245_v16  ;;  %v1284_v24 = vunpack.c.l.bf16 %v3300_v21  ;;  %v1285_v10 = vunpack.c.h.bf16 %v3300_v21  ;;  %v1297_v16 = vadd.f32 %v1289_v5, %v4165_v12 }
 0x317   :  { %v4317_v18 = vadd.f32 %v1253_v17, %v1251_v14  ;;  %v3301_v14 = vld [vmem:[%s4607_s0 + $0x68] sm:$0xff] }
 0x318   :  { %v1292_v19 = vadd.f32 %v1284_v24, %v4160_v9  ;;  %v1293_v3 = vadd.f32 %v1285_v10, %v4165_v12  ;;  %v1286_v24 = vunpack.c.l.bf16 %v3301_v14 }
 0x319   :  { %3690 = vtanh.f32 %v4317_v18 }
 0x31f   :  { %v3685_v22 = vpop.eup %3684 }
 0x322   :  { %v3687_v20 = vpop.eup %3686 }
 0x323   :  { %v3689_v23 = vpop.eup %3688  ;;  %v1258_v26 = vmul.f32 %v3687_v20, %v3685_v22 }
 0x326   :  { %v3691_v25 = vpop.eup %3690 }
 0x327   :  { %v1259_v27 = vmul.f32 %v3691_v25, %v3689_v23  ;;  %v1287_v25 = vunpack.c.h.bf16 %v3301_v14 }
 0x329   :  { %v3560_v28 = vpack.c.bf16 %v1259_v27, %v1258_v26  ;;  %v1295_v29 = vadd.f32 %v1287_v25, %v4177_v6 }
 0x32b   :  { %3588 = vst [vmem:[%s4610_s3 + $0x10] sm:$0xff] %v3560_v28   ;;  %1526 = vmatmul.mubr.bf16.vlgmr.msra.gmra.mxu0 %v3560_v28  ;;  %1569 = vmatmul.mubr.bf16.vlgmr.msra.gmra.mxu1 %v3560_v28  ;;  %v3303_v28 = vld [vmem:[%s4607_s0 + $0x78] sm:$0xff] }
 0x32c   :  { %1869 = vmatpush1.bf16.msra.mxu0 %v3998_v33  ;;  %1912 = vmatpush1.bf16.msra.mxu1 %v4005_v36  ;;  %v1291_v1 = vunpack.c.h.bf16 %v3303_v28 }
 0x32d   :  { %1870 = vmatprep.subr.bf16.mxu0 %v4000_v34  ;;  %1913 = vmatprep.subr.bf16.mxu1 %v4007_v37 }
 0x32e   :  { %1900 = vmatprep.mubr.bf16.mxu0 %v3854_v42  ;;  %1943 = vmatprep.mubr.bf16.mxu1 %v3854_v42  ;;  %v1299_v5 = vadd.f32 %v1291_v1, %v4177_v6 }
 0x330   :  { %1871 = vmatpush1.bf16.msra.mxu0 %v4010_v38  ;;  %1914 = vmatpush1.bf16.msra.mxu1 %v4017_v40 }
 0x331   :  { %1872 = vmatprep.subr.bf16.mxu0 %v4014_v39  ;;  %1915 = vmatprep.subr.bf16.mxu1 %v4020_v41 }
 0x334   :  { %1873 = vmatpush1.bf16.msra.mxu0 %v4024_v43  ;;  %1916 = vmatpush1.bf16.msra.mxu1 %v4030_v45 }
 0x335   :  { %1874 = vmatprep.subr.bf16.mxu0 %v4027_v44  ;;  %1917 = vmatprep.subr.bf16.mxu1 %v4033_v46 }
 0x338   :  { %1875 = vmatpush1.bf16.msra.mxu0 %v4037_v47  ;;  %1918 = vmatpush1.bf16.msra.mxu1 %v4043_v49 }
 0x339   :  { %1876 = vmatprep.subr.bf16.mxu0 %v4040_v48  ;;  %1919 = vmatprep.subr.bf16.mxu1 %v4046_v50 }
 0x33c   :  { %1877 = vmatpush1.bf16.msra.mxu0 %v4049_v51  ;;  %1920 = vmatpush1.bf16.msra.mxu1 %v4057_v53 }
 0x33d   :  { %1878 = vmatprep.subr.bf16.mxu0 %v4054_v52  ;;  %1921 = vmatprep.subr.bf16.mxu1 %v4062_v54 }
 0x340   :  { %1879 = vmatpush1.bf16.msra.mxu0 %v4067_v55  ;;  %1922 = vmatpush1.bf16.msra.mxu1 %v4077_v57 }
 0x341   :  { %1880 = vmatprep.subr.bf16.mxu0 %v4072_v56  ;;  %1923 = vmatprep.subr.bf16.mxu1 %v4082_v58 }
 0x344   :  { %1881 = vmatpush1.bf16.msra.mxu0 %v4087_v59  ;;  %1924 = vmatpush1.bf16.msra.mxu1 %v4097_v61 }
 0x345   :  { %1882 = vmatprep.subr.bf16.mxu0 %v4092_v60  ;;  %1925 = vmatprep.subr.bf16.mxu1 %v4102_v62 }
 0x348   :  { %1883 = vmatpush1.bf16.msra.mxu0 %v4107_v63  ;;  %1926 = vmatpush1.bf16.msra.mxu1 %v4113_v4 }
 0x349   :  { %2243 = vmatprep.subr.bf16.mxu0 %v3996_v32  ;;  %2286 = vmatprep.subr.bf16.mxu1 %v4002_v35 }
 0x3eb   :  { %v1527_v30 = vpop.f32.mrf.mxu0  ;;  %v1570_v31 = vpop.f32.mrf.mxu1 }
 0x3ec   :  { %v1579_v7 = vadd.f32 %v1527_v30, %v1292_v19 }
 0x3ed   :  { %v1529_v8 = vpop.f32.mrf.mxu0  ;;  %v1572_v20 = vpop.f32.mrf.mxu1 }
 0x3ee   :  { %v3336_v13 = vmul.f32 -1.442695, %v1579_v7  ;;  %v1580_v2 = vadd.f32 %v1529_v8, %v1293_v3  ;;  %v1294_v3 = vadd.f32 %v1286_v24, %v4179_v11  ;;  %v1582_v7 = vadd.f32 %v1572_v20, %v1295_v29 }
 0x3ef   :  { %v1531_v17 = vpop.f32.mrf.mxu0  ;;  %v1574_v10 = vpop.f32.mrf.mxu1 }
 0x3f0   :  { %3692 = vpow2.f32 %v3336_v13  ;;  %v3338_v22 = vmul.f32 -1.442695, %v1580_v2  ;;  %v1583_v23 = vadd.f32 %v1531_v17, %v1296_v0  ;;  %v1290_v0 = vunpack.c.l.bf16 %v3303_v28 }
 0x3f1   :  { %v1533_v26 = vpop.f32.mrf.mxu0  ;;  %v1576_v30 = vpop.f32.mrf.mxu1  ;;  %v1581_v8 = vadd.f32 %v1570_v31, %v1294_v3  ;;  %v3340_v17 = vmul.f32 -1.442695, %v1582_v7 }
 0x3f2   :  { %3694 = vpow2.f32 %v3338_v22  ;;  %v3337_v27 = vmul.f32 -1.442695, %v1583_v23  ;;  %v1584_v21 = vadd.f32 %v1533_v26, %v1297_v16  ;;  %v1586_v13 = vadd.f32 %v1576_v30, %v1299_v5 }
 0x3f3   :  { %v1298_v16 = vadd.f32 %v1290_v0, %v4179_v11 }
 0x3f4   :  { %3696 = vpow2.f32 %v3337_v27  ;;  %v3339_v19 = vmul.f32 -1.442695, %v1584_v21  ;;  %v3341_v23 = vmul.f32 -1.442695, %v1586_v13 }
 0x3f5   :  { %v1585_v27 = vadd.f32 %v1574_v10, %v1298_v16 }
 0x3f6   :  { %3698 = vpow2.f32 %v3339_v19 }
 0x3f7   :  { %3700 = vtanh.f32 %v1581_v8 }
 0x3fd   :  { %v3693_v2 = vpop.eup %3692 }
 0x3fe   :  { %v1593_v14 = vadd.f32 1.0, %v3693_v2 }
 0x3ff   :  { %v3695_v22 = vpop.eup %3694 }
 0x400   :  { %3702 = vrcp.f32 %v1593_v14  ;;  %v1605_v25 = vadd.f32 1.0, %v3695_v22 }
 0x401   :  { %v3697_v26 = vpop.eup %3696  ;;  %3704 = vpow2.f32 %v3340_v17 }
 0x402   :  { %3706 = vrcp.f32 %v1605_v25  ;;  %v1594_v21 = vadd.f32 1.0, %v3697_v26 }
 0x403   :  { %v3699_v24 = vpop.eup %3698  ;;  %3708 = vpow2.f32 %v3341_v23 }
 0x404   :  { %3710 = vrcp.f32 %v1594_v21  ;;  %v1606_v31 = vadd.f32 1.0, %v3699_v24  ;;  %v3701_v20 = vpop.eup %3700  ;;  %v3348_v24 = vld [vmem:[%s4607_s0 + $0x90] sm:$0xff] }
 0x405   :  { %3712 = vtanh.f32 %v1585_v27 }
 0x406   :  { %3714 = vrcp.f32 %v1606_v31 }
 0x40d   :  { %v3703_v28 = vpop.eup %3702 }
 0x40e   :  { %v3705_v1 = vpop.eup %3704  ;;  %v1627_v3 = vmul.f32 %v3703_v28, %v3701_v20  ;;  %v1663_v28 = vunpack.c.l.bf16 %v3348_v24 }
 0x40f   :  { %v3707_v19 = vpop.eup %3706  ;;  %v1619_v7 = vadd.f32 1.0, %v3705_v1 }
 0x410   :  { %v3709_v29 = vpop.eup %3708  ;;  %v1625_v5 = vmul.f32 %v3707_v19, %v4314_v15  ;;  %v1664_v19 = vunpack.c.h.bf16 %v3348_v24 }
 0x411   :  { %v3711_v30 = vpop.eup %3710  ;;  %v1620_v13 = vadd.f32 1.0, %v3709_v29  ;;  %3716 = vrcp.f32 %v1619_v7 }
 0x412   :  { %v3713_v0 = vpop.eup %3712  ;;  %v4379_v10 = vadd.f32 %v1627_v3, %v1625_v5 }
 0x413   :  { %v3715_v8 = vpop.eup %3714  ;;  %v1628_v2 = vmul.f32 %v3713_v0, %v3711_v30  ;;  %v1671_v30 = vadd.f32 %v1663_v28, %v4160_v9 }
 0x414   :  { %v1626_v17 = vmul.f32 %v3715_v8, %v4317_v18  ;;  %3718 = vtanh.f32 %v4379_v10  ;;  %v3346_v18 = vld [vmem:[%s4607_s0 + $0x80] sm:$0xff] }
 0x415   :  { %3720 = vrcp.f32 %v1620_v13  ;;  %v1659_v21 = vunpack.c.l.bf16 %v3346_v18  ;;  %v1660_v31 = vunpack.c.h.bf16 %v3346_v18  ;;  %v1672_v13 = vadd.f32 %v1664_v19, %v4165_v12 }
 0x416   :  { %v4382_v16 = vadd.f32 %v1628_v2, %v1626_v17  ;;  %v3347_v17 = vld [vmem:[%s4607_s0 + $0x88] sm:$0xff] }
 0x417   :  { %v1667_v20 = vadd.f32 %v1659_v21, %v4160_v9  ;;  %v1668_v1 = vadd.f32 %v1660_v31, %v4165_v12  ;;  %v1661_v21 = vunpack.c.l.bf16 %v3347_v17 }
 0x418   :  { %3722 = vtanh.f32 %v4382_v16 }
 0x41e   :  { %v3717_v14 = vpop.eup %3716 }
 0x421   :  { %v3719_v15 = vpop.eup %3718 }
 0x422   :  { %v3721_v22 = vpop.eup %3720  ;;  %v1633_v25 = vmul.f32 %v3719_v15, %v3717_v14 }
 0x425   :  { %v3723_v23 = vpop.eup %3722 }
 0x426   :  { %v1634_v26 = vmul.f32 %v3723_v23, %v3721_v22  ;;  %v1662_v23 = vunpack.c.h.bf16 %v3347_v17 }
 0x428   :  { %v3565_v27 = vpack.c.bf16 %v1634_v26, %v1633_v25  ;;  %v1670_v28 = vadd.f32 %v1662_v23, %v4177_v6 }
 0x42a   :  { %3589 = vst [vmem:[%s4610_s3 + $0x18] sm:$0xff] %v3565_v27   ;;  %1901 = vmatmul.mubr.bf16.vlgmr.msra.gmra.mxu0 %v3565_v27  ;;  %1944 = vmatmul.mubr.bf16.vlgmr.msra.gmra.mxu1 %v3565_v27  ;;  %v3349_v27 = vld [vmem:[%s4607_s0 + $0x98] sm:$0xff] }
 0x42b   :  { %2244 = vmatpush1.bf16.msra.mxu0 %v3998_v33  ;;  %2287 = vmatpush1.bf16.msra.mxu1 %v4005_v36  ;;  %v1666_v24 = vunpack.c.h.bf16 %v3349_v27 }
 0x42c   :  { %2245 = vmatprep.subr.bf16.mxu0 %v4000_v34  ;;  %2288 = vmatprep.subr.bf16.mxu1 %v4007_v37 }
 0x42d   :  { %2275 = vmatprep.mubr.bf16.mxu0 %v3854_v42  ;;  %2318 = vmatprep.mubr.bf16.mxu1 %v3854_v42  ;;  %v1674_v19 = vadd.f32 %v1666_v24, %v4177_v6 }
 0x42f   :  { %2246 = vmatpush1.bf16.msra.mxu0 %v4010_v38  ;;  %2289 = vmatpush1.bf16.msra.mxu1 %v4017_v40 }
 0x430   :  { %2247 = vmatprep.subr.bf16.mxu0 %v4014_v39  ;;  %2290 = vmatprep.subr.bf16.mxu1 %v4020_v41 }
 0x433   :  { %2248 = vmatpush1.bf16.msra.mxu0 %v4024_v43  ;;  %2291 = vmatpush1.bf16.msra.mxu1 %v4030_v45 }
 0x434   :  { %2249 = vmatprep.subr.bf16.mxu0 %v4027_v44  ;;  %2292 = vmatprep.subr.bf16.mxu1 %v4033_v46 }
 0x437   :  { %2250 = vmatpush1.bf16.msra.mxu0 %v4037_v47  ;;  %2293 = vmatpush1.bf16.msra.mxu1 %v4043_v49 }
 0x438   :  { %2251 = vmatprep.subr.bf16.mxu0 %v4040_v48  ;;  %2294 = vmatprep.subr.bf16.mxu1 %v4046_v50 }
 0x43b   :  { %2252 = vmatpush1.bf16.msra.mxu0 %v4049_v51  ;;  %2295 = vmatpush1.bf16.msra.mxu1 %v4057_v53 }
 0x43c   :  { %2253 = vmatprep.subr.bf16.mxu0 %v4054_v52  ;;  %2296 = vmatprep.subr.bf16.mxu1 %v4062_v54 }
 0x43f   :  { %2254 = vmatpush1.bf16.msra.mxu0 %v4067_v55  ;;  %2297 = vmatpush1.bf16.msra.mxu1 %v4077_v57 }
 0x440   :  { %2255 = vmatprep.subr.bf16.mxu0 %v4072_v56  ;;  %2298 = vmatprep.subr.bf16.mxu1 %v4082_v58 }
 0x443   :  { %2256 = vmatpush1.bf16.msra.mxu0 %v4087_v59  ;;  %2299 = vmatpush1.bf16.msra.mxu1 %v4097_v61 }
 0x444   :  { %2257 = vmatprep.subr.bf16.mxu0 %v4092_v60  ;;  %2300 = vmatprep.subr.bf16.mxu1 %v4102_v62 }
 0x447   :  { %2258 = vmatpush1.bf16.msra.mxu0 %v4107_v63  ;;  %2301 = vmatpush1.bf16.msra.mxu1 %v4113_v4 }
 0x448   :  { %2618 = vmatprep.subr.bf16.mxu0 %v3996_v32  ;;  %2661 = vmatprep.subr.bf16.mxu1 %v4002_v35 }
 0x4ea   :  { %v1902_v29 = vpop.f32.mrf.mxu0  ;;  %v1945_v5 = vpop.f32.mrf.mxu1 }
 0x4eb   :  { %v1954_v3 = vadd.f32 %v1902_v29, %v1667_v20 }
 0x4ec   :  { %v1904_v7 = vpop.f32.mrf.mxu0  ;;  %v1947_v15 = vpop.f32.mrf.mxu1 }
 0x4ed   :  { %v3382_v0 = vmul.f32 -1.442695, %v1954_v3  ;;  %v1955_v8 = vadd.f32 %v1904_v7, %v1668_v1  ;;  %v1669_v1 = vadd.f32 %v1661_v21, %v4179_v11  ;;  %v1957_v3 = vadd.f32 %v1947_v15, %v1670_v28 }
 0x4ee   :  { %v1906_v2 = vpop.f32.mrf.mxu0  ;;  %v1949_v31 = vpop.f32.mrf.mxu1 }
 0x4ef   :  { %3724 = vpow2.f32 %v3382_v0  ;;  %v3384_v14 = vmul.f32 -1.442695, %v1955_v8  ;;  %v1958_v22 = vadd.f32 %v1906_v2, %v1671_v30  ;;  %v1665_v30 = vunpack.c.l.bf16 %v3349_v27 }
 0x4f0   :  { %v1908_v25 = vpop.f32.mrf.mxu0  ;;  %v1951_v29 = vpop.f32.mrf.mxu1  ;;  %v1956_v7 = vadd.f32 %v1945_v5, %v1669_v1  ;;  %v3386_v2 = vmul.f32 -1.442695, %v1957_v3 }
 0x4f1   :  { %3726 = vpow2.f32 %v3384_v14  ;;  %v3383_v26 = vmul.f32 -1.442695, %v1958_v22  ;;  %v1959_v18 = vadd.f32 %v1908_v25, %v1672_v13  ;;  %v1961_v0 = vadd.f32 %v1951_v29, %v1674_v19 }
 0x4f2   :  { %v1673_v13 = vadd.f32 %v1665_v30, %v4179_v11 }
 0x4f3   :  { %3728 = vpow2.f32 %v3383_v26  ;;  %v3385_v20 = vmul.f32 -1.442695, %v1959_v18  ;;  %v3387_v22 = vmul.f32 -1.442695, %v1961_v0 }
 0x4f4   :  { %v1960_v26 = vadd.f32 %v1949_v31, %v1673_v13 }
 0x4f5   :  { %3730 = vpow2.f32 %v3385_v20 }
 0x4f6   :  { %3732 = vtanh.f32 %v1956_v7 }
 0x4fc   :  { %v3725_v8 = vpop.eup %3724 }
 0x4fd   :  { %v1968_v17 = vadd.f32 1.0, %v3725_v8 }
 0x4fe   :  { %v3727_v14 = vpop.eup %3726 }
 0x4ff   :  { %3734 = vrcp.f32 %v1968_v17  ;;  %v1980_v23 = vadd.f32 1.0, %v3727_v14 }
 0x500   :  { %v3729_v25 = vpop.eup %3728  ;;  %3736 = vpow2.f32 %v3386_v2 }
 0x501   :  { %3738 = vrcp.f32 %v1980_v23  ;;  %v1969_v18 = vadd.f32 1.0, %v3729_v25 }
 0x502   :  { %v3731_v21 = vpop.eup %3730  ;;  %3740 = vpow2.f32 %v3387_v22 }
 0x503   :  { %3742 = vrcp.f32 %v1969_v18  ;;  %v1981_v5 = vadd.f32 1.0, %v3731_v21  ;;  %v3733_v15 = vpop.eup %3732  ;;  %v3394_v21 = vld [vmem:[%s4607_s0 + $0xb0] sm:$0xff] }
 0x504   :  { %3744 = vtanh.f32 %v1960_v26 }
 0x505   :  { %3746 = vrcp.f32 %v1981_v5 }
 0x50c   :  { %v3735_v27 = vpop.eup %3734 }
 0x50d   :  { %v3737_v24 = vpop.eup %3736  ;;  %v2002_v1 = vmul.f32 %v3735_v27, %v3733_v15  ;;  %v2038_v27 = vunpack.c.l.bf16 %v3394_v21 }
 0x50e   :  { %v3739_v20 = vpop.eup %3738  ;;  %v1994_v3 = vadd.f32 1.0, %v3737_v24 }
 0x50f   :  { %v3741_v28 = vpop.eup %3740  ;;  %v2000_v19 = vmul.f32 %v3739_v20, %v4379_v10  ;;  %v2039_v20 = vunpack.c.h.bf16 %v3394_v21 }
 0x510   :  { %v3743_v29 = vpop.eup %3742  ;;  %v1995_v0 = vadd.f32 1.0, %v3741_v28  ;;  %3748 = vrcp.f32 %v1994_v3 }
 0x511   :  { %v3745_v30 = vpop.eup %3744  ;;  %v4444_v31 = vadd.f32 %v2002_v1, %v2000_v19 }
 0x512   :  { %v3747_v7 = vpop.eup %3746  ;;  %v2003_v8 = vmul.f32 %v3745_v30, %v3743_v29  ;;  %v2047_v30 = vadd.f32 %v2039_v20, %v4165_v12 }
 0x513   :  { %v2001_v2 = vmul.f32 %v3747_v7, %v4382_v16  ;;  %3750 = vtanh.f32 %v4444_v31  ;;  %v3392_v16 = vld [vmem:[%s4607_s0 + $0xa0] sm:$0xff] }
 0x514   :  { %3752 = vrcp.f32 %v1995_v0  ;;  %v2034_v18 = vunpack.c.l.bf16 %v3392_v16  ;;  %v2035_v5 = vunpack.c.h.bf16 %v3392_v16  ;;  %v3393_v0 = vld [vmem:[%s4607_s0 + $0xa8] sm:$0xff] }
 0x515   :  { %v4447_v13 = vadd.f32 %v2003_v8, %v2001_v2 }
 0x516   :  { %v2042_v15 = vadd.f32 %v2034_v18, %v4160_v9  ;;  %v2043_v24 = vadd.f32 %v2035_v5, %v4165_v12 }
 0x517   :  { %3754 = vtanh.f32 %v4447_v13 }
 0x51d   :  { %v3749_v17 = vpop.eup %3748 }
 0x520   :  { %v3751_v10 = vpop.eup %3750 }
 0x521   :  { %v3753_v14 = vpop.eup %3752  ;;  %v2008_v23 = vmul.f32 %v3751_v10, %v3749_v17  ;;  %v2037_v10 = vunpack.c.h.bf16 %v3393_v0 }
 0x523   :  { %v2045_v5 = vadd.f32 %v2037_v10, %v4177_v6 }
 0x524   :  { %v3755_v22 = vpop.eup %3754 }
 0x525   :  { %v2009_v25 = vmul.f32 %v3755_v22, %v3753_v14 }
 0x527   :  { %v3570_v26 = vpack.c.bf16 %v2009_v25, %v2008_v23  ;;  %v3395_v23 = vld [vmem:[%s4607_s0 + $0xb8] sm:$0xff] }
 0x528   :  { %v2041_v16 = vunpack.c.h.bf16 %v3395_v23 }
 0x529   :  { %3590 = vst [vmem:[%s4610_s3 + $0x20] sm:$0xff] %v3570_v26   ;;  %2276 = vmatmul.mubr.bf16.vlgmr.msra.gmra.mxu0 %v3570_v26  ;;  %2319 = vmatmul.mubr.bf16.vlgmr.msra.gmra.mxu1 %v3570_v26  ;;  %v2036_v26 = vunpack.c.l.bf16 %v3393_v0 }
 0x52a   :  { %2619 = vmatpush1.bf16.msra.mxu0 %v3998_v33  ;;  %2662 = vmatpush1.bf16.msra.mxu1 %v4005_v36 }
 0x52b   :  { %2620 = vmatprep.subr.bf16.mxu0 %v4000_v34  ;;  %2663 = vmatprep.subr.bf16.mxu1 %v4007_v37 }
 0x52c   :  { %2650 = vmatprep.mubr.bf16.mxu0 %v3854_v42  ;;  %2693 = vmatprep.mubr.bf16.mxu1 %v3854_v42 }
 0x52e   :  { %2621 = vmatpush1.bf16.msra.mxu0 %v4010_v38  ;;  %2664 = vmatpush1.bf16.msra.mxu1 %v4017_v40 }
 0x52f   :  { %2622 = vmatprep.subr.bf16.mxu0 %v4014_v39  ;;  %2665 = vmatprep.subr.bf16.mxu1 %v4020_v41 }
 0x532   :  { %2623 = vmatpush1.bf16.msra.mxu0 %v4024_v43  ;;  %2666 = vmatpush1.bf16.msra.mxu1 %v4030_v45 }
 0x533   :  { %2624 = vmatprep.subr.bf16.mxu0 %v4027_v44  ;;  %2667 = vmatprep.subr.bf16.mxu1 %v4033_v46 }
 0x536   :  { %2625 = vmatpush1.bf16.msra.mxu0 %v4037_v47  ;;  %2668 = vmatpush1.bf16.msra.mxu1 %v4043_v49 }
 0x537   :  { %2626 = vmatprep.subr.bf16.mxu0 %v4040_v48  ;;  %2669 = vmatprep.subr.bf16.mxu1 %v4046_v50 }
 0x53a   :  { %2627 = vmatpush1.bf16.msra.mxu0 %v4049_v51  ;;  %2670 = vmatpush1.bf16.msra.mxu1 %v4057_v53 }
 0x53b   :  { %2628 = vmatprep.subr.bf16.mxu0 %v4054_v52  ;;  %2671 = vmatprep.subr.bf16.mxu1 %v4062_v54 }
 0x53e   :  { %2629 = vmatpush1.bf16.msra.mxu0 %v4067_v55  ;;  %2672 = vmatpush1.bf16.msra.mxu1 %v4077_v57 }
 0x53f   :  { %2630 = vmatprep.subr.bf16.mxu0 %v4072_v56  ;;  %2673 = vmatprep.subr.bf16.mxu1 %v4082_v58 }
 0x542   :  { %2631 = vmatpush1.bf16.msra.mxu0 %v4087_v59  ;;  %2674 = vmatpush1.bf16.msra.mxu1 %v4097_v61 }
 0x543   :  { %2632 = vmatprep.subr.bf16.mxu0 %v4092_v60  ;;  %2675 = vmatprep.subr.bf16.mxu1 %v4102_v62 }
 0x546   :  { %2633 = vmatpush1.bf16.msra.mxu0 %v4107_v63  ;;  %2676 = vmatpush1.bf16.msra.mxu1 %v4113_v4 }
 0x547   :  { %2993 = vmatprep.subr.bf16.mxu0 %v3996_v32  ;;  %3036 = vmatprep.subr.bf16.mxu1 %v4002_v35  ;;  %v2046_v35 = vadd.f32 %v2038_v27, %v4160_v9  ;;  %v2049_v27 = vadd.f32 %v2041_v16, %v4177_v6 }
 0x5e9   :  { %v2277_v28 = vpop.f32.mrf.mxu0  ;;  %v2320_v1 = vpop.f32.mrf.mxu1 }
 0x5ea   :  { %v2329_v32 = vadd.f32 %v2277_v28, %v2042_v15  ;;  %v2044_v15 = vadd.f32 %v2036_v26, %v4179_v11  ;;  %v2040_v28 = vunpack.c.l.bf16 %v3395_v23 }
 0x5eb   :  { %v2279_v19 = vpop.f32.mrf.mxu0  ;;  %v2322_v2 = vpop.f32.mrf.mxu1 }
 0x5ec   :  { %v3428_v29 = vmul.f32 -1.442695, %v2329_v32  ;;  %v2330_v3 = vadd.f32 %v2279_v19, %v2043_v24  ;;  %v2332_v20 = vadd.f32 %v2322_v2, %v2045_v5  ;;  %v2331_v32 = vadd.f32 %v2320_v1, %v2044_v15 }
 0x5ed   :  { %v2281_v7 = vpop.f32.mrf.mxu0  ;;  %v2324_v18 = vpop.f32.mrf.mxu1 }
 0x5ee   :  { %3756 = vpow2.f32 %v3428_v29  ;;  %v3430_v8 = vmul.f32 -1.442695, %v2330_v3  ;;  %v2333_v17 = vadd.f32 %v2281_v7, %v2046_v35  ;;  %v3432_v29 = vmul.f32 -1.442695, %v2332_v20 }
 0x5ef   :  { %v2283_v14 = vpop.f32.mrf.mxu0  ;;  %v2326_v24 = vpop.f32.mrf.mxu1  ;;  %v2048_v3 = vadd.f32 %v2040_v28, %v4179_v11 }
 0x5f0   :  { %3758 = vpow2.f32 %v3430_v8  ;;  %v3429_v22 = vmul.f32 -1.442695, %v2333_v17  ;;  %v2334_v25 = vadd.f32 %v2283_v14, %v2047_v30  ;;  %v2336_v35 = vadd.f32 %v2326_v24, %v2049_v27 }
 0x5f1   :  { %v2335_v10 = vadd.f32 %v2324_v18, %v2048_v3 }
 0x5f2   :  { %3760 = vpow2.f32 %v3429_v22  ;;  %v3431_v21 = vmul.f32 -1.442695, %v2334_v25  ;;  %v3433_v0 = vmul.f32 -1.442695, %v2336_v35 }
 0x5f4   :  { %3762 = vpow2.f32 %v3431_v21 }
 0x5f5   :  { %3764 = vtanh.f32 %v2331_v32 }
 0x5fb   :  { %v3757_v19 = vpop.eup %3756 }
 0x5fc   :  { %v2343_v30 = vadd.f32 1.0, %v3757_v19 }
 0x5fd   :  { %v3759_v7 = vpop.eup %3758 }
 0x5fe   :  { %3766 = vrcp.f32 %v2343_v30  ;;  %v2355_v8 = vadd.f32 1.0, %v3759_v7 }
 0x5ff   :  { %v3761_v17 = vpop.eup %3760  ;;  %3768 = vpow2.f32 %v3432_v29 }
 0x600   :  { %3770 = vrcp.f32 %v2355_v8  ;;  %v2344_v14 = vadd.f32 1.0, %v3761_v17 }
 0x601   :  { %v3763_v22 = vpop.eup %3762  ;;  %3772 = vpow2.f32 %v3433_v0 }
 0x602   :  { %3774 = vrcp.f32 %v2344_v14  ;;  %v2356_v1 = vadd.f32 1.0, %v3763_v22  ;;  %v3765_v2 = vpop.eup %3764 }
 0x603   :  { %3776 = vtanh.f32 %v2335_v10 }
 0x604   :  { %3778 = vrcp.f32 %v2356_v1 }
 0x60b   :  { %v3767_v23 = vpop.eup %3766 }
 0x60c   :  { %v3769_v25 = vpop.eup %3768  ;;  %v2377_v21 = vmul.f32 %v3767_v23, %v3765_v2 }
 0x60d   :  { %v3771_v26 = vpop.eup %3770  ;;  %v2369_v27 = vadd.f32 1.0, %v3769_v25 }
 0x60e   :  { %v3773_v16 = vpop.eup %3772  ;;  %v2375_v5 = vmul.f32 %v3771_v26, %v4444_v31 }
 0x60f   :  { %v3775_v15 = vpop.eup %3774  ;;  %v2370_v28 = vadd.f32 1.0, %v3773_v16  ;;  %3780 = vrcp.f32 %v2369_v27 }
 0x610   :  { %v3777_v24 = vpop.eup %3776  ;;  %v4509_v18 = vadd.f32 %v2377_v21, %v2375_v5 }
 0x611   :  { %v3779_v20 = vpop.eup %3778  ;;  %v2378_v32 = vmul.f32 %v3777_v24, %v3775_v15 }
 0x612   :  { %v2376_v35 = vmul.f32 %v3779_v20, %v4447_v13  ;;  %3782 = vtanh.f32 %v4509_v18 }
 0x613   :  { %3784 = vrcp.f32 %v2370_v28 }
 0x614   :  { %v4512_v19 = vadd.f32 %v2378_v32, %v2376_v35 }
 0x616   :  { %3786 = vtanh.f32 %v4512_v19 }
 0x61c   :  { %v3781_v29 = vpop.eup %3780 }
 0x61f   :  { %v3783_v31 = vpop.eup %3782 }
 0x620   :  { %v3785_v3 = vpop.eup %3784  ;;  %v2383_v7 = vmul.f32 %v3783_v31, %v3781_v29 }
 0x623   :  { %v3787_v30 = vpop.eup %3786 }
 0x624   :  { %v2384_v0 = vmul.f32 %v3787_v30, %v3785_v3 }
 0x626   :  { %v3575_v8 = vpack.c.bf16 %v2384_v0, %v2383_v7 }
 0x628   :  { %3591 = vst [vmem:[%s4610_s3 + $0x28] sm:$0xff] %v3575_v8   ;;  %2651 = vmatmul.mubr.bf16.vlgmr.msra.gmra.mxu0 %v3575_v8  ;;  %2694 = vmatmul.mubr.bf16.vlgmr.msra.gmra.mxu1 %v3575_v8 }
 0x629   :  { %2994 = vmatpush1.bf16.msra.mxu0 %v3998_v33  ;;  %3037 = vmatpush1.bf16.msra.mxu1 %v4005_v36  ;;  %v3438_v33 = vld [vmem:[%s4607_s0 + $0xc0] sm:$0xff]  ;;  %v3440_v36 = vld [vmem:[%s4607_s0 + $0xd0] sm:$0xff] }
 0x62a   :  { %2995 = vmatprep.subr.bf16.mxu0 %v4000_v34  ;;  %3038 = vmatprep.subr.bf16.mxu1 %v4007_v37  ;;  %v2409_v34 = vunpack.c.l.bf16 %v3438_v33  ;;  %v2410_v37 = vunpack.c.h.bf16 %v3438_v33 }
 0x62b   :  { %3025 = vmatprep.mubr.bf16.mxu0 %v3854_v42  ;;  %3068 = vmatprep.mubr.bf16.mxu1 %v3854_v42 }
 0x62d   :  { %2996 = vmatpush1.bf16.msra.mxu0 %v4010_v38  ;;  %3039 = vmatpush1.bf16.msra.mxu1 %v4017_v40  ;;  %v2417_v38 = vadd.f32 %v2409_v34, %v4160_v9  ;;  %v2418_v40 = vadd.f32 %v2410_v37, %v4165_v12 }
 0x62e   :  { %2997 = vmatprep.subr.bf16.mxu0 %v4014_v39  ;;  %3040 = vmatprep.subr.bf16.mxu1 %v4020_v41  ;;  %v2413_v39 = vunpack.c.l.bf16 %v3440_v36  ;;  %v2414_v41 = vunpack.c.h.bf16 %v3440_v36 }
 0x631   :  { %2998 = vmatpush1.bf16.msra.mxu0 %v4024_v43  ;;  %3041 = vmatpush1.bf16.msra.mxu1 %v4030_v45  ;;  %v2421_v45 = vadd.f32 %v2413_v39, %v4160_v9 }
 0x632   :  { %2999 = vmatprep.subr.bf16.mxu0 %v4027_v44  ;;  %3042 = vmatprep.subr.bf16.mxu1 %v4033_v46 }
 0x635   :  { %3000 = vmatpush1.bf16.msra.mxu0 %v4037_v47  ;;  %3043 = vmatpush1.bf16.msra.mxu1 %v4043_v49  ;;  %v2422_v49 = vadd.f32 %v2414_v41, %v4165_v12 }
 0x636   :  { %3001 = vmatprep.subr.bf16.mxu0 %v4040_v48  ;;  %3044 = vmatprep.subr.bf16.mxu1 %v4046_v50 }
 0x639   :  { %3002 = vmatpush1.bf16.msra.mxu0 %v4049_v51  ;;  %3045 = vmatpush1.bf16.msra.mxu1 %v4057_v53  ;;  %v3439_v51 = vld [vmem:[%s4607_s0 + $0xc8] sm:$0xff] }
 0x63a   :  { %3003 = vmatprep.subr.bf16.mxu0 %v4054_v52  ;;  %3046 = vmatprep.subr.bf16.mxu1 %v4062_v54 }
 0x63d   :  { %3004 = vmatpush1.bf16.msra.mxu0 %v4067_v55  ;;  %3047 = vmatpush1.bf16.msra.mxu1 %v4077_v57  ;;  %v2412_v55 = vunpack.c.h.bf16 %v3439_v51 }
 0x63e   :  { %3005 = vmatprep.subr.bf16.mxu0 %v4072_v56  ;;  %3048 = vmatprep.subr.bf16.mxu1 %v4082_v58  ;;  %v3441_v58 = vld [vmem:[%s4607_s0 + $0xd8] sm:$0xff] }
 0x63f   :  { %v2415_v22 = vunpack.c.l.bf16 %v3441_v58 }
 0x641   :  { %3006 = vmatpush1.bf16.msra.mxu0 %v4087_v59  ;;  %3049 = vmatpush1.bf16.msra.mxu1 %v4097_v61  ;;  %v2416_v61 = vunpack.c.h.bf16 %v3441_v58  ;;  %v2423_v26 = vadd.f32 %v2415_v22, %v4179_v11 }
 0x642   :  { %3007 = vmatprep.subr.bf16.mxu0 %v4092_v60  ;;  %3050 = vmatprep.subr.bf16.mxu1 %v4102_v62  ;;  %v2411_v60 = vunpack.c.l.bf16 %v3439_v51 }
 0x643   :  { %v2424_v17 = vadd.f32 %v2416_v61, %v4177_v6 }
 0x644   :  { %v2419_v13 = vadd.f32 %v2411_v60, %v4179_v11 }
 0x645   :  { %3008 = vmatpush1.bf16.msra.mxu0 %v4107_v63  ;;  %3051 = vmatpush1.bf16.msra.mxu1 %v4113_v4  ;;  %v2420_v4 = vadd.f32 %v2412_v55, %v4177_v6 }
 0x6e8   :  { %v2652_v42 = vpop.f32.mrf.mxu0  ;;  %v2695_v44 = vpop.f32.mrf.mxu1 }
 0x6e9   :  { %v2704_v43 = vadd.f32 %v2652_v42, %v2417_v38  ;;  %v2706_v1 = vadd.f32 %v2695_v44, %v2419_v13 }
 0x6ea   :  { %v2654_v46 = vpop.f32.mrf.mxu0  ;;  %v2697_v53 = vpop.f32.mrf.mxu1 }
 0x6eb   :  { %v3474_v47 = vmul.f32 -1.442695, %v2704_v43  ;;  %v2705_v48 = vadd.f32 %v2654_v46, %v2418_v40  ;;  %v2707_v14 = vadd.f32 %v2697_v53, %v2420_v4  ;;  %v3485_v4 = vld [vmem:[%s4607_s0 + $0xe8] sm:$0xff] }
 0x6ec   :  { %v2656_v50 = vpop.f32.mrf.mxu0  ;;  %v2699_v62 = vpop.f32.mrf.mxu1 }
 0x6ed   :  { %3788 = vpow2.f32 %v3474_v47  ;;  %v3476_v52 = vmul.f32 -1.442695, %v2705_v48  ;;  %v2708_v54 = vadd.f32 %v2656_v50, %v2421_v45  ;;  %v3478_v25 = vmul.f32 -1.442695, %v2707_v14 }
 0x6ee   :  { %v2658_v56 = vpop.f32.mrf.mxu0  ;;  %v2701_v10 = vpop.f32.mrf.mxu1  ;;  %v2710_v24 = vadd.f32 %v2699_v62, %v2423_v26  ;;  %v2787_v14 = vunpack.c.h.bf16 %v3485_v4 }
 0x6ef   :  { %3790 = vpow2.f32 %v3476_v52  ;;  %v3475_v57 = vmul.f32 -1.442695, %v2708_v54  ;;  %v2709_v59 = vadd.f32 %v2658_v56, %v2422_v49  ;;  %v2711_v2 = vadd.f32 %v2701_v10, %v2424_v17  ;;  %v3486_v49 = vld [vmem:[%s4607_s0 + $0xf0] sm:$0xff] }
 0x6f0   :  { %v2788_v52 = vunpack.c.l.bf16 %v3486_v49  ;;  %v2789_v54 = vunpack.c.h.bf16 %v3486_v49 }
 0x6f1   :  { %3792 = vpow2.f32 %v3475_v57  ;;  %v3477_v63 = vmul.f32 -1.442695, %v2709_v59  ;;  %v3479_v5 = vmul.f32 -1.442695, %v2711_v2 }
 0x6f2   :  { %v2796_v58 = vadd.f32 %v2788_v52, %v4160_v9  ;;  %v2797_v62 = vadd.f32 %v2789_v54, %v4165_v12 }
 0x6f3   :  { %3794 = vpow2.f32 %v3477_v63 }
 0x6f4   :  { %3796 = vtanh.f32 %v2706_v1 }
 0x6fa   :  { %v3789_v23 = vpop.eup %3788 }
 0x6fb   :  { %v2718_v16 = vadd.f32 1.0, %v3789_v23  ;;  %v2786_v23 = vunpack.c.l.bf16 %v3485_v4 }
 0x6fc   :  { %v3791_v21 = vpop.eup %3790 }
 0x6fd   :  { %3798 = vrcp.f32 %v2718_v16  ;;  %v2730_v15 = vadd.f32 1.0, %v3791_v21  ;;  %v2795_v16 = vadd.f32 %v2787_v14, %v4177_v6  ;;  %v2794_v21 = vadd.f32 %v2786_v23, %v4179_v11 }
 0x6fe   :  { %v3793_v27 = vpop.eup %3792  ;;  %3800 = vpow2.f32 %v3478_v25 }
 0x6ff   :  { %3802 = vrcp.f32 %v2730_v15  ;;  %v2719_v20 = vadd.f32 1.0, %v3793_v27 }
 0x700   :  { %v3795_v28 = vpop.eup %3794  ;;  %3804 = vpow2.f32 %v3479_v5 }
 0x701   :  { %3806 = vrcp.f32 %v2719_v20  ;;  %v2731_v32 = vadd.f32 1.0, %v3795_v28  ;;  %v3797_v35 = vpop.eup %3796 }
 0x702   :  { %3808 = vtanh.f32 %v2710_v24 }
 0x703   :  { %3810 = vrcp.f32 %v2731_v32 }
 0x70a   :  { %v3799_v29 = vpop.eup %3798 }
 0x70b   :  { %v3801_v31 = vpop.eup %3800  ;;  %v2752_v7 = vmul.f32 %v3799_v29, %v3797_v35 }
 0x70c   :  { %v3803_v3 = vpop.eup %3802  ;;  %v2744_v33 = vadd.f32 1.0, %v3801_v31 }
 0x70d   :  { %v3805_v30 = vpop.eup %3804  ;;  %v2750_v0 = vmul.f32 %v3803_v3, %v4509_v18 }
 0x70e   :  { %v3807_v8 = vpop.eup %3806  ;;  %v2745_v38 = vadd.f32 1.0, %v3805_v30  ;;  %3812 = vrcp.f32 %v2744_v33 }
 0x70f   :  { %v3809_v34 = vpop.eup %3808  ;;  %v4572_v36 = vadd.f32 %v2752_v7, %v2750_v0 }
 0x710   :  { %v3811_v37 = vpop.eup %3810  ;;  %v2753_v39 = vmul.f32 %v3809_v34, %v3807_v8 }
 0x711   :  { %v2751_v40 = vmul.f32 %v3811_v37, %v4512_v19  ;;  %3814 = vtanh.f32 %v4572_v36  ;;  %v3484_v19 = vld [vmem:[%s4607_s0 + $0xe0] sm:$0xff] }
 0x712   :  { %3816 = vrcp.f32 %v2745_v38  ;;  %v2784_v48 = vunpack.c.l.bf16 %v3484_v19  ;;  %v2785_v50 = vunpack.c.h.bf16 %v3484_v19 }
 0x713   :  { %v4575_v41 = vadd.f32 %v2753_v39, %v2751_v40 }
 0x714   :  { %v2792_v51 = vadd.f32 %v2784_v48, %v4160_v9  ;;  %v2793_v53 = vadd.f32 %v2785_v50, %v4165_v12  ;;  %v3487_v9 = vld [vmem:[%s4607_s0 + $0xf8] sm:$0xff] }
 0x715   :  { %3818 = vtanh.f32 %v4575_v41  ;;  %v2791_v12 = vunpack.c.h.bf16 %v3487_v9  ;;  %v2790_v24 = vunpack.c.l.bf16 %v3487_v9 }
 0x717   :  { %v2799_v5 = vadd.f32 %v2791_v12, %v4177_v6  ;;  %v2798_v29 = vadd.f32 %v2790_v24, %v4179_v11 }
 0x71b   :  { %v3813_v42 = vpop.eup %3812 }
 0x71e   :  { %v3815_v18 = vpop.eup %3814 }
 0x71f   :  { %v3817_v43 = vpop.eup %3816  ;;  %v2758_v45 = vmul.f32 %v3815_v18, %v3813_v42 }
 0x722   :  { %v3819_v44 = vpop.eup %3818 }
 0x723   :  { %v2759_v46 = vmul.f32 %v3819_v44, %v3817_v43 }
 0x725   :  { %v3580_v47 = vpack.c.bf16 %v2759_v46, %v2758_v45 }
 0x727   :  { %3592 = vst [vmem:[%s4610_s3 + $0x30] sm:$0xff] %v3580_v47   ;;  %3026 = vmatmul.mubr.bf16.vlgmr.msra.gmra.mxu0 %v3580_v47  ;;  %3069 = vmatmul.mubr.bf16.vlgmr.msra.gmra.mxu1 %v3580_v47 }
 0x7e7   :  { %v3027_v55 = vpop.f32.mrf.mxu0  ;;  %v3070_v57 = vpop.f32.mrf.mxu1 }
 0x7e8   :  { %v3079_v56 = vadd.f32 %v3027_v55, %v2792_v51  ;;  %v3081_v20 = vadd.f32 %v3070_v57, %v2794_v21 }
 0x7e9   :  { %v3029_v59 = vpop.f32.mrf.mxu0  ;;  %v3072_v17 = vpop.f32.mrf.mxu1 }
 0x7ea   :  { %v3520_v60 = vmul.f32 -1.442695, %v3079_v56  ;;  %v3080_v61 = vadd.f32 %v3029_v59, %v2793_v53  ;;  %v3082_v27 = vadd.f32 %v3072_v17, %v2795_v16 }
 0x7eb   :  { %v3031_v63 = vpop.f32.mrf.mxu0  ;;  %v3074_v25 = vpop.f32.mrf.mxu1 }
 0x7ec   :  { %3820 = vpow2.f32 %v3520_v60  ;;  %v3522_v13 = vmul.f32 -1.442695, %v3080_v61  ;;  %v3083_v10 = vadd.f32 %v3031_v63, %v2796_v58  ;;  %v3524_v35 = vmul.f32 -1.442695, %v3082_v27 }
 0x7ed   :  { %v3033_v22 = vpop.f32.mrf.mxu0  ;;  %v3076_v15 = vpop.f32.mrf.mxu1  ;;  %v3085_v8 = vadd.f32 %v3074_v25, %v2798_v29 }
 0x7ee   :  { %3822 = vpow2.f32 %v3522_v13  ;;  %v3521_v1 = vmul.f32 -1.442695, %v3083_v10  ;;  %v3084_v2 = vadd.f32 %v3033_v22, %v2797_v62  ;;  %v3086_v28 = vadd.f32 %v3076_v15, %v2799_v5 }
 0x7f0   :  { %3824 = vpow2.f32 %v3521_v1  ;;  %v3523_v26 = vmul.f32 -1.442695, %v3084_v2  ;;  %v3525_v30 = vmul.f32 -1.442695, %v3086_v28 }
 0x7f2   :  { %3826 = vpow2.f32 %v3523_v26 }
 0x7f3   :  { %3828 = vtanh.f32 %v3081_v20 }
 0x7f9   :  { %v3821_v32 = vpop.eup %3820 }
 0x7fa   :  { %v3093_v31 = vadd.f32 1.0, %v3821_v32 }
 0x7fb   :  { %v3823_v3 = vpop.eup %3822 }
 0x7fc   :  { %3830 = vrcp.f32 %v3093_v31  ;;  %v3105_v7 = vadd.f32 1.0, %v3823_v3 }
 0x7fd   :  { %v3825_v0 = vpop.eup %3824  ;;  %3832 = vpow2.f32 %v3524_v35 }
 0x7fe   :  { %3834 = vrcp.f32 %v3105_v7  ;;  %v3094_v6 = vadd.f32 1.0, %v3825_v0 }
 0x7ff   :  { %v3827_v33 = vpop.eup %3826  ;;  %3836 = vpow2.f32 %v3525_v30 }
 0x800   :  { %3838 = vrcp.f32 %v3094_v6  ;;  %v3106_v34 = vadd.f32 1.0, %v3827_v33  ;;  %v3829_v37 = vpop.eup %3828 }
 0x801   :  { %3840 = vtanh.f32 %v3085_v8 }
 0x802   :  { %3842 = vrcp.f32 %v3106_v34 }
 0x809   :  { %v3831_v38 = vpop.eup %3830 }
 0x80a   :  { %v3833_v11 = vpop.eup %3832  ;;  %v3127_v42 = vmul.f32 %v3831_v38, %v3829_v37 }
 0x80b   :  { %v3835_v39 = vpop.eup %3834  ;;  %v3119_v44 = vadd.f32 1.0, %v3833_v11 }
 0x80c   :  { %v3837_v40 = vpop.eup %3836  ;;  %v3125_v18 = vmul.f32 %v3835_v39, %v4572_v36 }
 0x80d   :  { %v3839_v43 = vpop.eup %3838  ;;  %v3120_v19 = vadd.f32 1.0, %v3837_v40  ;;  %3844 = vrcp.f32 %v3119_v44 }
 0x80e   :  { %v3841_v45 = vpop.eup %3840  ;;  %v3129_v46 = vadd.f32 %v3127_v42, %v3125_v18 }
 0x80f   :  { %v3843_v47 = vpop.eup %3842  ;;  %v3128_v48 = vmul.f32 %v3841_v45, %v3839_v43 }
 0x810   :  { %v3126_v49 = vmul.f32 %v3843_v47, %v4575_v41  ;;  %3846 = vtanh.f32 %v3129_v46 }
 0x811   :  { %3848 = vrcp.f32 %v3120_v19 }
 0x812   :  { %v3130_v50 = vadd.f32 %v3128_v48, %v3126_v49 }
 0x814   :  { %3850 = vtanh.f32 %v3130_v50 }
 0x81a   :  { %v3845_v51 = vpop.eup %3844 }
 0x81d   :  { %v3847_v52 = vpop.eup %3846 }
 0x81e   :  { %v3849_v53 = vpop.eup %3848  ;;  %v3133_v55 = vmul.f32 %v3847_v52, %v3845_v51 }
 0x821   :  { %v3851_v54 = vpop.eup %3850 }
 0x822   :  { %v3134_v36 = vmul.f32 %v3851_v54, %v3849_v53 }
 0x824   :  { %v3585_v56 = vpack.c.bf16 %v3134_v36, %v3133_v55 }
 0x826   :  { %3593 = vst [vmem:[%s4610_s3 + $0x38] sm:$0xff] %v3585_v56  }
 0x827   :  { %3154 = vsyncmov [#allocation5] }
 0x82a   :  { %s3155_s16 = vpop.sfrf %3154 }
 0x82b   :  { %p3530_p0 = scmp.ne.s32.totalorder %s3155_s16, 0 }
 0x82d   :  { %3159 = shalt.err (%p3530_p0)  }

</bundles_post_ra>
